<compile_context>
chip_gen: v5e
topology: v5e:2x2
jax: 0.10.0
libtpu: 0.0.40
codegen_flags: <defaults>
</compile_context>

<pallas_src>
import functools
import math

import jax
import jax.numpy as jnp
from jax.experimental import pallas as pl
from jax.experimental.pallas import tpu as pltpu


# ----------------------------------------------------------------------------
# Fused kernel: i2h dense linear + full routed h2h stack for one batch tile.
# refs = [x, h, w_i2h, b_i2h, (wp_t, bp, we, be) * depth, i2h_out, h2h_out, mask_out]
# ----------------------------------------------------------------------------
def _fused_cell_kernel(*refs, depth, num_experts):
    E = num_experts
    n_in = 4 + 4 * depth
    x_ref, h_ref, wi_ref, bi_ref = refs[0:4]
    i2h_ref, h2h_ref, mask_ref = refs[n_in:n_in + 3]

    tb = x_ref.shape[0]

    # ---- i2h = linear_i2h(x): MXU matmul, bf16 operands / f32 accumulate ----
    i2h = jnp.dot(x_ref[...].astype(jnp.bfloat16), wi_ref[...],
                  preferred_element_type=jnp.float32) + bi_ref[...]
    i2h_ref[...] = i2h.astype(i2h_ref.dtype)

    # ---- h2h = _route_internals(h): fused depth loop, state stays on-chip ----
    cur = h_ref[...].astype(jnp.float32)          # (tb, H) routed activation
    live = jnp.ones((tb, 1), jnp.float32)         # mask (1.0 = still routed)

    for d in range(depth):
        wpt_ref, bp_ref, we_ref, be_ref = refs[4 + 4 * d: 8 + 4 * d]
        cur_bf = cur.astype(jnp.bfloat16)

        # Greedy routing decision (deterministic stand-in for the RL Decision
        # agent).  ONE (tb, Din) x (Din, E) MXU matmul -> (tb, E) logits, then
        # a strict-'>' scan over the E lane-columns (== first argmax).  No
        # per-expert XLU reduces or sublane broadcasts.
        logits = jnp.dot(cur_bf, wpt_ref[...],
                         preferred_element_type=jnp.float32) + bp_ref[...]
        best = logits[:, 0:1]
        action = jnp.zeros((tb, 1), jnp.int32)
        for e in range(1, E):
            le = logits[:, e:e + 1]
            better = le > best
            action = jnp.where(better, jnp.int32(e), action)
            best = jnp.where(better, le, best)

        # mask *= 1 - (action == 0)   (already-dead samples stay dead)
        live = live * (action != 0).astype(jnp.float32)

        # Selection: every expert Linear on the MXU (bf16 x bf16 -> f32 acc),
        # combined with a single select per expert (exactly one expert matches
        # per sample, so where() == one-hot combine but with 1 VALU pass).
        dout = we_ref.shape[-1]
        acc = (jnp.dot(cur_bf, we_ref[0], preferred_element_type=jnp.float32)
               + be_ref[0:1, :])
        for e in range(1, E):
            ye = (jnp.dot(cur_bf, we_ref[e], preferred_element_type=jnp.float32)
                  + be_ref[e:e + 1, :])
            acc = jnp.where(action == e, ye, acc)

        # Masked-out samples pass through unchanged (zeros at depth 0, where
        # the feature width changes H -> 4H and pass-through is impossible).
        if cur.shape[-1] == dout:
            sel_out = jnp.where(live > 0.0, acc, cur)
        else:
            sel_out = jnp.where(live > 0.0, acc, 0.0)

        # nonlin between depths only (matches `if i < routing_depth - 1`).
        cur = jnp.maximum(sel_out, 0.0) if d < depth - 1 else sel_out

    h2h_ref[...] = cur.astype(h2h_ref.dtype)
    mask_ref[...] = live.astype(mask_ref.dtype)   # single (tb, 1) store


def _vmem_limit_bytes():
    """Generation-aware VMEM budget: ~75% of physical (128 MiB v5e/v6e, 64 MiB v7x)."""
    try:
        cap = int(pltpu.get_tpu_info().vmem_capacity_bytes)
        return max(32 * 1024 * 1024, int(0.75 * cap))
    except Exception:
        return 32 * 1024 * 1024   # safe scoped-VMEM default everywhere


def _mxu_rows():
    """MXU M-dimension target: 128 on v5e (4x128^2), 256 on v6e/v7x (2x256^2)."""
    try:
        kind = jax.devices()[0].device_kind.lower()
    except Exception:
        return 128
    if ("v6" in kind) or ("v7" in kind) or ("7x" in kind):
        return 256
    return 128


def _pick_batch_tile(B):
    """Largest divisor of B that fills the MXU M dim and packs bf16 sublanes (x16)."""
    cap = _mxu_rows()
    if B <= cap:
        return B
    for tb in range(cap, 15, -1):
        if B % tb == 0 and tb % 16 == 0:
            return tb
    for tb in range(cap, 7, -1):
        if B % tb == 0 and tb % 8 == 0:
            return tb
    return B


# ----------------------------------------------------------------------------
# Module wrapper reproducing RoutingRNNCellBase (route_h2h path).
# ----------------------------------------------------------------------------
class RoutingRNNCellPallas:
    def __init__(self, in_features, hidden_size, num_selections, depth_routing,
                 key):
        self.in_features = in_features
        self.hidden_size = hidden_size
        self.proj = 4 * hidden_size               # _projection_size
        self.E = num_selections                   # routing_width
        self.depth = depth_routing                # routing_depth

        std = 1.0 / math.sqrt(hidden_size)        # reset_parameters()

        def u(k, shape, dtype=jnp.float32):
            return jax.random.uniform(k, shape, jnp.float32, -std, std).astype(dtype)

        keys = jax.random.split(key, 2 + 4 * depth_routing)
        # linear_i2h: in_features -> 4H.  NOTE: weights held bf16 (MXU / DMA) --
        # a deliberate precision deviation from the f32 PyTorch module.
        self.w_i2h = u(keys[0], (in_features, self.proj), jnp.bfloat16)
        self.b_i2h = u(keys[1], (1, self.proj))

        # routed h2h stack: feature dims [H] + [4H] * depth
        dims = [hidden_size] + [self.proj] * depth_routing
        self.h2h_params = []
        kk = 2
        for d in range(depth_routing):
            # routing head stored PRE-TRANSPOSED (Din, E) bf16 for a single
            # MXU matmul producing (tb, E) logits.
            wpt = u(keys[kk + 0], (dims[d], self.E), jnp.bfloat16)
            bp = u(keys[kk + 1], (1, self.E))
            we = u(keys[kk + 2], (self.E, dims[d], dims[d + 1]), jnp.bfloat16)
            be = u(keys[kk + 3], (self.E, dims[d + 1]))
            self.h2h_params.append((wpt, bp, we, be))
            kk += 4

    # --------------------------------------------------------------------
    def __call__(self, x, h, batch_tile=None):
        try:
            # Single-buffer the constant-index weight inputs (halves weight VMEM).
            return self._forward(x, h, batch_tile, single_buffer_weights=True)
        except Exception:
            # Fallback for jax versions without BlockSpec.pipeline_mode support.
            return self._forward(x, h, batch_tile, single_buffer_weights=False)

    def _forward(self, x, h, batch_tile, single_buffer_weights):
        B = x.shape[0]
        tb = batch_tile if batch_tile is not None else _pick_batch_tile(B)
        assert B % tb == 0 and (tb % 8 == 0 or tb == B), (B, tb)
        grid_steps = B // tb

        def w_spec(shape):
            imap = (lambda b: (0, 0)) if len(shape) == 2 else (lambda b: (0, 0, 0))
            if single_buffer_weights:
                return pl.BlockSpec(shape, imap, pipeline_mode=pl.Buffered(1))
            return pl.BlockSpec(shape, imap)

        inputs = [x, h, self.w_i2h, self.b_i2h]
        in_specs = [
            pl.BlockSpec((tb, self.in_features), lambda b: (b, 0)),
            pl.BlockSpec((tb, self.hidden_size), lambda b: (b, 0)),
            w_spec(self.w_i2h.shape),
            w_spec(self.b_i2h.shape),
        ]
        for wpt, bp, we, be in self.h2h_params:
            inputs += [wpt, bp, we, be]
            in_specs += [w_spec(wpt.shape), w_spec(bp.shape),
                         w_spec(we.shape), w_spec(be.shape)]

        # bf16 activation outputs (halves the dominant output DMA); mask f32.
        out_shape = (
            jax.ShapeDtypeStruct((B, self.proj), jnp.bfloat16),   # i2h
            jax.ShapeDtypeStruct((B, self.proj), jnp.bfloat16),   # h2h
            jax.ShapeDtypeStruct((B, 1), jnp.float32),            # final mask
        )
        out_specs = (
            pl.BlockSpec((tb, self.proj), lambda b: (b, 0)),
            pl.BlockSpec((tb, self.proj), lambda b: (b, 0)),
            pl.BlockSpec((tb, 1), lambda b: (b, 0)),
        )

        # Megacore gating (v7x): marking the batch axis "parallel" makes BOTH
        # TensorCores DMA the full weight stack.  Only split when per-core
        # activation bytes exceed the (duplicated) weight bytes AND there is
        # more than one grid step; otherwise run the grid serially on one core.
        weight_bytes = sum(int(a.size) * a.dtype.itemsize for a in inputs[2:])
        act_bytes = (int(x.size) * x.dtype.itemsize + int(h.size) * h.dtype.itemsize
                     + 2 * B * self.proj * 2 + B * 4)
        use_parallel = grid_steps >= 2 and act_bytes > 2 * weight_bytes
        semantics = ("parallel",) if use_parallel else ("arbitrary",)

        # Advisory cost estimate for the XLA scheduler.
        dims = [self.hidden_size] + [self.proj] * self.depth
        flops = 2 * B * self.in_features * self.proj
        for d in range(self.depth):
            flops += 2 * B * self.E * dims[d] * dims[d + 1]   # expert matmuls
            flops += 2 * B * self.E * dims[d]                 # routing logits
        bytes_accessed = weight_bytes + act_bytes

        kernel = functools.partial(_fused_cell_kernel,
                                   depth=self.depth, num_experts=self.E)
        i2h, h2h, mask = pl.pallas_call(
            kernel,
            grid=(grid_steps,),
            in_specs=in_specs,
            out_specs=out_specs,
            out_shape=out_shape,
            compiler_params=pltpu.CompilerParams(
                dimension_semantics=semantics,
                vmem_limit_bytes=_vmem_limit_bytes()),
            cost_estimate=pl.CostEstimate(flops=flops, transcendentals=0,
                                          bytes_accessed=bytes_accessed),
        )(*inputs)
        return i2h, h2h, mask


# ----------------------------------------------------------------------------
# Pure-JAX reference mirroring the kernel math (bf16 matmuls, f32 accumulate,
# bf16 outputs).  Routing ties between near-equal logits could in principle
# flip between MXU and XLA accumulation order; inputs are continuous random so
# this is vanishingly unlikely at these shapes.
# ----------------------------------------------------------------------------
def _reference_forward(cell, x, h):
    i2h = (jnp.dot(x.astype(jnp.bfloat16), cell.w_i2h,
                   preferred_element_type=jnp.float32) + cell.b_i2h)
    cur = h.astype(jnp.float32)
    live = jnp.ones((h.shape[0], 1), jnp.float32)
    for d, (wpt, bp, we, be) in enumerate(cell.h2h_params):
        cur_bf = cur.astype(jnp.bfloat16)
        logits = (jnp.dot(cur_bf, wpt, preferred_element_type=jnp.float32) + bp)
        action = jnp.argmax(logits, axis=-1)[:, None].astype(jnp.int32)
        live = live * (action != 0).astype(jnp.float32)
        outs = jnp.stack(
            [jnp.dot(cur_bf, we[e], preferred_element_type=jnp.float32) + be[e]
             for e in range(cell.E)], axis=1)                   # (B, E, 4H)
        sel = jnp.take_along_axis(outs, action[:, :, None], axis=1)[:, 0, :]
        if cur.shape[-1] == sel.shape[-1]:
            sel = jnp.where(live > 0.0, sel, cur)
        else:
            sel = jnp.where(live > 0.0, sel, 0.0)
        cur = jnp.maximum(sel, 0.0) if d < cell.depth - 1 else sel
    return i2h.astype(jnp.bfloat16), cur.astype(jnp.bfloat16), live


def _check(i2h, h2h, mask, ri2h, rh2h, rmask, tag):
    f32 = jnp.float32
    assert jnp.allclose(i2h.astype(f32), ri2h.astype(f32),
                        atol=2e-2, rtol=2e-2), f"i2h mismatch ({tag})"
    assert jnp.allclose(h2h.astype(f32), rh2h.astype(f32),
                        atol=2e-2, rtol=2e-2), f"h2h mismatch ({tag})"
    assert jnp.allclose(mask, rmask), f"mask mismatch ({tag})"


if __name__ == "__main__":
    in_features, hidden_size = 16, 32
    num_selections, depth_routing = 4, 2
    batch = 64

    key = jax.random.PRNGKey(0)
    kp, kx, kh = jax.random.split(key, 3)
    cell = RoutingRNNCellPallas(in_features, hidden_size,
                                num_selections, depth_routing, kp)

    x = jax.random.normal(kx, (batch, in_features), jnp.float32)
    h = jax.random.normal(kh, (batch, hidden_size), jnp.float32)

    ri2h, rh2h, rmask = _reference_forward(cell, x, h)

    # Default tile: fills the MXU M dimension (grid=(1,) at this small batch).
    i2h, h2h, mask = cell(x, h)
    jax.block_until_ready((i2h, h2h, mask))
    assert i2h.shape == (batch, 4 * hidden_size)
    assert h2h.shape == (batch, 4 * hidden_size)
    assert mask.shape == (batch, 1)
    _check(i2h, h2h, mask, ri2h, rh2h, rmask, "default tile")

    # Explicit small tile: exercises the multi-step grid pipeline and the
    # megacore-gating / single-buffered-weight paths.
    i2h2, h2h2, mask2 = cell(x, h, batch_tile=16)
    jax.block_until_ready((i2h2, h2h2, mask2))
    _check(i2h2, h2h2, mask2, ri2h, rh2h, rmask, "tile=16")

    print("KERNEL_OK")
</pallas_src>

<mosaic_0001>
module attributes {stable_mosaic.version = 11 : i64} {
  func.func @_fused_cell_kernel(%arg0: i32, %arg1: memref<64x16xf32, #tpu.memory_space<vmem>>, %arg2: memref<64x32xf32, #tpu.memory_space<vmem>>, %arg3: memref<16x128xbf16, #tpu.memory_space<vmem>>, %arg4: memref<1x128xf32, #tpu.memory_space<vmem>>, %arg5: memref<32x4xbf16, #tpu.memory_space<vmem>>, %arg6: memref<1x4xf32, #tpu.memory_space<vmem>>, %arg7: memref<4x32x128xbf16, #tpu.memory_space<vmem>>, %arg8: memref<4x128xf32, #tpu.memory_space<vmem>>, %arg9: memref<128x4xbf16, #tpu.memory_space<vmem>>, %arg10: memref<1x4xf32, #tpu.memory_space<vmem>>, %arg11: memref<4x128x128xbf16, #tpu.memory_space<vmem>>, %arg12: memref<4x128xf32, #tpu.memory_space<vmem>>, %arg13: memref<64x128xbf16, #tpu.memory_space<vmem>>, %arg14: memref<64x128xbf16, #tpu.memory_space<vmem>>, %arg15: memref<64x1xf32, #tpu.memory_space<vmem>>) attributes {dimension_semantics = [#tpu.dimension_semantics<arbitrary>], iteration_bounds = array<i64: 1>, scalar_prefetch = 0 : i64, scratch_operands = 0 : i64, tpu.core_type = #tpu.core_type<tc>, window_params = [{transform_indices = @transform_0, window_bounds = array<i64: 64, 16>}, {transform_indices = @transform_1, window_bounds = array<i64: 64, 32>}, {pipeline_mode = #tpu.pipeline_mode<synchronous>, transform_indices = @transform_2, window_bounds = array<i64: 16, 128>}, {pipeline_mode = #tpu.pipeline_mode<synchronous>, transform_indices = @transform_3, window_bounds = array<i64: 1, 128>}, {pipeline_mode = #tpu.pipeline_mode<synchronous>, transform_indices = @transform_4, window_bounds = array<i64: 32, 4>}, {pipeline_mode = #tpu.pipeline_mode<synchronous>, transform_indices = @transform_5, window_bounds = array<i64: 1, 4>}, {pipeline_mode = #tpu.pipeline_mode<synchronous>, transform_indices = @transform_6, window_bounds = array<i64: 4, 32, 128>}, {pipeline_mode = #tpu.pipeline_mode<synchronous>, transform_indices = @transform_7, window_bounds = array<i64: 4, 128>}, {pipeline_mode = #tpu.pipeline_mode<synchronous>, transform_indices = @transform_8, window_bounds = array<i64: 128, 4>}, {pipeline_mode = #tpu.pipeline_mode<synchronous>, transform_indices = @transform_9, window_bounds = array<i64: 1, 4>}, {pipeline_mode = #tpu.pipeline_mode<synchronous>, transform_indices = @transform_10, window_bounds = array<i64: 4, 128, 128>}, {pipeline_mode = #tpu.pipeline_mode<synchronous>, transform_indices = @transform_11, window_bounds = array<i64: 4, 128>}, {transform_indices = @transform_12, window_bounds = array<i64: 64, 128>}, {transform_indices = @transform_13, window_bounds = array<i64: 64, 128>}, {transform_indices = @transform_14, window_bounds = array<i64: 64, 1>}]} {
    %c0 = arith.constant 0 : index
    %c0_0 = arith.constant 0 : index
    %0 = vector.load %arg1[%c0, %c0_0] : memref<64x16xf32, #tpu.memory_space<vmem>>, vector<64x16xf32>
    %1 = arith.truncf %0 : vector<64x16xf32> to vector<64x16xbf16>
    %c0_1 = arith.constant 0 : index
    %c0_2 = arith.constant 0 : index
    %2 = vector.load %arg3[%c0_1, %c0_2] : memref<16x128xbf16, #tpu.memory_space<vmem>>, vector<16x128xbf16>
    %cst = arith.constant dense<0.000000e+00> : vector<64x128xf32>
    %3 = tpu.matmul %1, %2, %cst {dimension_numbers = #tpu.dot_dimension_numbers<[1], [0], [0], [1], [0, 0, 1, 1], [], []>} : vector<64x16xbf16>, vector<16x128xbf16>, vector<64x128xf32> -> vector<64x128xf32>
    %c0_3 = arith.constant 0 : index
    %c0_4 = arith.constant 0 : index
    %4 = vector.load %arg4[%c0_3, %c0_4] : memref<1x128xf32, #tpu.memory_space<vmem>>, vector<1x128xf32>
    %5 = vector.broadcast %4 : vector<1x128xf32> to vector<64x128xf32>
    %6 = arith.addf %3, %5 : vector<64x128xf32>
    %7 = arith.truncf %6 : vector<64x128xf32> to vector<64x128xbf16>
    %c0_5 = arith.constant 0 : index
    %c0_6 = arith.constant 0 : index
    %8 = vector.load %arg13[%c0_5, %c0_6] : memref<64x128xbf16, #tpu.memory_space<vmem>>, vector<64x128xbf16>
    tpu.vector_store %arg13[%c0_5, %c0_6], %7 {strides = array<i32>} : memref<64x128xbf16, #tpu.memory_space<vmem>>, vector<64x128xbf16>,
    %c0_7 = arith.constant 0 : index
    %c0_8 = arith.constant 0 : index
    %9 = vector.load %arg2[%c0_7, %c0_8] : memref<64x32xf32, #tpu.memory_space<vmem>>, vector<64x32xf32>
    %cst_9 = arith.constant 1.000000e+00 : f32
    %10 = vector.broadcast %cst_9 : f32 to vector<64x1xf32>
    %11 = arith.truncf %9 : vector<64x32xf32> to vector<64x32xbf16>
    %c0_10 = arith.constant 0 : index
    %c0_11 = arith.constant 0 : index
    %12 = vector.load %arg5[%c0_10, %c0_11] : memref<32x4xbf16, #tpu.memory_space<vmem>>, vector<32x4xbf16>
    %cst_12 = arith.constant dense<0.000000e+00> : vector<64x4xf32>
    %13 = tpu.matmul %11, %12, %cst_12 {dimension_numbers = #tpu.dot_dimension_numbers<[1], [0], [0], [1], [0, 0, 1, 1], [], []>} : vector<64x32xbf16>, vector<32x4xbf16>, vector<64x4xf32> -> vector<64x4xf32>
    %c0_13 = arith.constant 0 : index
    %c0_14 = arith.constant 0 : index
    %14 = vector.load %arg6[%c0_13, %c0_14] : memref<1x4xf32, #tpu.memory_space<vmem>>, vector<1x4xf32>
    %15 = vector.broadcast %14 : vector<1x4xf32> to vector<64x4xf32>
    %16 = arith.addf %13, %15 : vector<64x4xf32>
    %17 = vector.extract_strided_slice %16 {offsets = [0, 0], sizes = [64, 1], strides = [1, 1]} : vector<64x4xf32> to vector<64x1xf32>
    %c0_i32 = arith.constant 0 : i32
    %18 = vector.broadcast %c0_i32 : i32 to vector<64x1xi32>
    %19 = vector.extract_strided_slice %16 {offsets = [0, 1], sizes = [64, 1], strides = [1, 1]} : vector<64x4xf32> to vector<64x1xf32>
    %20 = arith.cmpf ogt, %19, %17 : vector<64x1xf32>
    %c1_i32 = arith.constant 1 : i32
    %21 = vector.broadcast %c1_i32 : i32 to vector<64x1xi32>
    %22 = arith.select %20, %21, %18 : vector<64x1xi1>, vector<64x1xi32>
    %23 = arith.select %20, %19, %17 : vector<64x1xi1>, vector<64x1xf32>
    %24 = vector.extract_strided_slice %16 {offsets = [0, 2], sizes = [64, 1], strides = [1, 1]} : vector<64x4xf32> to vector<64x1xf32>
    %25 = arith.cmpf ogt, %24, %23 : vector<64x1xf32>
    %c2_i32 = arith.constant 2 : i32
    %26 = vector.broadcast %c2_i32 : i32 to vector<64x1xi32>
    %27 = arith.select %25, %26, %22 : vector<64x1xi1>, vector<64x1xi32>
    %28 = arith.select %25, %24, %23 : vector<64x1xi1>, vector<64x1xf32>
    %29 = vector.extract_strided_slice %16 {offsets = [0, 3], sizes = [64, 1], strides = [1, 1]} : vector<64x4xf32> to vector<64x1xf32>
    %30 = arith.cmpf ogt, %29, %28 : vector<64x1xf32>
    %c3_i32 = arith.constant 3 : i32
    %31 = vector.broadcast %c3_i32 : i32 to vector<64x1xi32>
    %32 = arith.select %30, %31, %27 : vector<64x1xi1>, vector<64x1xi32>
    %c0_i32_15 = arith.constant 0 : i32
    %33 = vector.broadcast %c0_i32_15 : i32 to vector<64x1xi32>
    %34 = arith.cmpi ne, %32, %33 : vector<64x1xi32>
    %35 = arith.extui %34 : vector<64x1xi1> to vector<64x1xi32>
    %36 = arith.sitofp %35 : vector<64x1xi32> to vector<64x1xf32>
    %37 = arith.mulf %10, %36 : vector<64x1xf32>
    %c0_16 = arith.constant 0 : index
    %c0_17 = arith.constant 0 : index
    %c0_18 = arith.constant 0 : index
    %38 = vector.load %arg7[%c0_16, %c0_17, %c0_18] : memref<4x32x128xbf16, #tpu.memory_space<vmem>>, vector<1x32x128xbf16>
    %39 = vector.shape_cast %38 : vector<1x32x128xbf16> to vector<32x128xbf16>
    %cst_19 = arith.constant dense<0.000000e+00> : vector<64x128xf32>
    %40 = tpu.matmul %11, %39, %cst_19 {dimension_numbers = #tpu.dot_dimension_numbers<[1], [0], [0], [1], [0, 0, 1, 1], [], []>} : vector<64x32xbf16>, vector<32x128xbf16>, vector<64x128xf32> -> vector<64x128xf32>
    %c0_20 = arith.constant 0 : index
    %c0_21 = arith.constant 0 : index
    %41 = vector.load %arg8[%c0_20, %c0_21] : memref<4x128xf32, #tpu.memory_space<vmem>>, vector<1x128xf32>
    %42 = vector.broadcast %41 : vector<1x128xf32> to vector<64x128xf32>
    %43 = arith.addf %40, %42 : vector<64x128xf32>
    %c1 = arith.constant 1 : index
    %c0_22 = arith.constant 0 : index
    %c0_23 = arith.constant 0 : index
    %44 = vector.load %arg7[%c1, %c0_22, %c0_23] : memref<4x32x128xbf16, #tpu.memory_space<vmem>>, vector<1x32x128xbf16>
    %45 = vector.shape_cast %44 : vector<1x32x128xbf16> to vector<32x128xbf16>
    %cst_24 = arith.constant dense<0.000000e+00> : vector<64x128xf32>
    %46 = tpu.matmul %11, %45, %cst_24 {dimension_numbers = #tpu.dot_dimension_numbers<[1], [0], [0], [1], [0, 0, 1, 1], [], []>} : vector<64x32xbf16>, vector<32x128xbf16>, vector<64x128xf32> -> vector<64x128xf32>
    %c1_25 = arith.constant 1 : index
    %c0_26 = arith.constant 0 : index
    %47 = vector.load %arg8[%c1_25, %c0_26] : memref<4x128xf32, #tpu.memory_space<vmem>>, vector<1x128xf32>
    %48 = vector.broadcast %47 : vector<1x128xf32> to vector<64x128xf32>
    %49 = arith.addf %46, %48 : vector<64x128xf32>
    %c1_i32_27 = arith.constant 1 : i32
    %50 = vector.broadcast %c1_i32_27 : i32 to vector<64x1xi32>
    %51 = arith.cmpi eq, %32, %50 : vector<64x1xi32>
    %52 = vector.shape_cast %51 : vector<64x1xi1> to vector<64x1xi1>
    %53 = vector.broadcast %52 : vector<64x1xi1> to vector<64x128xi1>
    %54 = arith.select %53, %49, %43 : vector<64x128xi1>, vector<64x128xf32>
    %c2 = arith.constant 2 : index
    %c0_28 = arith.constant 0 : index
    %c0_29 = arith.constant 0 : index
    %55 = vector.load %arg7[%c2, %c0_28, %c0_29] : memref<4x32x128xbf16, #tpu.memory_space<vmem>>, vector<1x32x128xbf16>
    %56 = vector.shape_cast %55 : vector<1x32x128xbf16> to vector<32x128xbf16>
    %cst_30 = arith.constant dense<0.000000e+00> : vector<64x128xf32>
    %57 = tpu.matmul %11, %56, %cst_30 {dimension_numbers = #tpu.dot_dimension_numbers<[1], [0], [0], [1], [0, 0, 1, 1], [], []>} : vector<64x32xbf16>, vector<32x128xbf16>, vector<64x128xf32> -> vector<64x128xf32>
    %c2_31 = arith.constant 2 : index
    %c0_32 = arith.constant 0 : index
    %58 = vector.load %arg8[%c2_31, %c0_32] : memref<4x128xf32, #tpu.memory_space<vmem>>, vector<1x128xf32>
    %59 = vector.broadcast %58 : vector<1x128xf32> to vector<64x128xf32>
    %60 = arith.addf %57, %59 : vector<64x128xf32>
    %c2_i32_33 = arith.constant 2 : i32
    %61 = vector.broadcast %c2_i32_33 : i32 to vector<64x1xi32>
    %62 = arith.cmpi eq, %32, %61 : vector<64x1xi32>
    %63 = vector.shape_cast %62 : vector<64x1xi1> to vector<64x1xi1>
    %64 = vector.broadcast %63 : vector<64x1xi1> to vector<64x128xi1>
    %65 = arith.select %64, %60, %54 : vector<64x128xi1>, vector<64x128xf32>
    %c3 = arith.constant 3 : index
    %c0_34 = arith.constant 0 : index
    %c0_35 = arith.constant 0 : index
    %66 = vector.load %arg7[%c3, %c0_34, %c0_35] : memref<4x32x128xbf16, #tpu.memory_space<vmem>>, vector<1x32x128xbf16>
    %67 = vector.shape_cast %66 : vector<1x32x128xbf16> to vector<32x128xbf16>
    %cst_36 = arith.constant dense<0.000000e+00> : vector<64x128xf32>
    %68 = tpu.matmul %11, %67, %cst_36 {dimension_numbers = #tpu.dot_dimension_numbers<[1], [0], [0], [1], [0, 0, 1, 1], [], []>} : vector<64x32xbf16>, vector<32x128xbf16>, vector<64x128xf32> -> vector<64x128xf32>
    %c3_37 = arith.constant 3 : index
    %c0_38 = arith.constant 0 : index
    %69 = vector.load %arg8[%c3_37, %c0_38] : memref<4x128xf32, #tpu.memory_space<vmem>>, vector<1x128xf32>
    %70 = vector.broadcast %69 : vector<1x128xf32> to vector<64x128xf32>
    %71 = arith.addf %68, %70 : vector<64x128xf32>
    %c3_i32_39 = arith.constant 3 : i32
    %72 = vector.broadcast %c3_i32_39 : i32 to vector<64x1xi32>
    %73 = arith.cmpi eq, %32, %72 : vector<64x1xi32>
    %74 = vector.shape_cast %73 : vector<64x1xi1> to vector<64x1xi1>
    %75 = vector.broadcast %74 : vector<64x1xi1> to vector<64x128xi1>
    %76 = arith.select %75, %71, %65 : vector<64x128xi1>, vector<64x128xf32>
    %cst_40 = arith.constant 0.000000e+00 : f32
    %77 = vector.broadcast %cst_40 : f32 to vector<64x1xf32>
    %78 = arith.cmpf ogt, %37, %77 : vector<64x1xf32>
    %cst_41 = arith.constant 0.000000e+00 : f32
    %79 = vector.shape_cast %78 : vector<64x1xi1> to vector<64x1xi1>
    %80 = vector.broadcast %79 : vector<64x1xi1> to vector<64x128xi1>
    %81 = vector.broadcast %cst_41 : f32 to vector<64x128xf32>
    %82 = arith.select %80, %76, %81 : vector<64x128xi1>, vector<64x128xf32>
    %cst_42 = arith.constant 0.000000e+00 : f32
    %83 = vector.broadcast %cst_42 : f32 to vector<64x128xf32>
    %84 = arith.maximumf %82, %83 : vector<64x128xf32>
    %85 = arith.truncf %84 : vector<64x128xf32> to vector<64x128xbf16>
    %c0_43 = arith.constant 0 : index
    %c0_44 = arith.constant 0 : index
    %86 = vector.load %arg9[%c0_43, %c0_44] : memref<128x4xbf16, #tpu.memory_space<vmem>>, vector<128x4xbf16>
    %cst_45 = arith.constant dense<0.000000e+00> : vector<64x4xf32>
    %87 = tpu.matmul %85, %86, %cst_45 {dimension_numbers = #tpu.dot_dimension_numbers<[1], [0], [0], [1], [0, 0, 1, 1], [], []>} : vector<64x128xbf16>, vector<128x4xbf16>, vector<64x4xf32> -> vector<64x4xf32>
    %c0_46 = arith.constant 0 : index
    %c0_47 = arith.constant 0 : index
    %88 = vector.load %arg10[%c0_46, %c0_47] : memref<1x4xf32, #tpu.memory_space<vmem>>, vector<1x4xf32>
    %89 = vector.broadcast %88 : vector<1x4xf32> to vector<64x4xf32>
    %90 = arith.addf %87, %89 : vector<64x4xf32>
    %91 = vector.extract_strided_slice %90 {offsets = [0, 0], sizes = [64, 1], strides = [1, 1]} : vector<64x4xf32> to vector<64x1xf32>
    %c0_i32_48 = arith.constant 0 : i32
    %92 = vector.broadcast %c0_i32_48 : i32 to vector<64x1xi32>
    %93 = vector.extract_strided_slice %90 {offsets = [0, 1], sizes = [64, 1], strides = [1, 1]} : vector<64x4xf32> to vector<64x1xf32>
    %94 = arith.cmpf ogt, %93, %91 : vector<64x1xf32>
    %c1_i32_49 = arith.constant 1 : i32
    %95 = vector.broadcast %c1_i32_49 : i32 to vector<64x1xi32>
    %96 = arith.select %94, %95, %92 : vector<64x1xi1>, vector<64x1xi32>
    %97 = arith.select %94, %93, %91 : vector<64x1xi1>, vector<64x1xf32>
    %98 = vector.extract_strided_slice %90 {offsets = [0, 2], sizes = [64, 1], strides = [1, 1]} : vector<64x4xf32> to vector<64x1xf32>
    %99 = arith.cmpf ogt, %98, %97 : vector<64x1xf32>
    %c2_i32_50 = arith.constant 2 : i32
    %100 = vector.broadcast %c2_i32_50 : i32 to vector<64x1xi32>
    %101 = arith.select %99, %100, %96 : vector<64x1xi1>, vector<64x1xi32>
    %102 = arith.select %99, %98, %97 : vector<64x1xi1>, vector<64x1xf32>
    %103 = vector.extract_strided_slice %90 {offsets = [0, 3], sizes = [64, 1], strides = [1, 1]} : vector<64x4xf32> to vector<64x1xf32>
    %104 = arith.cmpf ogt, %103, %102 : vector<64x1xf32>
    %c3_i32_51 = arith.constant 3 : i32
    %105 = vector.broadcast %c3_i32_51 : i32 to vector<64x1xi32>
    %106 = arith.select %104, %105, %101 : vector<64x1xi1>, vector<64x1xi32>
    %c0_i32_52 = arith.constant 0 : i32
    %107 = vector.broadcast %c0_i32_52 : i32 to vector<64x1xi32>
    %108 = arith.cmpi ne, %106, %107 : vector<64x1xi32>
    %109 = arith.extui %108 : vector<64x1xi1> to vector<64x1xi32>
    %110 = arith.sitofp %109 : vector<64x1xi32> to vector<64x1xf32>
    %111 = arith.mulf %37, %110 : vector<64x1xf32>
    %c0_53 = arith.constant 0 : index
    %c0_54 = arith.constant 0 : index
    %c0_55 = arith.constant 0 : index
    %112 = vector.load %arg11[%c0_53, %c0_54, %c0_55] : memref<4x128x128xbf16, #tpu.memory_space<vmem>>, vector<1x128x128xbf16>
    %113 = vector.shape_cast %112 : vector<1x128x128xbf16> to vector<128x128xbf16>
    %cst_56 = arith.constant dense<0.000000e+00> : vector<64x128xf32>
    %114 = tpu.matmul %85, %113, %cst_56 {dimension_numbers = #tpu.dot_dimension_numbers<[1], [0], [0], [1], [0, 0, 1, 1], [], []>} : vector<64x128xbf16>, vector<128x128xbf16>, vector<64x128xf32> -> vector<64x128xf32>
    %c0_57 = arith.constant 0 : index
    %c0_58 = arith.constant 0 : index
    %115 = vector.load %arg12[%c0_57, %c0_58] : memref<4x128xf32, #tpu.memory_space<vmem>>, vector<1x128xf32>
    %116 = vector.broadcast %115 : vector<1x128xf32> to vector<64x128xf32>
    %117 = arith.addf %114, %116 : vector<64x128xf32>
    %c1_59 = arith.constant 1 : index
    %c0_60 = arith.constant 0 : index
    %c0_61 = arith.constant 0 : index
    %118 = vector.load %arg11[%c1_59, %c0_60, %c0_61] : memref<4x128x128xbf16, #tpu.memory_space<vmem>>, vector<1x128x128xbf16>
    %119 = vector.shape_cast %118 : vector<1x128x128xbf16> to vector<128x128xbf16>
    %cst_62 = arith.constant dense<0.000000e+00> : vector<64x128xf32>
    %120 = tpu.matmul %85, %119, %cst_62 {dimension_numbers = #tpu.dot_dimension_numbers<[1], [0], [0], [1], [0, 0, 1, 1], [], []>} : vector<64x128xbf16>, vector<128x128xbf16>, vector<64x128xf32> -> vector<64x128xf32>
    %c1_63 = arith.constant 1 : index
    %c0_64 = arith.constant 0 : index
    %121 = vector.load %arg12[%c1_63, %c0_64] : memref<4x128xf32, #tpu.memory_space<vmem>>, vector<1x128xf32>
    %122 = vector.broadcast %121 : vector<1x128xf32> to vector<64x128xf32>
    %123 = arith.addf %120, %122 : vector<64x128xf32>
    %c1_i32_65 = arith.constant 1 : i32
    %124 = vector.broadcast %c1_i32_65 : i32 to vector<64x1xi32>
    %125 = arith.cmpi eq, %106, %124 : vector<64x1xi32>
    %126 = vector.shape_cast %125 : vector<64x1xi1> to vector<64x1xi1>
    %127 = vector.broadcast %126 : vector<64x1xi1> to vector<64x128xi1>
    %128 = arith.select %127, %123, %117 : vector<64x128xi1>, vector<64x128xf32>
    %c2_66 = arith.constant 2 : index
    %c0_67 = arith.constant 0 : index
    %c0_68 = arith.constant 0 : index
    %129 = vector.load %arg11[%c2_66, %c0_67, %c0_68] : memref<4x128x128xbf16, #tpu.memory_space<vmem>>, vector<1x128x128xbf16>
    %130 = vector.shape_cast %129 : vector<1x128x128xbf16> to vector<128x128xbf16>
    %cst_69 = arith.constant dense<0.000000e+00> : vector<64x128xf32>
    %131 = tpu.matmul %85, %130, %cst_69 {dimension_numbers = #tpu.dot_dimension_numbers<[1], [0], [0], [1], [0, 0, 1, 1], [], []>} : vector<64x128xbf16>, vector<128x128xbf16>, vector<64x128xf32> -> vector<64x128xf32>
    %c2_70 = arith.constant 2 : index
    %c0_71 = arith.constant 0 : index
    %132 = vector.load %arg12[%c2_70, %c0_71] : memref<4x128xf32, #tpu.memory_space<vmem>>, vector<1x128xf32>
    %133 = vector.broadcast %132 : vector<1x128xf32> to vector<64x128xf32>
    %134 = arith.addf %131, %133 : vector<64x128xf32>
    %c2_i32_72 = arith.constant 2 : i32
    %135 = vector.broadcast %c2_i32_72 : i32 to vector<64x1xi32>
    %136 = arith.cmpi eq, %106, %135 : vector<64x1xi32>
    %137 = vector.shape_cast %136 : vector<64x1xi1> to vector<64x1xi1>
    %138 = vector.broadcast %137 : vector<64x1xi1> to vector<64x128xi1>
    %139 = arith.select %138, %134, %128 : vector<64x128xi1>, vector<64x128xf32>
    %c3_73 = arith.constant 3 : index
    %c0_74 = arith.constant 0 : index
    %c0_75 = arith.constant 0 : index
    %140 = vector.load %arg11[%c3_73, %c0_74, %c0_75] : memref<4x128x128xbf16, #tpu.memory_space<vmem>>, vector<1x128x128xbf16>
    %141 = vector.shape_cast %140 : vector<1x128x128xbf16> to vector<128x128xbf16>
    %cst_76 = arith.constant dense<0.000000e+00> : vector<64x128xf32>
    %142 = tpu.matmul %85, %141, %cst_76 {dimension_numbers = #tpu.dot_dimension_numbers<[1], [0], [0], [1], [0, 0, 1, 1], [], []>} : vector<64x128xbf16>, vector<128x128xbf16>, vector<64x128xf32> -> vector<64x128xf32>
    %c3_77 = arith.constant 3 : index
    %c0_78 = arith.constant 0 : index
    %143 = vector.load %arg12[%c3_77, %c0_78] : memref<4x128xf32, #tpu.memory_space<vmem>>, vector<1x128xf32>
    %144 = vector.broadcast %143 : vector<1x128xf32> to vector<64x128xf32>
    %145 = arith.addf %142, %144 : vector<64x128xf32>
    %c3_i32_79 = arith.constant 3 : i32
    %146 = vector.broadcast %c3_i32_79 : i32 to vector<64x1xi32>
    %147 = arith.cmpi eq, %106, %146 : vector<64x1xi32>
    %148 = vector.shape_cast %147 : vector<64x1xi1> to vector<64x1xi1>
    %149 = vector.broadcast %148 : vector<64x1xi1> to vector<64x128xi1>
    %150 = arith.select %149, %145, %139 : vector<64x128xi1>, vector<64x128xf32>
    %cst_80 = arith.constant 0.000000e+00 : f32
    %151 = vector.broadcast %cst_80 : f32 to vector<64x1xf32>
    %152 = arith.cmpf ogt, %111, %151 : vector<64x1xf32>
    %153 = vector.shape_cast %152 : vector<64x1xi1> to vector<64x1xi1>
    %154 = vector.broadcast %153 : vector<64x1xi1> to vector<64x128xi1>
    %155 = arith.select %154, %150, %84 : vector<64x128xi1>, vector<64x128xf32>
    %156 = arith.truncf %155 : vector<64x128xf32> to vector<64x128xbf16>
    %c0_81 = arith.constant 0 : index
    %c0_82 = arith.constant 0 : index
    %157 = vector.load %arg14[%c0_81, %c0_82] : memref<64x128xbf16, #tpu.memory_space<vmem>>, vector<64x128xbf16>
    tpu.vector_store %arg14[%c0_81, %c0_82], %156 {strides = array<i32>} : memref<64x128xbf16, #tpu.memory_space<vmem>>, vector<64x128xbf16>,
    %c0_83 = arith.constant 0 : index
    %c0_84 = arith.constant 0 : index
    %158 = vector.load %arg15[%c0_83, %c0_84] : memref<64x1xf32, #tpu.memory_space<vmem>>, vector<64x1xf32>
    tpu.vector_store %arg15[%c0_83, %c0_84], %111 {strides = array<i32>} : memref<64x1xf32, #tpu.memory_space<vmem>>, vector<64x1xf32>,
    return
  }
  func.func @transform_0(%arg0: i32) -> (i32, i32) {
    %c0_i32 = arith.constant 0 : i32
    %c0_i32_0 = arith.constant 0 : i32
    return %arg0, %c0_i32 : i32, i32
  }
  func.func @transform_1(%arg0: i32) -> (i32, i32) {
    %c0_i32 = arith.constant 0 : i32
    %c0_i32_0 = arith.constant 0 : i32
    return %arg0, %c0_i32 : i32, i32
  }
  func.func @transform_2(%arg0: i32) -> (i32, i32) {
    %c0_i32 = arith.constant 0 : i32
    %c0_i32_0 = arith.constant 0 : i32
    %c0_i32_1 = arith.constant 0 : i32
    return %c0_i32, %c0_i32_0 : i32, i32
  }
  func.func @transform_3(%arg0: i32) -> (i32, i32) {
    %c0_i32 = arith.constant 0 : i32
    %c0_i32_0 = arith.constant 0 : i32
    %c0_i32_1 = arith.constant 0 : i32
    return %c0_i32, %c0_i32_0 : i32, i32
  }
  func.func @transform_4(%arg0: i32) -> (i32, i32) {
    %c0_i32 = arith.constant 0 : i32
    %c0_i32_0 = arith.constant 0 : i32
    %c0_i32_1 = arith.constant 0 : i32
    return %c0_i32, %c0_i32_0 : i32, i32
  }
  func.func @transform_5(%arg0: i32) -> (i32, i32) {
    %c0_i32 = arith.constant 0 : i32
    %c0_i32_0 = arith.constant 0 : i32
    %c0_i32_1 = arith.constant 0 : i32
    return %c0_i32, %c0_i32_0 : i32, i32
  }
  func.func @transform_6(%arg0: i32) -> (i32, i32, i32) {
    %c0_i32 = arith.constant 0 : i32
    %c0_i32_0 = arith.constant 0 : i32
    %c0_i32_1 = arith.constant 0 : i32
    %c0_i32_2 = arith.constant 0 : i32
    return %c0_i32, %c0_i32_0, %c0_i32_1 : i32, i32, i32
  }
  func.func @transform_7(%arg0: i32) -> (i32, i32) {
    %c0_i32 = arith.constant 0 : i32
    %c0_i32_0 = arith.constant 0 : i32
    %c0_i32_1 = arith.constant 0 : i32
    return %c0_i32, %c0_i32_0 : i32, i32
  }
  func.func @transform_8(%arg0: i32) -> (i32, i32) {
    %c0_i32 = arith.constant 0 : i32
    %c0_i32_0 = arith.constant 0 : i32
    %c0_i32_1 = arith.constant 0 : i32
    return %c0_i32, %c0_i32_0 : i32, i32
  }
  func.func @transform_9(%arg0: i32) -> (i32, i32) {
    %c0_i32 = arith.constant 0 : i32
    %c0_i32_0 = arith.constant 0 : i32
    %c0_i32_1 = arith.constant 0 : i32
    return %c0_i32, %c0_i32_0 : i32, i32
  }
  func.func @transform_10(%arg0: i32) -> (i32, i32, i32) {
    %c0_i32 = arith.constant 0 : i32
    %c0_i32_0 = arith.constant 0 : i32
    %c0_i32_1 = arith.constant 0 : i32
    %c0_i32_2 = arith.constant 0 : i32
    return %c0_i32, %c0_i32_0, %c0_i32_1 : i32, i32, i32
  }
  func.func @transform_11(%arg0: i32) -> (i32, i32) {
    %c0_i32 = arith.constant 0 : i32
    %c0_i32_0 = arith.constant 0 : i32
    %c0_i32_1 = arith.constant 0 : i32
    return %c0_i32, %c0_i32_0 : i32, i32
  }
  func.func @transform_12(%arg0: i32) -> (i32, i32) {
    %c0_i32 = arith.constant 0 : i32
    %c0_i32_0 = arith.constant 0 : i32
    return %arg0, %c0_i32 : i32, i32
  }
  func.func @transform_13(%arg0: i32) -> (i32, i32) {
    %c0_i32 = arith.constant 0 : i32
    %c0_i32_0 = arith.constant 0 : i32
    return %arg0, %c0_i32 : i32, i32
  }
  func.func @transform_14(%arg0: i32) -> (i32, i32) {
    %c0_i32 = arith.constant 0 : i32
    %c0_i32_0 = arith.constant 0 : i32
    return %arg0, %c0_i32 : i32, i32
  }
}

module attributes {stable_mosaic.version = 11 : i64} {
  func.func @_fused_cell_kernel(%arg0: i32, %arg1: memref<64x16xf32, #tpu.memory_space<vmem>>, %arg2: memref<64x32xf32, #tpu.memory_space<vmem>>, %arg3: memref<16x128xbf16, #tpu.memory_space<vmem>>, %arg4: memref<1x128xf32, #tpu.memory_space<vmem>>, %arg5: memref<32x4xbf16, #tpu.memory_space<vmem>>, %arg6: memref<1x4xf32, #tpu.memory_space<vmem>>, %arg7: memref<4x32x128xbf16, #tpu.memory_space<vmem>>, %arg8: memref<4x128xf32, #tpu.memory_space<vmem>>, %arg9: memref<128x4xbf16, #tpu.memory_space<vmem>>, %arg10: memref<1x4xf32, #tpu.memory_space<vmem>>, %arg11: memref<4x128x128xbf16, #tpu.memory_space<vmem>>, %arg12: memref<4x128xf32, #tpu.memory_space<vmem>>, %arg13: memref<64x128xbf16, #tpu.memory_space<vmem>>, %arg14: memref<64x128xbf16, #tpu.memory_space<vmem>>, %arg15: memref<64x1xf32, #tpu.memory_space<vmem>>) attributes {dimension_semantics = [#tpu.dimension_semantics<arbitrary>], iteration_bounds = array<i64: 1>, scalar_prefetch = 0 : i64, scratch_operands = 0 : i64, tpu.core_type = #tpu.core_type<tc>, window_params = [{transform_indices = @transform_0, window_bounds = array<i64: 64, 16>}, {transform_indices = @transform_1, window_bounds = array<i64: 64, 32>}, {pipeline_mode = #tpu.pipeline_mode<synchronous>, transform_indices = @transform_2, window_bounds = array<i64: 16, 128>}, {pipeline_mode = #tpu.pipeline_mode<synchronous>, transform_indices = @transform_3, window_bounds = array<i64: 1, 128>}, {pipeline_mode = #tpu.pipeline_mode<synchronous>, transform_indices = @transform_4, window_bounds = array<i64: 32, 4>}, {pipeline_mode = #tpu.pipeline_mode<synchronous>, transform_indices = @transform_5, window_bounds = array<i64: 1, 4>}, {pipeline_mode = #tpu.pipeline_mode<synchronous>, transform_indices = @transform_6, window_bounds = array<i64: 4, 32, 128>}, {pipeline_mode = #tpu.pipeline_mode<synchronous>, transform_indices = @transform_7, window_bounds = array<i64: 4, 128>}, {pipeline_mode = #tpu.pipeline_mode<synchronous>, transform_indices = @transform_8, window_bounds = array<i64: 128, 4>}, {pipeline_mode = #tpu.pipeline_mode<synchronous>, transform_indices = @transform_9, window_bounds = array<i64: 1, 4>}, {pipeline_mode = #tpu.pipeline_mode<synchronous>, transform_indices = @transform_10, window_bounds = array<i64: 4, 128, 128>}, {pipeline_mode = #tpu.pipeline_mode<synchronous>, transform_indices = @transform_11, window_bounds = array<i64: 4, 128>}, {transform_indices = @transform_12, window_bounds = array<i64: 64, 128>}, {transform_indices = @transform_13, window_bounds = array<i64: 64, 128>}, {transform_indices = @transform_14, window_bounds = array<i64: 64, 1>}]} {
    %c0 = arith.constant 0 : index
    %c0_0 = arith.constant 0 : index
    %0 = vector.load %arg1[%c0, %c0_0] : memref<64x16xf32, #tpu.memory_space<vmem>>, vector<64x16xf32>
    %1 = arith.truncf %0 : vector<64x16xf32> to vector<64x16xbf16>
    %c0_1 = arith.constant 0 : index
    %c0_2 = arith.constant 0 : index
    %2 = vector.load %arg3[%c0_1, %c0_2] : memref<16x128xbf16, #tpu.memory_space<vmem>>, vector<16x128xbf16>
    %cst = arith.constant dense<0.000000e+00> : vector<64x128xf32>
    %3 = tpu.matmul %1, %2, %cst {dimension_numbers = #tpu.dot_dimension_numbers<[1], [0], [0], [1], [0, 0, 1, 1], [], []>} : vector<64x16xbf16>, vector<16x128xbf16>, vector<64x128xf32> -> vector<64x128xf32>
    %c0_3 = arith.constant 0 : index
    %c0_4 = arith.constant 0 : index
    %4 = vector.load %arg4[%c0_3, %c0_4] : memref<1x128xf32, #tpu.memory_space<vmem>>, vector<1x128xf32>
    %5 = vector.broadcast %4 : vector<1x128xf32> to vector<64x128xf32>
    %6 = arith.addf %3, %5 : vector<64x128xf32>
    %7 = arith.truncf %6 : vector<64x128xf32> to vector<64x128xbf16>
    %c0_5 = arith.constant 0 : index
    %c0_6 = arith.constant 0 : index
    %8 = vector.load %arg13[%c0_5, %c0_6] : memref<64x128xbf16, #tpu.memory_space<vmem>>, vector<64x128xbf16>
    tpu.vector_store %arg13[%c0_5, %c0_6], %7 {strides = array<i32>} : memref<64x128xbf16, #tpu.memory_space<vmem>>, vector<64x128xbf16>,
    %c0_7 = arith.constant 0 : index
    %c0_8 = arith.constant 0 : index
    %9 = vector.load %arg2[%c0_7, %c0_8] : memref<64x32xf32, #tpu.memory_space<vmem>>, vector<64x32xf32>
    %cst_9 = arith.constant 1.000000e+00 : f32
    %10 = vector.broadcast %cst_9 : f32 to vector<64x1xf32>
    %11 = arith.truncf %9 : vector<64x32xf32> to vector<64x32xbf16>
    %c0_10 = arith.constant 0 : index
    %c0_11 = arith.constant 0 : index
    %12 = vector.load %arg5[%c0_10, %c0_11] : memref<32x4xbf16, #tpu.memory_space<vmem>>, vector<32x4xbf16>
    %cst_12 = arith.constant dense<0.000000e+00> : vector<64x4xf32>
    %13 = tpu.matmul %11, %12, %cst_12 {dimension_numbers = #tpu.dot_dimension_numbers<[1], [0], [0], [1], [0, 0, 1, 1], [], []>} : vector<64x32xbf16>, vector<32x4xbf16>, vector<64x4xf32> -> vector<64x4xf32>
    %c0_13 = arith.constant 0 : index
    %c0_14 = arith.constant 0 : index
    %14 = vector.load %arg6[%c0_13, %c0_14] : memref<1x4xf32, #tpu.memory_space<vmem>>, vector<1x4xf32>
    %15 = vector.broadcast %14 : vector<1x4xf32> to vector<64x4xf32>
    %16 = arith.addf %13, %15 : vector<64x4xf32>
    %17 = vector.extract_strided_slice %16 {offsets = [0, 0], sizes = [64, 1], strides = [1, 1]} : vector<64x4xf32> to vector<64x1xf32>
    %c0_i32 = arith.constant 0 : i32
    %18 = vector.broadcast %c0_i32 : i32 to vector<64x1xi32>
    %19 = vector.extract_strided_slice %16 {offsets = [0, 1], sizes = [64, 1], strides = [1, 1]} : vector<64x4xf32> to vector<64x1xf32>
    %20 = arith.cmpf ogt, %19, %17 : vector<64x1xf32>
    %c1_i32 = arith.constant 1 : i32
    %21 = vector.broadcast %c1_i32 : i32 to vector<64x1xi32>
    %22 = arith.select %20, %21, %18 : vector<64x1xi1>, vector<64x1xi32>
    %23 = arith.select %20, %19, %17 : vector<64x1xi1>, vector<64x1xf32>
    %24 = vector.extract_strided_slice %16 {offsets = [0, 2], sizes = [64, 1], strides = [1, 1]} : vector<64x4xf32> to vector<64x1xf32>
    %25 = arith.cmpf ogt, %24, %23 : vector<64x1xf32>
    %c2_i32 = arith.constant 2 : i32
    %26 = vector.broadcast %c2_i32 : i32 to vector<64x1xi32>
    %27 = arith.select %25, %26, %22 : vector<64x1xi1>, vector<64x1xi32>
    %28 = arith.select %25, %24, %23 : vector<64x1xi1>, vector<64x1xf32>
    %29 = vector.extract_strided_slice %16 {offsets = [0, 3], sizes = [64, 1], strides = [1, 1]} : vector<64x4xf32> to vector<64x1xf32>
    %30 = arith.cmpf ogt, %29, %28 : vector<64x1xf32>
    %c3_i32 = arith.constant 3 : i32
    %31 = vector.broadcast %c3_i32 : i32 to vector<64x1xi32>
    %32 = arith.select %30, %31, %27 : vector<64x1xi1>, vector<64x1xi32>
    %c0_i32_15 = arith.constant 0 : i32
    %33 = vector.broadcast %c0_i32_15 : i32 to vector<64x1xi32>
    %34 = arith.cmpi ne, %32, %33 : vector<64x1xi32>
    %35 = arith.extui %34 : vector<64x1xi1> to vector<64x1xi32>
    %36 = arith.sitofp %35 : vector<64x1xi32> to vector<64x1xf32>
    %37 = arith.mulf %10, %36 : vector<64x1xf32>
    %c0_16 = arith.constant 0 : index
    %c0_17 = arith.constant 0 : index
    %c0_18 = arith.constant 0 : index
    %38 = vector.load %arg7[%c0_16, %c0_17, %c0_18] : memref<4x32x128xbf16, #tpu.memory_space<vmem>>, vector<1x32x128xbf16>
    %39 = vector.shape_cast %38 : vector<1x32x128xbf16> to vector<32x128xbf16>
    %cst_19 = arith.constant dense<0.000000e+00> : vector<64x128xf32>
    %40 = tpu.matmul %11, %39, %cst_19 {dimension_numbers = #tpu.dot_dimension_numbers<[1], [0], [0], [1], [0, 0, 1, 1], [], []>} : vector<64x32xbf16>, vector<32x128xbf16>, vector<64x128xf32> -> vector<64x128xf32>
    %c0_20 = arith.constant 0 : index
    %c0_21 = arith.constant 0 : index
    %41 = vector.load %arg8[%c0_20, %c0_21] : memref<4x128xf32, #tpu.memory_space<vmem>>, vector<1x128xf32>
    %42 = vector.broadcast %41 : vector<1x128xf32> to vector<64x128xf32>
    %43 = arith.addf %40, %42 : vector<64x128xf32>
    %c1 = arith.constant 1 : index
    %c0_22 = arith.constant 0 : index
    %c0_23 = arith.constant 0 : index
    %44 = vector.load %arg7[%c1, %c0_22, %c0_23] : memref<4x32x128xbf16, #tpu.memory_space<vmem>>, vector<1x32x128xbf16>
    %45 = vector.shape_cast %44 : vector<1x32x128xbf16> to vector<32x128xbf16>
    %cst_24 = arith.constant dense<0.000000e+00> : vector<64x128xf32>
    %46 = tpu.matmul %11, %45, %cst_24 {dimension_numbers = #tpu.dot_dimension_numbers<[1], [0], [0], [1], [0, 0, 1, 1], [], []>} : vector<64x32xbf16>, vector<32x128xbf16>, vector<64x128xf32> -> vector<64x128xf32>
    %c1_25 = arith.constant 1 : index
    %c0_26 = arith.constant 0 : index
    %47 = vector.load %arg8[%c1_25, %c0_26] : memref<4x128xf32, #tpu.memory_space<vmem>>, vector<1x128xf32>
    %48 = vector.broadcast %47 : vector<1x128xf32> to vector<64x128xf32>
    %49 = arith.addf %46, %48 : vector<64x128xf32>
    %c1_i32_27 = arith.constant 1 : i32
    %50 = vector.broadcast %c1_i32_27 : i32 to vector<64x1xi32>
    %51 = arith.cmpi eq, %32, %50 : vector<64x1xi32>
    %52 = vector.shape_cast %51 : vector<64x1xi1> to vector<64x1xi1>
    %53 = vector.broadcast %52 : vector<64x1xi1> to vector<64x128xi1>
    %54 = arith.select %53, %49, %43 : vector<64x128xi1>, vector<64x128xf32>
    %c2 = arith.constant 2 : index
    %c0_28 = arith.constant 0 : index
    %c0_29 = arith.constant 0 : index
    %55 = vector.load %arg7[%c2, %c0_28, %c0_29] : memref<4x32x128xbf16, #tpu.memory_space<vmem>>, vector<1x32x128xbf16>
    %56 = vector.shape_cast %55 : vector<1x32x128xbf16> to vector<32x128xbf16>
    %cst_30 = arith.constant dense<0.000000e+00> : vector<64x128xf32>
    %57 = tpu.matmul %11, %56, %cst_30 {dimension_numbers = #tpu.dot_dimension_numbers<[1], [0], [0], [1], [0, 0, 1, 1], [], []>} : vector<64x32xbf16>, vector<32x128xbf16>, vector<64x128xf32> -> vector<64x128xf32>
    %c2_31 = arith.constant 2 : index
    %c0_32 = arith.constant 0 : index
    %58 = vector.load %arg8[%c2_31, %c0_32] : memref<4x128xf32, #tpu.memory_space<vmem>>, vector<1x128xf32>
    %59 = vector.broadcast %58 : vector<1x128xf32> to vector<64x128xf32>
    %60 = arith.addf %57, %59 : vector<64x128xf32>
    %c2_i32_33 = arith.constant 2 : i32
    %61 = vector.broadcast %c2_i32_33 : i32 to vector<64x1xi32>
    %62 = arith.cmpi eq, %32, %61 : vector<64x1xi32>
    %63 = vector.shape_cast %62 : vector<64x1xi1> to vector<64x1xi1>
    %64 = vector.broadcast %63 : vector<64x1xi1> to vector<64x128xi1>
    %65 = arith.select %64, %60, %54 : vector<64x128xi1>, vector<64x128xf32>
    %c3 = arith.constant 3 : index
    %c0_34 = arith.constant 0 : index
    %c0_35 = arith.constant 0 : index
    %66 = vector.load %arg7[%c3, %c0_34, %c0_35] : memref<4x32x128xbf16, #tpu.memory_space<vmem>>, vector<1x32x128xbf16>
    %67 = vector.shape_cast %66 : vector<1x32x128xbf16> to vector<32x128xbf16>
    %cst_36 = arith.constant dense<0.000000e+00> : vector<64x128xf32>
    %68 = tpu.matmul %11, %67, %cst_36 {dimension_numbers = #tpu.dot_dimension_numbers<[1], [0], [0], [1], [0, 0, 1, 1], [], []>} : vector<64x32xbf16>, vector<32x128xbf16>, vector<64x128xf32> -> vector<64x128xf32>
    %c3_37 = arith.constant 3 : index
    %c0_38 = arith.constant 0 : index
    %69 = vector.load %arg8[%c3_37, %c0_38] : memref<4x128xf32, #tpu.memory_space<vmem>>, vector<1x128xf32>
    %70 = vector.broadcast %69 : vector<1x128xf32> to vector<64x128xf32>
    %71 = arith.addf %68, %70 : vector<64x128xf32>
    %c3_i32_39 = arith.constant 3 : i32
    %72 = vector.broadcast %c3_i32_39 : i32 to vector<64x1xi32>
    %73 = arith.cmpi eq, %32, %72 : vector<64x1xi32>
    %74 = vector.shape_cast %73 : vector<64x1xi1> to vector<64x1xi1>
    %75 = vector.broadcast %74 : vector<64x1xi1> to vector<64x128xi1>
    %76 = arith.select %75, %71, %65 : vector<64x128xi1>, vector<64x128xf32>
    %cst_40 = arith.constant 0.000000e+00 : f32
    %77 = vector.broadcast %cst_40 : f32 to vector<64x1xf32>
    %78 = arith.cmpf ogt, %37, %77 : vector<64x1xf32>
    %cst_41 = arith.constant 0.000000e+00 : f32
    %79 = vector.shape_cast %78 : vector<64x1xi1> to vector<64x1xi1>
    %80 = vector.broadcast %79 : vector<64x1xi1> to vector<64x128xi1>
    %81 = vector.broadcast %cst_41 : f32 to vector<64x128xf32>
    %82 = arith.select %80, %76, %81 : vector<64x128xi1>, vector<64x128xf32>
    %cst_42 = arith.constant 0.000000e+00 : f32
    %83 = vector.broadcast %cst_42 : f32 to vector<64x128xf32>
    %84 = arith.maximumf %82, %83 : vector<64x128xf32>
    %85 = arith.truncf %84 : vector<64x128xf32> to vector<64x128xbf16>
    %c0_43 = arith.constant 0 : index
    %c0_44 = arith.constant 0 : index
    %86 = vector.load %arg9[%c0_43, %c0_44] : memref<128x4xbf16, #tpu.memory_space<vmem>>, vector<128x4xbf16>
    %cst_45 = arith.constant dense<0.000000e+00> : vector<64x4xf32>
    %87 = tpu.matmul %85, %86, %cst_45 {dimension_numbers = #tpu.dot_dimension_numbers<[1], [0], [0], [1], [0, 0, 1, 1], [], []>} : vector<64x128xbf16>, vector<128x4xbf16>, vector<64x4xf32> -> vector<64x4xf32>
    %c0_46 = arith.constant 0 : index
    %c0_47 = arith.constant 0 : index
    %88 = vector.load %arg10[%c0_46, %c0_47] : memref<1x4xf32, #tpu.memory_space<vmem>>, vector<1x4xf32>
    %89 = vector.broadcast %88 : vector<1x4xf32> to vector<64x4xf32>
    %90 = arith.addf %87, %89 : vector<64x4xf32>
    %91 = vector.extract_strided_slice %90 {offsets = [0, 0], sizes = [64, 1], strides = [1, 1]} : vector<64x4xf32> to vector<64x1xf32>
    %c0_i32_48 = arith.constant 0 : i32
    %92 = vector.broadcast %c0_i32_48 : i32 to vector<64x1xi32>
    %93 = vector.extract_strided_slice %90 {offsets = [0, 1], sizes = [64, 1], strides = [1, 1]} : vector<64x4xf32> to vector<64x1xf32>
    %94 = arith.cmpf ogt, %93, %91 : vector<64x1xf32>
    %c1_i32_49 = arith.constant 1 : i32
    %95 = vector.broadcast %c1_i32_49 : i32 to vector<64x1xi32>
    %96 = arith.select %94, %95, %92 : vector<64x1xi1>, vector<64x1xi32>
    %97 = arith.select %94, %93, %91 : vector<64x1xi1>, vector<64x1xf32>
    %98 = vector.extract_strided_slice %90 {offsets = [0, 2], sizes = [64, 1], strides = [1, 1]} : vector<64x4xf32> to vector<64x1xf32>
    %99 = arith.cmpf ogt, %98, %97 : vector<64x1xf32>
    %c2_i32_50 = arith.constant 2 : i32
    %100 = vector.broadcast %c2_i32_50 : i32 to vector<64x1xi32>
    %101 = arith.select %99, %100, %96 : vector<64x1xi1>, vector<64x1xi32>
    %102 = arith.select %99, %98, %97 : vector<64x1xi1>, vector<64x1xf32>
    %103 = vector.extract_strided_slice %90 {offsets = [0, 3], sizes = [64, 1], strides = [1, 1]} : vector<64x4xf32> to vector<64x1xf32>
    %104 = arith.cmpf ogt, %103, %102 : vector<64x1xf32>
    %c3_i32_51 = arith.constant 3 : i32
    %105 = vector.broadcast %c3_i32_51 : i32 to vector<64x1xi32>
    %106 = arith.select %104, %105, %101 : vector<64x1xi1>, vector<64x1xi32>
    %c0_i32_52 = arith.constant 0 : i32
    %107 = vector.broadcast %c0_i32_52 : i32 to vector<64x1xi32>
    %108 = arith.cmpi ne, %106, %107 : vector<64x1xi32>
    %109 = arith.extui %108 : vector<64x1xi1> to vector<64x1xi32>
    %110 = arith.sitofp %109 : vector<64x1xi32> to vector<64x1xf32>
    %111 = arith.mulf %37, %110 : vector<64x1xf32>
    %c0_53 = arith.constant 0 : index
    %c0_54 = arith.constant 0 : index
    %c0_55 = arith.constant 0 : index
    %112 = vector.load %arg11[%c0_53, %c0_54, %c0_55] : memref<4x128x128xbf16, #tpu.memory_space<vmem>>, vector<1x128x128xbf16>
    %113 = vector.shape_cast %112 : vector<1x128x128xbf16> to vector<128x128xbf16>
    %cst_56 = arith.constant dense<0.000000e+00> : vector<64x128xf32>
    %114 = tpu.matmul %85, %113, %cst_56 {dimension_numbers = #tpu.dot_dimension_numbers<[1], [0], [0], [1], [0, 0, 1, 1], [], []>} : vector<64x128xbf16>, vector<128x128xbf16>, vector<64x128xf32> -> vector<64x128xf32>
    %c0_57 = arith.constant 0 : index
    %c0_58 = arith.constant 0 : index
    %115 = vector.load %arg12[%c0_57, %c0_58] : memref<4x128xf32, #tpu.memory_space<vmem>>, vector<1x128xf32>
    %116 = vector.broadcast %115 : vector<1x128xf32> to vector<64x128xf32>
    %117 = arith.addf %114, %116 : vector<64x128xf32>
    %c1_59 = arith.constant 1 : index
    %c0_60 = arith.constant 0 : index
    %c0_61 = arith.constant 0 : index
    %118 = vector.load %arg11[%c1_59, %c0_60, %c0_61] : memref<4x128x128xbf16, #tpu.memory_space<vmem>>, vector<1x128x128xbf16>
    %119 = vector.shape_cast %118 : vector<1x128x128xbf16> to vector<128x128xbf16>
    %cst_62 = arith.constant dense<0.000000e+00> : vector<64x128xf32>
    %120 = tpu.matmul %85, %119, %cst_62 {dimension_numbers = #tpu.dot_dimension_numbers<[1], [0], [0], [1], [0, 0, 1, 1], [], []>} : vector<64x128xbf16>, vector<128x128xbf16>, vector<64x128xf32> -> vector<64x128xf32>
    %c1_63 = arith.constant 1 : index
    %c0_64 = arith.constant 0 : index
    %121 = vector.load %arg12[%c1_63, %c0_64] : memref<4x128xf32, #tpu.memory_space<vmem>>, vector<1x128xf32>
    %122 = vector.broadcast %121 : vector<1x128xf32> to vector<64x128xf32>
    %123 = arith.addf %120, %122 : vector<64x128xf32>
    %c1_i32_65 = arith.constant 1 : i32
    %124 = vector.broadcast %c1_i32_65 : i32 to vector<64x1xi32>
    %125 = arith.cmpi eq, %106, %124 : vector<64x1xi32>
    %126 = vector.shape_cast %125 : vector<64x1xi1> to vector<64x1xi1>
    %127 = vector.broadcast %126 : vector<64x1xi1> to vector<64x128xi1>
    %128 = arith.select %127, %123, %117 : vector<64x128xi1>, vector<64x128xf32>
    %c2_66 = arith.constant 2 : index
    %c0_67 = arith.constant 0 : index
    %c0_68 = arith.constant 0 : index
    %129 = vector.load %arg11[%c2_66, %c0_67, %c0_68] : memref<4x128x128xbf16, #tpu.memory_space<vmem>>, vector<1x128x128xbf16>
    %130 = vector.shape_cast %129 : vector<1x128x128xbf16> to vector<128x128xbf16>
    %cst_69 = arith.constant dense<0.000000e+00> : vector<64x128xf32>
    %131 = tpu.matmul %85, %130, %cst_69 {dimension_numbers = #tpu.dot_dimension_numbers<[1], [0], [0], [1], [0, 0, 1, 1], [], []>} : vector<64x128xbf16>, vector<128x128xbf16>, vector<64x128xf32> -> vector<64x128xf32>
    %c2_70 = arith.constant 2 : index
    %c0_71 = arith.constant 0 : index
    %132 = vector.load %arg12[%c2_70, %c0_71] : memref<4x128xf32, #tpu.memory_space<vmem>>, vector<1x128xf32>
    %133 = vector.broadcast %132 : vector<1x128xf32> to vector<64x128xf32>
    %134 = arith.addf %131, %133 : vector<64x128xf32>
    %c2_i32_72 = arith.constant 2 : i32
    %135 = vector.broadcast %c2_i32_72 : i32 to vector<64x1xi32>
    %136 = arith.cmpi eq, %106, %135 : vector<64x1xi32>
    %137 = vector.shape_cast %136 : vector<64x1xi1> to vector<64x1xi1>
    %138 = vector.broadcast %137 : vector<64x1xi1> to vector<64x128xi1>
    %139 = arith.select %138, %134, %128 : vector<64x128xi1>, vector<64x128xf32>
    %c3_73 = arith.constant 3 : index
    %c0_74 = arith.constant 0 : index
    %c0_75 = arith.constant 0 : index
    %140 = vector.load %arg11[%c3_73, %c0_74, %c0_75] : memref<4x128x128xbf16, #tpu.memory_space<vmem>>, vector<1x128x128xbf16>
    %141 = vector.shape_cast %140 : vector<1x128x128xbf16> to vector<128x128xbf16>
    %cst_76 = arith.constant dense<0.000000e+00> : vector<64x128xf32>
    %142 = tpu.matmul %85, %141, %cst_76 {dimension_numbers = #tpu.dot_dimension_numbers<[1], [0], [0], [1], [0, 0, 1, 1], [], []>} : vector<64x128xbf16>, vector<128x128xbf16>, vector<64x128xf32> -> vector<64x128xf32>
    %c3_77 = arith.constant 3 : index
    %c0_78 = arith.constant 0 : index
    %143 = vector.load %arg12[%c3_77, %c0_78] : memref<4x128xf32, #tpu.memory_space<vmem>>, vector<1x128xf32>
    %144 = vector.broadcast %143 : vector<1x128xf32> to vector<64x128xf32>
    %145 = arith.addf %142, %144 : vector<64x128xf32>
    %c3_i32_79 = arith.constant 3 : i32
    %146 = vector.broadcast %c3_i32_79 : i32 to vector<64x1xi32>
    %147 = arith.cmpi eq, %106, %146 : vector<64x1xi32>
    %148 = vector.shape_cast %147 : vector<64x1xi1> to vector<64x1xi1>
    %149 = vector.broadcast %148 : vector<64x1xi1> to vector<64x128xi1>
    %150 = arith.select %149, %145, %139 : vector<64x128xi1>, vector<64x128xf32>
    %cst_80 = arith.constant 0.000000e+00 : f32
    %151 = vector.broadcast %cst_80 : f32 to vector<64x1xf32>
    %152 = arith.cmpf ogt, %111, %151 : vector<64x1xf32>
    %153 = vector.shape_cast %152 : vector<64x1xi1> to vector<64x1xi1>
    %154 = vector.broadcast %153 : vector<64x1xi1> to vector<64x128xi1>
    %155 = arith.select %154, %150, %84 : vector<64x128xi1>, vector<64x128xf32>
    %156 = arith.truncf %155 : vector<64x128xf32> to vector<64x128xbf16>
    %c0_81 = arith.constant 0 : index
    %c0_82 = arith.constant 0 : index
    %157 = vector.load %arg14[%c0_81, %c0_82] : memref<64x128xbf16, #tpu.memory_space<vmem>>, vector<64x128xbf16>
    tpu.vector_store %arg14[%c0_81, %c0_82], %156 {strides = array<i32>} : memref<64x128xbf16, #tpu.memory_space<vmem>>, vector<64x128xbf16>,
    %c0_83 = arith.constant 0 : index
    %c0_84 = arith.constant 0 : index
    %158 = vector.load %arg15[%c0_83, %c0_84] : memref<64x1xf32, #tpu.memory_space<vmem>>, vector<64x1xf32>
    tpu.vector_store %arg15[%c0_83, %c0_84], %111 {strides = array<i32>} : memref<64x1xf32, #tpu.memory_space<vmem>>, vector<64x1xf32>,
    return
  }
  func.func @transform_0(%arg0: i32) -> (i32, i32) {
    %c0_i32 = arith.constant 0 : i32
    %c0_i32_0 = arith.constant 0 : i32
    return %arg0, %c0_i32 : i32, i32
  }
  func.func @transform_1(%arg0: i32) -> (i32, i32) {
    %c0_i32 = arith.constant 0 : i32
    %c0_i32_0 = arith.constant 0 : i32
    return %arg0, %c0_i32 : i32, i32
  }
  func.func @transform_2(%arg0: i32) -> (i32, i32) {
    %c0_i32 = arith.constant 0 : i32
    %c0_i32_0 = arith.constant 0 : i32
    %c0_i32_1 = arith.constant 0 : i32
    return %c0_i32, %c0_i32_0 : i32, i32
  }
  func.func @transform_3(%arg0: i32) -> (i32, i32) {
    %c0_i32 = arith.constant 0 : i32
    %c0_i32_0 = arith.constant 0 : i32
    %c0_i32_1 = arith.constant 0 : i32
    return %c0_i32, %c0_i32_0 : i32, i32
  }
  func.func @transform_4(%arg0: i32) -> (i32, i32) {
    %c0_i32 = arith.constant 0 : i32
    %c0_i32_0 = arith.constant 0 : i32
    %c0_i32_1 = arith.constant 0 : i32
    return %c0_i32, %c0_i32_0 : i32, i32
  }
  func.func @transform_5(%arg0: i32) -> (i32, i32) {
    %c0_i32 = arith.constant 0 : i32
    %c0_i32_0 = arith.constant 0 : i32
    %c0_i32_1 = arith.constant 0 : i32
    return %c0_i32, %c0_i32_0 : i32, i32
  }
  func.func @transform_6(%arg0: i32) -> (i32, i32, i32) {
    %c0_i32 = arith.constant 0 : i32
    %c0_i32_0 = arith.constant 0 : i32
    %c0_i32_1 = arith.constant 0 : i32
    %c0_i32_2 = arith.constant 0 : i32
    return %c0_i32, %c0_i32_0, %c0_i32_1 : i32, i32, i32
  }
  func.func @transform_7(%arg0: i32) -> (i32, i32) {
    %c0_i32 = arith.constant 0 : i32
    %c0_i32_0 = arith.constant 0 : i32
    %c0_i32_1 = arith.constant 0 : i32
    return %c0_i32, %c0_i32_0 : i32, i32
  }
  func.func @transform_8(%arg0: i32) -> (i32, i32) {
    %c0_i32 = arith.constant 0 : i32
    %c0_i32_0 = arith.constant 0 : i32
    %c0_i32_1 = arith.constant 0 : i32
    return %c0_i32, %c0_i32_0 : i32, i32
  }
  func.func @transform_9(%arg0: i32) -> (i32, i32) {
    %c0_i32 = arith.constant 0 : i32
    %c0_i32_0 = arith.constant 0 : i32
    %c0_i32_1 = arith.constant 0 : i32
    return %c0_i32, %c0_i32_0 : i32, i32
  }
  func.func @transform_10(%arg0: i32) -> (i32, i32, i32) {
    %c0_i32 = arith.constant 0 : i32
    %c0_i32_0 = arith.constant 0 : i32
    %c0_i32_1 = arith.constant 0 : i32
    %c0_i32_2 = arith.constant 0 : i32
    return %c0_i32, %c0_i32_0, %c0_i32_1 : i32, i32, i32
  }
  func.func @transform_11(%arg0: i32) -> (i32, i32) {
    %c0_i32 = arith.constant 0 : i32
    %c0_i32_0 = arith.constant 0 : i32
    %c0_i32_1 = arith.constant 0 : i32
    return %c0_i32, %c0_i32_0 : i32, i32
  }
  func.func @transform_12(%arg0: i32) -> (i32, i32) {
    %c0_i32 = arith.constant 0 : i32
    %c0_i32_0 = arith.constant 0 : i32
    return %arg0, %c0_i32 : i32, i32
  }
  func.func @transform_13(%arg0: i32) -> (i32, i32) {
    %c0_i32 = arith.constant 0 : i32
    %c0_i32_0 = arith.constant 0 : i32
    return %arg0, %c0_i32 : i32, i32
  }
  func.func @transform_14(%arg0: i32) -> (i32, i32) {
    %c0_i32 = arith.constant 0 : i32
    %c0_i32_0 = arith.constant 0 : i32
    return %arg0, %c0_i32 : i32, i32
  }
}

</mosaic_0001>

<bundles_post_ra>
// kernel: tpu_custom_call.1
= control target key start
LH: loop header
LB: loop body
LE: loop exit
PB: predicated region body
PF: predicated region fallthrough
CT: control target
= control target key end

     0   :  { %20 = vsyncpa [#allocation3], 0  ;;  %s3443_s0 = inlined_call_operand.vmem [shape: f32[64,16], index: 0, kind: input, shape index: {}]   ;;  %s3444_s1 = inlined_call_operand.vmem [shape: f32[64,32], index: 1, kind: input, shape index: {}]   ;;  %s3445_s2 = inlined_call_operand.vmem [shape: bf16[16,128], index: 2, kind: input, shape index: {}]   ;;  %s3446_s3 = inlined_call_operand.vmem [shape: f32[1,128], index: 3, kind: input, shape index: {}]   ;;  %s3447_s4 = inlined_call_operand.vmem [shape: bf16[32,4], index: 4, kind: input, shape index: {}]   ;;  %s3448_s5 = inlined_call_operand.hbm [shape: f32[1,4], index: 5, kind: input, shape index: {}]   ;;  %s3449_s6 = inlined_call_operand.hbm [shape: bf16[4,32,128], index: 6, kind: input, shape index: {}]   ;;  %s3450_s7 = inlined_call_operand.vmem [shape: f32[4,128], index: 7, kind: input, shape index: {}]   ;;  %s3451_s8 = inlined_call_operand.vmem [shape: bf16[128,4], index: 8, kind: input, shape index: {}]   ;;  %s3452_s9 = inlined_call_operand.hbm [shape: f32[1,4], index: 9, kind: input, shape index: {}]   ;;  %s3453_s10 = inlined_call_operand.vmem [shape: bf16[4,128,128], index: 10, kind: input, shape index: {}]   ;;  %s3454_s11 = inlined_call_operand.hbm [shape: f32[4,128], index: 11, kind: input, shape index: {}]   ;;  %s3455_s12 = inlined_call_operand.hbm [shape: bf16[64,128], index: 12, kind: output, shape index: {0}]   ;;  %s3456_s13 = inlined_call_operand.hbm [shape: bf16[64,128], index: 13, kind: output, shape index: {1}]   ;;  %s3457_s14 = inlined_call_operand.vmem [shape: f32[64,1], index: 14, kind: output, shape index: {2}]  }
   0x1   :  { %21 = vsyncpa [#allocation6], 0 }
   0x2   :  { %22 = vsyncpa [#allocation9], 0 }
   0x3   :  { %23 = vsyncpa [#allocation4], 0  ;;  %s50_s15 = sshll.u32 %s3449_s6, 4  ;;  %s51_s15 = int_to_ptr.hbm [resolvable:$true] %s50_s15 }
   0x4   :  { %24 = vsyncpa [#allocation12], 0  ;;  %s2505_s16 = smov [#allocation5]   ;;  %s40_s20 = sshll.u32 %s3448_s5, 4  ;;  %s41_s20 = int_to_ptr.hbm [resolvable:$true] %s40_s20 }
   0x5   :  { %s52_s17 = sshll.u32 %s2505_s16, 4  ;;  %s2506_s21 = smov 64   ;;  %s53_s17 = int_to_ptr.vmem [resolvable:$true] %s52_s17 }
   0x6   :  { %s2507_s22 = smov 4   ;;  %s2508_s23 = smov [#allocation2]  }
   0x7   :  { %58 = dma.hbm_to_vmem [thread:$0]  %s51_s15, 1024, %s53_s17, [#allocation6], %s2506_s21, %s2506_s21, %s2507_s22  }
   0x8   :  { %s42_s24 = sshll.u32 %s2508_s23, 4  ;;  %s68_s26 = sshll.u32 %s3452_s9, 4  ;;  %s43_s24 = int_to_ptr.vmem [resolvable:$true] %s42_s24  ;;  %s69_s26 = int_to_ptr.hbm [resolvable:$true] %s68_s26 }
   0x9   :  { %45 = dma.hbm_to_vmem [thread:$0]  %s41_s20, 16, %s43_s24, [#allocation3]  }
   0xa   :  { %s81_s5 = sshll.u32 %s3454_s11, 4  ;;  %s2509_s29 = smov [#allocation7]   ;;  %s82_s5 = int_to_ptr.hbm [resolvable:$true] %s81_s5 }
   0xb   :  { %s70_s30 = sshll.u32 %s2509_s29, 4  ;;  %s2510_s15 = smov [#allocation8]   ;;  %s71_s30 = int_to_ptr.vmem [resolvable:$true] %s70_s30 }
   0xc   :  { %73 = dma.hbm_to_vmem [thread:$0]  %s69_s26, 16, %s71_s30, [#allocation6]  }
   0xd   :  { %s83_s16 = sshll.u32 %s2510_s15, 4  ;;  %s84_s16 = int_to_ptr.vmem [resolvable:$true] %s83_s16 }
   0xe   :  { %86 = dma.hbm_to_vmem [thread:$0]  %s82_s5, 64, %s84_s16, [#allocation9]  }
   0xf   :  { %2495 = dma.done.wait [#allocation3], 16  }
  0x10   :  { %2496 = vsyncadd [#allocation3], 4294967280 }
  0x11   :  { %2497 = dma.done.wait [#allocation6], 1040  }
  0x12   :  { %2498 = vsyncadd [#allocation6], 4294966256 }
  0x13   :  { %2499 = dma.done.wait [#allocation9], 64  }
  0x14   :  { %2500 = vsyncadd [#allocation9], 4294967232  ;;  %v2225_v0 = vld [vmem:[%s3447_s4 + $0x8] sm:$0xff]  ;;  %v2224_v1 = vld [vmem:[%s3447_s4] sm:$0xff]  ;;  %vm218_vm0 = vcmask 261120   ;;  %s2511_s17 = smov 1  }
  0x15   :  { %237 = vmatpush.bf16.msra.mxu1 %v2225_v0  ;;  %v186_v2 = vld [vmem:[%s3444_s1] sm:$0xff]  ;;  %v187_v3 = vld [vmem:[%s3444_s1 + $0x8] sm:$0xff]  ;;  %v188_v5 = vld [vmem:[%s3444_s1 + $0x10] sm:$0xff]  ;;  %v2512_v33 = vmov 0   ;;  %vm128_vm10 = vcmask 130048   ;;  %s2516_s16 = smov [#allocation10]  }
  0x16   :  { %v2620_v4 = vpack.c.bf16 %v187_v3, %v186_v2  ;;  %v189_v6 = vld [vmem:[%s3444_s1 + $0x18] sm:$0xff]  ;;  %v190_v8 = vld [vmem:[%s3444_s1 + $0x20] sm:$0xff]  ;;  %v191_v9 = vld [vmem:[%s3444_s1 + $0x28] sm:$0xff]  ;;  %s2517_s6 = smov [#allocation11]   ;;  %s1907_s28 = sshll.u32 %s3456_s13, 4  ;;  %s1908_s28 = int_to_ptr.hbm [resolvable:$true] %s1907_s28 }
  0x17   :  { %v2630_v7 = vpack.c.bf16 %v189_v6, %v188_v5  ;;  %v2640_v10 = vpack.c.bf16 %v191_v9, %v190_v8  ;;  %v192_v11 = vld [vmem:[%s3444_s1 + $0x30] sm:$0xff]  ;;  %v193_v12 = vld [vmem:[%s3444_s1 + $0x38] sm:$0xff]  ;;  %v2340_v14 = vld [vmem:[#allocation2] ss:$0 sm:$0xff]  ;;  %s1905_s4 = sshll.u32 %s2517_s6, 4  ;;  %s1906_s4 = int_to_ptr.vmem [resolvable:$true] %s1905_s4 }
  0x18   :  { %v2650_v13 = vpack.c.bf16 %v193_v12, %v192_v11  ;;  %v2223_v58 = vld [vmem:[%s3445_s2] sm:$0xff]  ;;  %v105_v60 = vld [vmem:[%s3443_s0 + $0x8] sm:$0xff]  ;;  %v106_v5 = vld [vmem:[%s3443_s0 + $0x10] sm:$0xff] }
  0x19   :  { %238 = vmatpush.bf16.msra.mxu1 %v2224_v1  ;;  %148 = vmatpush.bf16.msra.mxu0 %v2223_v58  ;;  %v104_v59 = vld [vmem:[%s3443_s0] sm:$0xff]  ;;  %v2227_v61 = vld [vmem:[#allocation5 + $0x8] sm:$0xff]  ;;  %v107_v6 = vld [vmem:[%s3443_s0 + $0x18] sm:$0xff]  ;;  %v2513_v58 = vmov 3  }
  0x1a   :  { %v112_v62 = vpack.c.bf16 %v105_v60, %v104_v59  ;;  %2320 = vmatpush.bf16.msra.mxu2 %v2227_v61  ;;  %v2231_v2 = vld [vmem:[#allocation5 + $0x28] sm:$0xff]  ;;  %v113_v12 = vpack.c.bf16 %v107_v6, %v106_v5  ;;  %2338 = vset.pattern.permute.xlu0 %v2513_v58  ;;  %v2838_v6 = vld [vmem:[%s3446_s3] ss:$0 sm:$0xff]  ;;  %s1892_s3 = sshll.u32 %s2516_s16, 4  ;;  %s1893_s3 = int_to_ptr.vmem [resolvable:$true] %s1892_s3 }
  0x1b   :  { %2337 = vset.pattern.permute.xlu1 %v2513_v58  ;;  %2339 = vset.pattern.permute.xlu2 %v2513_v58 }
  0x1c   :  { %1947 = vmatmul.msk.bf16.vlgmr.msra.gmra.mxu1 %vm218_vm0, %v2620_v4  ;;  %1935 = vmatmul.msk.bf16.vlgmr.msra.gmra.mxu0 %vm128_vm10, %v112_v62 }
  0x1d   :  { %500 = vmatpush.bf16.msrb.mxu1 %v2227_v61  ;;  %652 = vmatpush.bf16.msrb.mxu0 %v2231_v2 }
  0x2c   :  { %1948 = vmatmul.msk.bf16.gmra.mxu1 %vm218_vm0, %v2630_v7  ;;  %1936 = vmatmul.msk.bf16.gmra.mxu0 %vm128_vm10, %v113_v12 }
  0x3c   :  { %1949 = vmatmul.msk.bf16.gmra.mxu1 %vm218_vm0, %v2640_v10 }
  0x4c   :  { %1950 = vmatmul.msk.bf16.gmra.mxu1 %vm218_vm0, %v2650_v13 }
  0x99   :  { %v240_v15 = vpop.f32.mrf.mxu1 }
  0x9a   :  { %v2654_v16 = vadd.f32 %v2340_v14, %v240_v15 }
  0x9c   :  { %268 = vrot.lane.b32.xlu0 %v2654_v16, %s2511_s17 }
  0xa1   :  { %v242_v17 = vpop.f32.mrf.mxu1 }
  0xa2   :  { %v2658_v18 = vadd.f32 %v2340_v14, %v242_v17 }
  0xa4   :  { %270 = vrot.lane.b32.xlu0 %v2658_v18, %s2511_s17 }
  0xa9   :  { %v245_v19 = vpop.f32.mrf.mxu1 }
  0xaa   :  { %v2662_v20 = vadd.f32 %v2340_v14, %v245_v19 }
  0xac   :  { %272 = vrot.lane.b32.xlu1 %v2662_v20, %s2511_s17 }
  0xb1   :  { %v247_v21 = vpop.f32.mrf.mxu1 }
  0xb2   :  { %v2666_v22 = vadd.f32 %v2340_v14, %v247_v21 }
  0xb4   :  { %274 = vrot.lane.b32.xlu1 %v2666_v22, %s2511_s17 }
  0xb9   :  { %v250_v23 = vpop.f32.mrf.mxu1 }
  0xba   :  { %v2670_v24 = vadd.f32 %v2340_v14, %v250_v23 }
  0xbc   :  { %276 = vrot.lane.b32.xlu2 %v2670_v24, %s2511_s17 }
  0xc1   :  { %v252_v25 = vpop.f32.mrf.mxu1 }
  0xc2   :  { %v2674_v26 = vadd.f32 %v2340_v14, %v252_v25 }
  0xc4   :  { %278 = vrot.lane.b32.xlu2 %v2674_v26, %s2511_s17 }
  0xc9   :  { %v255_v27 = vpop.f32.mrf.mxu1 }
  0xca   :  { %v2678_v28 = vadd.f32 %v2340_v14, %v255_v27 }
  0xcc   :  { %280 = vrot.lane.b32.xlu0 %v2678_v28, %s2511_s17 }
  0xd1   :  { %v257_v29 = vpop.f32.mrf.mxu1 }
  0xd2   :  { %v2682_v30 = vadd.f32 %v2340_v14, %v257_v29 }
  0xd4   :  { %282 = vrot.lane.b32.xlu1 %v2682_v30, %s2511_s17 }
 0x10e   :  { %v269_v31 = vpop.permute.xlu0 %268 }
 0x10f   :  { %vm292_vm1 = vcmp.gt.f32.partialorder %v2654_v16, %v269_v31 }
 0x110   :  { %v308_v32 = vsel %vm292_vm1, %v2654_v16, %v269_v31  ;;  %v300_v34 = vsel %vm292_vm1, 1, %v2512_v33 }
 0x111   :  { %324 = vrot.lane.b32.xlu2 %v308_v32, %s2511_s17  ;;  %356 = vrot.lane.b32.xlu1 %v300_v34, %s2511_s17  ;;  %v108_v34 = vld [vmem:[%s3443_s0 + $0x20] sm:$0xff] }
 0x116   :  { %v271_v35 = vpop.permute.xlu0 %270  ;;  %v277_v39 = vpop.permute.xlu2 %276 }
 0x117   :  { %vm293_vm2 = vcmp.gt.f32.partialorder %v2658_v18, %v271_v35  ;;  %vm296_vm4 = vcmp.gt.f32.partialorder %v2670_v24, %v277_v39 }
 0x118   :  { %v309_v36 = vsel %vm293_vm2, %v2658_v18, %v271_v35  ;;  %v301_v37 = vsel %vm293_vm2, 1, %v2512_v33  ;;  %v312_v44 = vsel %vm296_vm4, %v2670_v24, %v277_v39  ;;  %v304_v49 = vsel %vm296_vm4, 1, %v2512_v33  ;;  %v109_v35 = vld [vmem:[%s3443_s0 + $0x28] sm:$0xff] }
 0x119   :  { %326 = vrot.lane.b32.xlu0 %v309_v36, %s2511_s17  ;;  %358 = vrot.lane.b32.xlu2 %v301_v37, %s2511_s17  ;;  %v2226_v36 = vld [vmem:[#allocation5] sm:$0xff]  ;;  %v114_v37 = vpack.c.bf16 %v109_v35, %v108_v34 }
 0x11a   :  { %v2230_v39 = vld [vmem:[#allocation5 + $0x20] sm:$0xff]  ;;  %501 = vmatpush.bf16.msrb.mxu1 %v2226_v36  ;;  %2321 = vmatpush.bf16.msra.mxu2 %v2226_v36 }
 0x11b   :  { %653 = vmatpush.bf16.msrb.mxu0 %v2230_v39 }
 0x11c   :  { %1937 = vmatmul.msk.bf16.gmra.mxu0 %vm128_vm10, %v114_v37 }
 0x11d   :  { %1967 = vmatmul.msk.bf16.vlgmr.msrb.gmra.mxu1 %vm218_vm0, %v2620_v4  ;;  %1968 = vmatmul.msk.bf16.vlgmr.msra.gmra.mxu2 %vm218_vm0, %v2630_v7 }
 0x11e   :  { %v273_v38 = vpop.permute.xlu1 %272  ;;  %v279_v46 = vpop.permute.xlu2 %278 }
 0x11f   :  { %vm294_vm3 = vcmp.gt.f32.partialorder %v2662_v20, %v273_v38  ;;  %vm297_vm6 = vcmp.gt.f32.partialorder %v2674_v26, %v279_v46 }
 0x120   :  { %v310_v40 = vsel %vm294_vm3, %v2662_v20, %v273_v38  ;;  %v302_v41 = vsel %vm294_vm3, 1, %v2512_v33  ;;  %v313_v47 = vsel %vm297_vm6, %v2674_v26, %v279_v46  ;;  %v305_v48 = vsel %vm297_vm6, 1, %v2512_v33  ;;  %v2229_v38 = vld [vmem:[#allocation5 + $0x18] sm:$0xff] }
 0x121   :  { %328 = vrot.lane.b32.xlu1 %v310_v40, %s2511_s17  ;;  %360 = vrot.lane.b32.xlu0 %v302_v41, %s2511_s17  ;;  %v2233_v41 = vld [vmem:[#allocation5 + $0x38] sm:$0xff] }
 0x122   :  { %548 = vmatpush.bf16.msra.mxu3 %v2229_v38  ;;  %756 = vmatpush.bf16.msra.mxu1 %v2233_v41 }
 0x126   :  { %v275_v42 = vpop.permute.xlu1 %274 }
 0x127   :  { %vm295_vm5 = vcmp.gt.f32.partialorder %v2666_v22, %v275_v42 }
 0x128   :  { %v303_v43 = vsel %vm295_vm5, 1, %v2512_v33  ;;  %v311_v45 = vsel %vm295_vm5, %v2666_v22, %v275_v42  ;;  %v2228_v42 = vld [vmem:[#allocation5 + $0x10] sm:$0xff] }
 0x129   :  { %362 = vrot.lane.b32.xlu1 %v303_v43, %s2511_s17  ;;  %332 = vrot.lane.b32.xlu0 %v312_v44, %s2511_s17  ;;  %v2232_v43 = vld [vmem:[#allocation5 + $0x30] sm:$0xff] }
 0x12a   :  { %330 = vrot.lane.b32.xlu2 %v311_v45, %s2511_s17  ;;  %549 = vmatpush.bf16.msra.mxu3 %v2228_v42 }
 0x12b   :  { %757 = vmatpush.bf16.msra.mxu1 %v2232_v43 }
 0x12d   :  { %1979 = vmatmul.msk.bf16.vlgmr.msra.gmra.mxu3 %vm218_vm0, %v2620_v4  ;;  %1969 = vmatmul.msk.bf16.gmra.mxu2 %vm218_vm0, %v2640_v10 }
 0x12e   :  { %2322 = vmatpush.bf16.msrb.mxu3 %v2233_v41  ;;  %2003 = vmatmul.msk.bf16.vlgmr.msra.gmra.mxu1 %vm218_vm0, %v2620_v4 }
 0x131   :  { %334 = vrot.lane.b32.xlu1 %v313_v47, %s2511_s17  ;;  %366 = vrot.lane.b32.xlu0 %v305_v48, %s2511_s17 }
 0x132   :  { %364 = vrot.lane.b32.xlu2 %v304_v49, %s2511_s17  ;;  %v110_v49 = vld [vmem:[%s3443_s0 + $0x30] sm:$0xff]  ;;  %2323 = vmatpush.bf16.msrb.mxu3 %v2232_v43 }
 0x13d   :  { %1980 = vmatmul.msk.bf16.gmra.mxu3 %vm218_vm0, %v2630_v7  ;;  %1970 = vmatmul.msk.bf16.gmra.mxu2 %vm218_vm0, %v2650_v13 }
 0x13e   :  { %v281_v50 = vpop.permute.xlu0 %280  ;;  %2004 = vmatmul.msk.bf16.gmra.mxu1 %vm218_vm0, %v2630_v7 }
 0x13f   :  { %vm298_vm7 = vcmp.gt.f32.partialorder %v2678_v28, %v281_v50 }
 0x140   :  { %v314_v51 = vsel %vm298_vm7, %v2678_v28, %v281_v50  ;;  %v306_v52 = vsel %vm298_vm7, 1, %v2512_v33  ;;  %v111_v50 = vld [vmem:[%s3443_s0 + $0x38] sm:$0xff]  ;;  %s1894_s0 = sshll.u32 %s3455_s12, 4  ;;  %s1895_s0 = int_to_ptr.hbm [resolvable:$true] %s1894_s0 }
 0x141   :  { %336 = vrot.lane.b32.xlu2 %v314_v51, %s2511_s17  ;;  %368 = vrot.lane.b32.xlu1 %v306_v52, %s2511_s17  ;;  %v115_v51 = vpack.c.bf16 %v111_v50, %v110_v49 }
 0x143   :  { %1938 = vmatmul.msk.bf16.gmra.mxu0 %vm128_vm10, %v115_v51 }
 0x146   :  { %v283_v53 = vpop.permute.xlu1 %282 }
 0x147   :  { %vm299_vm8 = vcmp.gt.f32.partialorder %v2682_v30, %v283_v53 }
 0x148   :  { %v315_v54 = vsel %vm299_vm8, %v2682_v30, %v283_v53  ;;  %v307_v55 = vsel %vm299_vm8, 1, %v2512_v33 }
 0x149   :  { %338 = vrot.lane.b32.xlu0 %v315_v54, %s2511_s17  ;;  %370 = vrot.lane.b32.xlu2 %v307_v55, %s2511_s17 }
 0x14d   :  { %1981 = vmatmul.msk.bf16.gmra.mxu3 %vm218_vm0, %v2640_v10 }
 0x153   :  { %1991 = vmatmul.msk.bf16.vlgmr.msrb.gmra.mxu0 %vm218_vm0, %v2620_v4 }
 0x15d   :  { %1982 = vmatmul.msk.bf16.gmra.mxu3 %vm218_vm0, %v2650_v13 }
 0x163   :  { %1992 = vmatmul.msk.bf16.gmra.mxu0 %vm218_vm0, %v2630_v7 }
 0x16b   :  { %v325_v56 = vpop.permute.xlu2 %324 }
 0x16c   :  { %vm348_vm9 = vcmp.gt.f32.partialorder %v2654_v16, %v325_v56 }
 0x16d   :  { %v380_v57 = vsel %vm348_vm9, %v2654_v16, %v325_v56  ;;  %2005 = vmatmul.msk.bf16.vlgmr.msrb.gmra.mxu3 %vm218_vm0, %v2640_v10 }
 0x16e   :  { %396 = vrot.lane.b32.xlu0 %v380_v57, %s2511_s17 }
 0x173   :  { %v359_v1 = vpop.permute.xlu2 %358  ;;  %1993 = vmatmul.msk.bf16.gmra.mxu0 %vm218_vm0, %v2640_v10  ;;  %v150_v10 = vpop.f32.mrf.mxu0 }
 0x17d   :  { %2006 = vmatmul.msk.bf16.gmra.mxu3 %vm218_vm0, %v2650_v13 }
 0x183   :  { %v357_v63 = vpop.permute.xlu1 %356  ;;  %1994 = vmatmul.msk.bf16.gmra.mxu0 %vm218_vm0, %v2650_v13  ;;  %v151_v13 = vadd.f32 %v2838_v6, %v150_v10 }
 0x184   :  { %v372_v0 = vsel %vm348_vm9, 2, %v357_v63  ;;  %v331_v11 = vpop.permute.xlu2 %330 }
 0x185   :  { %428 = vrot.lane.b32.xlu2 %v372_v0, %s2511_s17  ;;  %vm351_vm12 = vcmp.gt.f32.partialorder %v2666_v22, %v331_v11 }
 0x186   :  { %v383_v21 = vsel %vm351_vm12, %v2666_v22, %v331_v11  ;;  %v152_v11 = vpop.f32.mrf.mxu0 }
 0x18b   :  { %v327_v3 = vpop.permute.xlu0 %326 }
 0x18c   :  { %vm349_vm11 = vcmp.gt.f32.partialorder %v2658_v18, %v327_v3  ;;  %v365_v23 = vpop.permute.xlu2 %364 }
 0x18d   :  { %v381_v8 = vsel %vm349_vm11, %v2658_v18, %v327_v3  ;;  %v373_v9 = vsel %vm349_vm11, 2, %v359_v1 }
 0x18e   :  { %398 = vrot.lane.b32.xlu1 %v381_v8, %s2511_s17  ;;  %430 = vrot.lane.b32.xlu0 %v373_v9, %s2511_s17 }
 0x193   :  { %v329_v14 = vpop.permute.xlu1 %328  ;;  %v361_v15 = vpop.permute.xlu0 %360 }
 0x194   :  { %vm350_vm13 = vcmp.gt.f32.partialorder %v2662_v20, %v329_v14 }
 0x195   :  { %v374_v17 = vsel %vm350_vm13, 2, %v361_v15  ;;  %v382_v19 = vsel %vm350_vm13, %v2662_v20, %v329_v14 }
 0x196   :  { %400 = vrot.lane.b32.xlu2 %v382_v19, %s2511_s17  ;;  %402 = vrot.lane.b32.xlu0 %v383_v21, %s2511_s17 }
 0x197   :  { %432 = vrot.lane.b32.xlu1 %v374_v17, %s2511_s17 }
 0x19b   :  { %v363_v25 = vpop.permute.xlu1 %362  ;;  %v333_v29 = vpop.permute.xlu0 %332 }
 0x19c   :  { %v375_v27 = vsel %vm351_vm12, 2, %v363_v25  ;;  %vm352_vm14 = vcmp.gt.f32.partialorder %v2670_v24, %v333_v29  ;;  %v337_v40 = vpop.permute.xlu2 %336 }
 0x19d   :  { %v384_v31 = vsel %vm352_vm14, %v2670_v24, %v333_v29  ;;  %v376_v32 = vsel %vm352_vm14, 2, %v365_v23  ;;  %vm354_vm15 = vcmp.gt.f32.partialorder %v2678_v28, %v337_v40  ;;  %v155_v29 = vpop.f32.mrf.mxu0 }
 0x19e   :  { %434 = vrot.lane.b32.xlu2 %v375_v27, %s2511_s17  ;;  %436 = vrot.lane.b32.xlu0 %v376_v32, %s2511_s17  ;;  %v386_v48 = vsel %vm354_vm15, %v2678_v28, %v337_v40  ;;  %v156_v35 = vadd.f32 %v2838_v6, %v155_v29  ;;  %v2264_v29 = vld [vmem:[%s3453_s10 + $0xb0] sm:$0xff] }
 0x19f   :  { %404 = vrot.lane.b32.xlu1 %v384_v31, %s2511_s17 }
 0x1a3   :  { %v335_v44 = vpop.permute.xlu1 %334  ;;  %v367_v45 = vpop.permute.xlu0 %366 }
 0x1a4   :  { %vm353_vm1 = vcmp.gt.f32.partialorder %v2674_v26, %v335_v44  ;;  %v371_v55 = vpop.permute.xlu2 %370 }
 0x1a5   :  { %v377_v46 = vsel %vm353_vm1, 2, %v367_v45  ;;  %v385_v47 = vsel %vm353_vm1, %v2674_v26, %v335_v44  ;;  %v157_v37 = vpop.f32.mrf.mxu0 }
 0x1a6   :  { %406 = vrot.lane.b32.xlu2 %v385_v47, %s2511_s17  ;;  %408 = vrot.lane.b32.xlu0 %v386_v48, %s2511_s17  ;;  %v158_v38 = vadd.f32 %v2838_v6, %v157_v37 }
 0x1a7   :  { %438 = vrot.lane.b32.xlu1 %v377_v46, %s2511_s17 }
 0x1a8   :  { %v2282_v39 = vpack.c.bf16 %v158_v38, %v156_v35  ;;  %v2263_v35 = vld [vmem:[%s3453_s10 + $0xa8] sm:$0xff]  ;;  %v2246_v38 = vld [vmem:[%s3453_s10 + $0x20] sm:$0xff] }
 0x1aa   :  { %2314 = vst [vmem:[#allocation10 + $0x8] sm:$0xff] %v2282_v39   ;;  %v2254_v39 = vld [vmem:[%s3453_s10 + $0x60] sm:$0xff] }
 0x1ad   :  { %v160_v48 = vpop.f32.mrf.mxu0 }
 0x1b0   :  { %v2950_v37 = vpop.f32.mrf.mxu3 }
 0x1b3   :  { %v369_v52 = vpop.permute.xlu1 %368 }
 0x1b4   :  { %v378_v53 = vsel %vm354_vm15, 2, %v369_v52 }
 0x1b5   :  { %440 = vrot.lane.b32.xlu2 %v378_v53, %s2511_s17  ;;  %v162_v53 = vpop.f32.mrf.mxu0 }
 0x1bb   :  { %v339_v54 = vpop.permute.xlu0 %338 }
 0x1bc   :  { %vm355_vm2 = vcmp.gt.f32.partialorder %v2682_v30, %v339_v54 }
 0x1bd   :  { %v387_v56 = vsel %vm355_vm2, %v2682_v30, %v339_v54  ;;  %v379_v57 = vsel %vm355_vm2, 2, %v371_v55  ;;  %v163_v54 = vadd.f32 %v2838_v6, %v162_v53  ;;  %v2260_v53 = vld [vmem:[%s3453_s10 + $0x90] sm:$0xff] }
 0x1be   :  { %410 = vrot.lane.b32.xlu1 %v387_v56, %s2511_s17  ;;  %442 = vrot.lane.b32.xlu0 %v379_v57, %s2511_s17 }
 0x1df   :  { %v429_v59 = vpop.permute.xlu2 %428 }
 0x1e0   :  { %v397_v4 = vpop.permute.xlu0 %396 }
 0x1e1   :  { %vm420_vm3 = vcmp.gt.f32.partialorder %v2654_v16, %v397_v4  ;;  %v2514_v16 = vmov 0.0  }
 0x1e2   :  { %v444_v60 = vsel %vm420_vm3, 3, %v429_v59  ;;  %v2241_v59 = vld [vmem:[%s3451_s8 + $0x38] sm:$0xff] }
 0x1e3   :  { %vm779_vm4 = vcmp.eq.s32.totalorder %v444_v60, 3  ;;  %vm571_vm5 = vcmp.eq.s32.totalorder %v444_v60, 1  ;;  %vm675_vm6 = vcmp.eq.s32.totalorder %v444_v60, 2  ;;  %vm452_vm7 = vcmp.ne.s32.totalorder %v444_v60, 0  ;;  %971 = vmatpush.bf16.msrb.mxu2 %v2241_v59  ;;  %v2242_v59 = vld [vmem:[%s3453_s10] sm:$0xff] }
 0x1e4   :  { %v787_v61 = vsel %vm779_vm4, 1, %v2512_v33  ;;  %v579_v62 = vsel %vm571_vm5, 1, %v2512_v33  ;;  %v683_v7 = vsel %vm675_vm6, 1, %v2512_v33  ;;  %v2826_v63 = vsel %vm452_vm7, 1.0, %v2514_v16 }
 0x1e5   :  { %796 = vperm.xlu0 %2338, %v787_v61   ;;  %588 = vperm.xlu1 %2337, %v579_v62   ;;  %vm835_vm8 = vcmp.gt.f32.partialorder %v2826_v63, 0.0  ;;  %v165_v62 = vpop.f32.mrf.mxu0 }
 0x1e6   :  { %v843_v0 = vsel %vm835_vm8, 1, %v2512_v33 }
 0x1ed   :  { %692 = vperm.xlu1 %2337, %v683_v7  }
 0x1f0   :  { %v401_v1 = vpop.permute.xlu2 %400 }
 0x1f1   :  { %vm422_vm0 = vcmp.gt.f32.partialorder %v2662_v20, %v401_v1 }
 0x1f5   :  { %852 = vperm.xlu1 %2337, %v843_v0  }
 0x1f8   :  { %v435_v15 = vpop.permute.xlu2 %434 }
 0x200   :  { %v399_v2 = vpop.permute.xlu1 %398  ;;  %v431_v3 = vpop.permute.xlu0 %430 }
 0x201   :  { %vm421_vm9 = vcmp.gt.f32.partialorder %v2658_v18, %v399_v2  ;;  %v153_v18 = vadd.f32 %v2838_v6, %v152_v11  ;;  %v407_v40 = vpop.permute.xlu2 %406 }
 0x202   :  { %v445_v5 = vsel %vm421_vm9, 3, %v431_v3 }
 0x203   :  { %vm780_vm10 = vcmp.eq.s32.totalorder %v445_v5, 3  ;;  %vm572_vm11 = vcmp.eq.s32.totalorder %v445_v5, 1  ;;  %vm676_vm12 = vcmp.eq.s32.totalorder %v445_v5, 2  ;;  %v2277_v19 = vpack.c.bf16 %v153_v18, %v151_v13 }
 0x204   :  { %v788_v8 = vsel %vm780_vm10, 1, %v2512_v33  ;;  %v580_v9 = vsel %vm572_vm11, 1, %v2512_v33  ;;  %vm453_vm14 = vcmp.ne.s32.totalorder %v445_v5, 0  ;;  %v684_v25 = vsel %vm676_vm12, 1, %v2512_v33 }
 0x205   :  { %799 = vperm.xlu1 %2337, %v788_v8   ;;  %591 = vperm.xlu2 %2339, %v580_v9   ;;  %2278 = vst [vmem:[#allocation10] sm:$0xff] %v2277_v19   ;;  %v2850_v27 = vsel %vm453_vm14, 1.0, %v2514_v16  ;;  %vm425_vm11 = vcmp.gt.f32.partialorder %v2674_v26, %v407_v40  ;;  %v161_v26 = vadd.f32 %v2838_v6, %v160_v48  ;;  %v167_v9 = vpop.f32.mrf.mxu0  ;;  %v2238_v19 = vld [vmem:[%s3451_s8 + $0x20] sm:$0xff]  ;;  %v2236_v40 = vld [vmem:[%s3451_s8 + $0x10] sm:$0xff]  ;;  %v2235_v48 = vld [vmem:[%s3451_s8 + $0x8] sm:$0xff] }
 0x206   :  { %vm836_vm3 = vcmp.gt.f32.partialorder %v2850_v27, 0.0  ;;  %v166_v5 = vadd.f32 %v2838_v6, %v165_v62  ;;  %v168_v13 = vadd.f32 %v2838_v6, %v167_v9  ;;  %v2258_v62 = vld [vmem:[%s3453_s10 + $0x80] sm:$0xff] }
 0x207   :  { %v844_v32 = vsel %vm836_vm3, 1, %v2512_v33  ;;  %v2287_v56 = vpack.c.bf16 %v163_v54, %v161_v26  ;;  %v553_v26 = vpop.f32.mrf.mxu3  ;;  %v503_v54 = vpop.f32.mrf.mxu1  ;;  %v3031_v9 = vld [vmem:[%s3450_s7 + $0x2] ss:$0 sm:$0xff] }
 0x208   :  { %v403_v14 = vpop.permute.xlu0 %402  ;;  %v2292_v11 = vpack.c.bf16 %v168_v13, %v166_v5  ;;  %v3021_v5 = vld [vmem:[%s3450_s7] ss:$0 sm:$0xff] }
 0x209   :  { %v433_v12 = vpop.permute.xlu1 %432  ;;  %vm423_vm13 = vcmp.gt.f32.partialorder %v2666_v22, %v403_v14  ;;  %2315 = vst [vmem:[#allocation10 + $0x10] sm:$0xff] %v2287_v56   ;;  %v2249_v14 = vld [vmem:[%s3453_s10 + $0x38] sm:$0xff]  ;;  %v2251_v56 = vld [vmem:[%s3453_s10 + $0x48] sm:$0xff] }
 0x20a   :  { %v446_v17 = vsel %vm422_vm0, 3, %v433_v12  ;;  %v447_v21 = vsel %vm423_vm13, 3, %v435_v15  ;;  %2316 = vst [vmem:[#allocation10 + $0x18] sm:$0xff] %v2292_v11   ;;  %v2257_v15 = vld [vmem:[%s3453_s10 + $0x78] sm:$0xff]  ;;  %1290 = vmatpush.bf16.msra.mxu3 %v2249_v14 }
 0x20b   :  { %vm573_vm15 = vcmp.eq.s32.totalorder %v446_v17, 1  ;;  %vm574_vm1 = vcmp.eq.s32.totalorder %v447_v21, 1  ;;  %vm677_vm2 = vcmp.eq.s32.totalorder %v446_v17, 2  ;;  %vm678_vm4 = vcmp.eq.s32.totalorder %v447_v21, 2  ;;  %1386 = vmatpush.bf16.msra.mxu0 %v2257_v15  ;;  %1900 = dma.vmem_to_hbm [thread:$0]  %s1893_s3, 512, %s1895_s0, [#allocation4], %s2506_s21, %s2506_s21, %s2507_s22  }
 0x20c   :  { %v581_v23 = vsel %vm573_vm15, 1, %v2512_v33  ;;  %v582_v20 = vsel %vm574_vm1, 1, %v2512_v33  ;;  %vm454_vm5 = vcmp.ne.s32.totalorder %v446_v17, 0  ;;  %v685_v31 = vsel %vm677_vm2, 1, %v2512_v33 }
 0x20d   :  { %594 = vperm.xlu0 %2338, %v581_v23   ;;  %695 = vperm.xlu2 %2339, %v684_v25   ;;  %v686_v34 = vsel %vm678_vm4, 1, %v2512_v33  ;;  %v2858_v36 = vsel %vm454_vm5, 1.0, %v2514_v16  ;;  %vm782_vm6 = vcmp.eq.s32.totalorder %v447_v21, 3  ;;  %vm781_vm7 = vcmp.eq.s32.totalorder %v446_v17, 3  ;;  %v2265_v17 = vld [vmem:[%s3453_s10 + $0xb8] sm:$0xff]  ;;  %v2256_v23 = vld [vmem:[%s3453_s10 + $0x70] sm:$0xff] }
 0x20e   :  { %597 = vperm.xlu1 %2337, %v582_v20   ;;  %vm837_vm8 = vcmp.gt.f32.partialorder %v2858_v36, 0.0  ;;  %vm455_vm10 = vcmp.ne.s32.totalorder %v447_v21, 0  ;;  %v790_v43 = vsel %vm782_vm6, 1, %v2512_v33  ;;  %v789_v44 = vsel %vm781_vm7, 1, %v2512_v33  ;;  %v2248_v21 = vld [vmem:[%s3453_s10 + $0x30] sm:$0xff]  ;;  %1538 = vmatpush.bf16.msrb.mxu1 %v2265_v17 }
 0x20f   :  { %v845_v45 = vsel %vm837_vm8, 1, %v2512_v33  ;;  %v2868_v47 = vsel %vm455_vm10, 1.0, %v2514_v16  ;;  %v441_v60 = vpop.permute.xlu2 %440  ;;  %1291 = vmatpush.bf16.msra.mxu3 %v2248_v21  ;;  %1387 = vmatpush.bf16.msra.mxu0 %v2256_v23 }
 0x210   :  { %v437_v41 = vpop.permute.xlu0 %436  ;;  %vm838_vm12 = vcmp.gt.f32.partialorder %v2868_v47, 0.0 }
 0x211   :  { %v405_v22 = vpop.permute.xlu1 %404  ;;  %v846_v50 = vsel %vm838_vm12, 1, %v2512_v33 }
 0x212   :  { %vm424_vm9 = vcmp.gt.f32.partialorder %v2670_v24, %v405_v22  ;;  %v2237_v22 = vld [vmem:[%s3451_s8 + $0x18] sm:$0xff]  ;;  %1539 = vmatpush.bf16.msrb.mxu1 %v2264_v29 }
 0x213   :  { %v448_v46 = vsel %vm424_vm9, 3, %v437_v41 }
 0x214   :  { %vm783_vm0 = vcmp.eq.s32.totalorder %v448_v46, 3  ;;  %vm456_vm14 = vcmp.ne.s32.totalorder %v448_v46, 0  ;;  %vm575_vm1 = vcmp.eq.s32.totalorder %v448_v46, 1  ;;  %vm679_vm5 = vcmp.eq.s32.totalorder %v448_v46, 2  ;;  %v2253_v46 = vld [vmem:[%s3453_s10 + $0x58] sm:$0xff] }
 0x215   :  { %698 = vperm.xlu0 %2338, %v685_v31   ;;  %855 = vperm.xlu2 %2339, %v844_v32   ;;  %v791_v49 = vsel %vm783_vm0, 1, %v2512_v33  ;;  %v2876_v52 = vsel %vm456_vm14, 1.0, %v2514_v16  ;;  %v583_v58 = vsel %vm575_vm1, 1, %v2512_v33  ;;  %v687_v1 = vsel %vm679_vm5, 1, %v2512_v33  ;;  %v2247_v32 = vld [vmem:[%s3453_s10 + $0x28] sm:$0xff] }
 0x216   :  { %701 = vperm.xlu1 %2337, %v686_v34   ;;  %vm839_vm2 = vcmp.gt.f32.partialorder %v2876_v52, 0.0  ;;  %v2255_v34 = vld [vmem:[%s3453_s10 + $0x68] sm:$0xff]  ;;  %1292 = vmatpush.bf16.msra.mxu3 %v2247_v32 }
 0x217   :  { %v847_v4 = vsel %vm839_vm2, 1, %v2512_v33  ;;  %1388 = vmatpush.bf16.msra.mxu0 %v2255_v34  ;;  %1540 = vmatpush.bf16.msrb.mxu1 %v2263_v35 }
 0x218   :  { %v409_v55 = vpop.permute.xlu0 %408 }
 0x219   :  { %v439_v42 = vpop.permute.xlu1 %438  ;;  %vm426_vm3 = vcmp.gt.f32.partialorder %v2678_v28, %v409_v55  ;;  %v2240_v28 = vld [vmem:[%s3451_s8 + $0x30] sm:$0xff]  ;;  %v2243_v55 = vld [vmem:[%s3453_s10 + $0x8] sm:$0xff] }
 0x21a   :  { %v449_v24 = vsel %vm425_vm11, 3, %v439_v42  ;;  %v2887_v61 = vsel %vm426_vm3, 3, %v441_v60  ;;  %972 = vmatpush.bf16.msrb.mxu2 %v2240_v28  ;;  %1293 = vmatpush.bf16.msra.mxu3 %v2246_v38  ;;  %v2250_v60 = vld [vmem:[%s3453_s10 + $0x40] sm:$0xff] }
 0x21b   :  { %vm576_vm13 = vcmp.eq.s32.totalorder %v449_v24, 1  ;;  %vm680_vm15 = vcmp.eq.s32.totalorder %v449_v24, 2  ;;  %vm784_vm4 = vcmp.eq.s32.totalorder %v449_v24, 3  ;;  %vm681_vm6 = vcmp.eq.s32.totalorder %v2887_v61, 2  ;;  %1389 = vmatpush.bf16.msra.mxu0 %v2254_v39 }
 0x21c   :  { %v584_v51 = vsel %vm576_vm13, 1, %v2512_v33  ;;  %v688_v57 = vsel %vm680_vm15, 1, %v2512_v33  ;;  %vm457_vm7 = vcmp.ne.s32.totalorder %v449_v24, 0  ;;  %v792_v10 = vsel %vm784_vm4, 1, %v2512_v33  ;;  %v2261_v24 = vld [vmem:[%s3453_s10 + $0x98] sm:$0xff] }
 0x21d   :  { %805 = vperm.xlu0 %2338, %v790_v43   ;;  %802 = vperm.xlu2 %2339, %v789_v44   ;;  %v689_v2 = vsel %vm681_vm6, 1, %v2512_v33  ;;  %v2898_v3 = vsel %vm457_vm7, 1.0, %v2514_v16  ;;  %vm785_vm9 = vcmp.eq.s32.totalorder %v2887_v61, 3  ;;  %vm577_vm12 = vcmp.eq.s32.totalorder %v2887_v61, 1  ;;  %v2262_v43 = vld [vmem:[%s3453_s10 + $0xa0] sm:$0xff] }
 0x21e   :  { %858 = vperm.xlu1 %2337, %v845_v45   ;;  %vm840_vm10 = vcmp.gt.f32.partialorder %v2898_v3, 0.0  ;;  %v793_v18 = vsel %vm785_vm9, 1, %v2512_v33  ;;  %v585_v20 = vsel %vm577_vm12, 1, %v2512_v33  ;;  %vm458_vm1 = vcmp.ne.s32.totalorder %v2887_v61, 0  ;;  %1541 = vmatpush.bf16.msrb.mxu1 %v2262_v43  ;;  %v2245_v45 = vld [vmem:[%s3453_s10 + $0x18] sm:$0xff]  ;;  %v3011_v61 = vpop.f32.mrf.mxu3 }
 0x21f   :  { %v848_v12 = vsel %vm840_vm10, 1, %v2512_v33  ;;  %v2968_v44 = vsel %vm458_vm1, 1.0, %v2514_v16  ;;  %1294 = vmatpush.bf16.msra.mxu3 %v2245_v45  ;;  %1390 = vmatpush.bf16.msra.mxu0 %v2253_v46 }
 0x220   :  { %vm841_vm2 = vcmp.gt.f32.partialorder %v2968_v44, 0.0 }
 0x222   :  { %1542 = vmatpush.bf16.msrb.mxu1 %v2261_v24 }
 0x225   :  { %808 = vperm.xlu0 %2338, %v791_v49   ;;  %861 = vperm.xlu2 %2339, %v846_v50   ;;  %v2244_v49 = vld [vmem:[%s3453_s10 + $0x10] sm:$0xff] }
 0x226   :  { %603 = vperm.xlu1 %2337, %v584_v51   ;;  %v2252_v50 = vld [vmem:[%s3453_s10 + $0x50] sm:$0xff]  ;;  %v849_v51 = vsel %vm841_vm2, 1, %v2512_v33  ;;  %1295 = vmatpush.bf16.msra.mxu3 %v2244_v49  ;;  %v508_v49 = vpop.f32.mrf.mxu2 }
 0x227   :  { %1391 = vmatpush.bf16.msra.mxu0 %v2252_v50  ;;  %1543 = vmatpush.bf16.msrb.mxu1 %v2260_v53 }
 0x22a   :  { %1296 = vmatpush.bf16.msra.mxu3 %v2243_v55 }
 0x22b   :  { %1392 = vmatpush.bf16.msra.mxu0 %v2251_v56 }
 0x22d   :  { %707 = vperm.xlu0 %2338, %v688_v57   ;;  %600 = vperm.xlu2 %2339, %v583_v58   ;;  %v2259_v57 = vld [vmem:[%s3453_s10 + $0x88] sm:$0xff] }
 0x22e   :  { %864 = vperm.xlu1 %2337, %v847_v4   ;;  %1544 = vmatpush.bf16.msrb.mxu1 %v2259_v57  ;;  %v2234_v4 = vld [vmem:[%s3451_s8] sm:$0xff] }
 0x22f   :  { %1297 = vmatpush.bf16.msra.mxu3 %v2242_v59  ;;  %1393 = vmatpush.bf16.msra.mxu0 %v2250_v60  ;;  %v509_v59 = vadd.f32 %v3021_v5, %v508_v49 }
 0x230   :  { %v411_v7 = vpop.permute.xlu1 %410  ;;  %v443_v0 = vpop.permute.xlu0 %442 }
 0x231   :  { %vm427_vm8 = vcmp.gt.f32.partialorder %v2682_v30, %v411_v7  ;;  %v2239_v30 = vld [vmem:[%s3451_s8 + $0x28] sm:$0xff]  ;;  %v505_v7 = vpop.f32.mrf.mxu1 }
 0x232   :  { %v451_v8 = vsel %vm427_vm8, 3, %v443_v0  ;;  %973 = vmatpush.bf16.msrb.mxu2 %v2239_v30  ;;  %1545 = vmatpush.bf16.msrb.mxu1 %v2258_v62  ;;  %v504_v30 = vadd.f32 %v3021_v5, %v503_v54 }
 0x233   :  { %vm786_vm11 = vcmp.eq.s32.totalorder %v451_v8, 3  ;;  %vm578_vm0 = vcmp.eq.s32.totalorder %v451_v8, 1  ;;  %vm459_vm13 = vcmp.ne.s32.totalorder %v451_v8, 0  ;;  %vm682_vm15 = vcmp.eq.s32.totalorder %v451_v8, 2  ;;  %v3026_v8 = vld [vmem:[%s3450_s7 + $0x1] ss:$0 sm:$0xff] }
 0x234   :  { %v794_v6 = vsel %vm786_vm11, 1, %v2512_v33  ;;  %v586_v25 = vsel %vm578_vm0, 1, %v2512_v33  ;;  %v2938_v31 = vsel %vm459_vm13, 1.0, %v2514_v16  ;;  %v690_v42 = vsel %vm682_vm15, 1, %v2512_v33 }
 0x235   :  { %811 = vperm.xlu0 %2338, %v792_v10   ;;  %704 = vperm.xlu2 %2339, %v687_v1   ;;  %vm842_vm14 = vcmp.gt.f32.partialorder %v2938_v31, 0.0  ;;  %v655_v10 = vpop.f32.mrf.mxu0  ;;  %v552_v11 = vadd.f32 %v3026_v8, %v2950_v37 }
 0x236   :  { %710 = vperm.xlu1 %2337, %v689_v2   ;;  %974 = vmatpush.bf16.msrb.mxu2 %v2238_v19  ;;  %v850_v41 = vsel %vm842_vm14, 1, %v2512_v33  ;;  %v3016_v2 = vpop.f32.mrf.mxu3  ;;  %v656_v14 = vadd.f32 %v3031_v9, %v655_v10  ;;  %v506_v19 = vadd.f32 %v3021_v5, %v505_v7  ;;  %v557_v7 = vadd.f32 %v3026_v8, %v3011_v61 }
 0x237   :  { %v559_v10 = vadd.f32 %v3026_v8, %v3016_v2 }
 0x239   :  { %v759_v13 = vpop.f32.mrf.mxu1 }
 0x23a   :  { %975 = vmatpush.bf16.msrb.mxu2 %v2237_v22 }
 0x23d   :  { %814 = vperm.xlu0 %2338, %v793_v18   ;;  %867 = vperm.xlu2 %2339, %v848_v12   ;;  %v3039_v18 = vld [vmem:[%s3450_s7 + $0x3] ss:$0 sm:$0xff]  ;;  %v657_v15 = vpop.f32.mrf.mxu0 }
 0x23e   :  { %817 = vperm.xlu1 %2337, %v794_v6   ;;  %976 = vmatpush.bf16.msrb.mxu2 %v2236_v40  ;;  %v3042_v17 = vpop.f32.mrf.mxu3  ;;  %v658_v22 = vadd.f32 %v3031_v9, %v657_v15 }
 0x241   :  { %v761_v32 = vpop.f32.mrf.mxu1 }
 0x242   :  { %977 = vmatpush.bf16.msrb.mxu2 %v2235_v48  ;;  %v762_v37 = vadd.f32 %v3039_v18, %v761_v32  ;;  %v2273_v32 = vld [vmem:[%s3453_s10 + $0xf8] sm:$0xff] }
 0x245   :  { %609 = vperm.xlu0 %2338, %v586_v25   ;;  %606 = vperm.xlu2 %2339, %v585_v20   ;;  %v554_v25 = vadd.f32 %v3026_v8, %v553_v26  ;;  %v760_v20 = vadd.f32 %v3039_v18, %v759_v13  ;;  %v660_v50 = vpop.f32.mrf.mxu0 }
 0x246   :  { %978 = vmatpush.bf16.msrb.mxu2 %v2234_v4  ;;  %v3055_v24 = vpop.f32.mrf.mxu3  ;;  %v661_v62 = vadd.f32 %v3031_v9, %v660_v50  ;;  %v2271_v50 = vld [vmem:[%s3453_s10 + $0xe8] sm:$0xff] }
 0x249   :  { %v764_v54 = vpop.f32.mrf.mxu1 }
 0x24a   :  { %1690 = vmatpush.bf16.msra.mxu2 %v2273_v32 }
 0x24d   :  { %873 = vperm.xlu0 %2338, %v850_v41   ;;  %713 = vperm.xlu2 %2339, %v690_v42   ;;  %v662_v60 = vpop.f32.mrf.mxu0 }
 0x24e   :  { %v3067_v55 = vpop.f32.mrf.mxu3 }
 0x255   :  { %870 = vperm.xlu2 %2339, %v849_v51  }
 0x256   :  { %v3081_v15 = vpop.f32.mrf.mxu3 }
 0x257   :  { %v589_v58 = vpop.permute.xlu1 %588  ;;  %v797_v23 = vpop.permute.xlu0 %796 }
 0x258   :  { %vm611_vm3 = vcmp.eq.s32.totalorder %v589_v58, 1  ;;  %vm819_vm8 = vcmp.eq.s32.totalorder %v797_v23, 1  ;;  %v510_v58 = vpop.f32.mrf.mxu2 }
 0x259   :  { %v619_v21 = vsel %vm611_vm3, %v552_v11, %v504_v30  ;;  %v765_v30 = vadd.f32 %v3039_v18, %v764_v54 }
 0x25f   :  { %v592_v28 = vpop.permute.xlu2 %591  ;;  %v693_v0 = vpop.permute.xlu1 %692 }
 0x260   :  { %vm715_vm4 = vcmp.eq.s32.totalorder %v693_v0, 1  ;;  %vm612_vm5 = vcmp.eq.s32.totalorder %v592_v28, 1  ;;  %v766_v28 = vpop.f32.mrf.mxu1  ;;  %v511_v0 = vadd.f32 %v3021_v5, %v510_v58 }
 0x261   :  { %v723_v29 = vsel %vm715_vm4, %v656_v14, %v619_v21  ;;  %v620_v34 = vsel %vm612_vm5, %v554_v25, %v506_v19  ;;  %v767_v11 = vadd.f32 %v3039_v18, %v766_v28  ;;  %v2270_v28 = vld [vmem:[%s3453_s10 + $0xe0] sm:$0xff] }
 0x262   :  { %v827_v35 = vsel %vm819_vm8, %v760_v20, %v723_v29 }
 0x267   :  { %v696_v1 = vpop.permute.xlu2 %695  ;;  %v853_v12 = vpop.permute.xlu1 %852 }
 0x268   :  { %vm875_vm6 = vcmp.eq.s32.totalorder %v853_v12, 1  ;;  %vm716_vm7 = vcmp.eq.s32.totalorder %v696_v1, 1  ;;  %v663_v1 = vadd.f32 %v3031_v9, %v662_v60 }
 0x269   :  { %v3049_v40 = vsel %vm875_vm6, %v827_v35, 0.0  ;;  %v724_v41 = vsel %vm716_vm7, %v658_v22, %v620_v34 }
 0x26a   :  { %v891_v45 = vmax.f32 %v3049_v40, 0.0 }
 0x26f   :  { %v856_v6 = vpop.permute.xlu2 %855 }
 0x270   :  { %vm876_vm10 = vcmp.eq.s32.totalorder %v856_v6, 1 }
 0x277   :  { %v800_v38 = vpop.permute.xlu1 %799  ;;  %v803_v39 = vpop.permute.xlu2 %802 }
 0x278   :  { %vm820_vm9 = vcmp.eq.s32.totalorder %v800_v38, 1  ;;  %vm821_vm14 = vcmp.eq.s32.totalorder %v803_v39, 1  ;;  %v665_v39 = vpop.f32.mrf.mxu0 }
 0x279   :  { %v828_v42 = vsel %vm820_vm9, %v762_v37, %v724_v41  ;;  %v513_v37 = vpop.f32.mrf.mxu2  ;;  %v2272_v41 = vld [vmem:[%s3453_s10 + $0xf0] sm:$0xff]  ;;  %v666_v58 = vadd.f32 %v3031_v9, %v665_v39 }
 0x27a   :  { %v3051_v43 = vsel %vm876_vm10, %v828_v42, 0.0  ;;  %v769_v42 = vpop.f32.mrf.mxu3  ;;  %1691 = vmatpush.bf16.msra.mxu2 %v2272_v41  ;;  %v514_v54 = vadd.f32 %v3021_v5, %v513_v37 }
 0x27b   :  { %v892_v46 = vmax.f32 %v3051_v43, 0.0  ;;  %v770_v60 = vadd.f32 %v3039_v18, %v769_v42  ;;  %v2266_v42 = vld [vmem:[%s3453_s10 + $0xc0] sm:$0xff] }
 0x27d   :  { %v3061_v48 = vpack.c.bf16 %v892_v46, %v891_v45 }
 0x27e   :  { %1692 = vmatpush.bf16.msra.mxu2 %v2271_v50 }
 0x27f   :  { %v595_v51 = vpop.permute.xlu0 %594  ;;  %v862_v26 = vpop.permute.xlu2 %861  ;;  %979 = vmatmul.bf16.vlgmr.msrb.gmra.mxu2 %v3061_v48  ;;  %1298 = vmatmul.bf16.vlgmr.msra.gmra.mxu3 %v3061_v48 }
 0x280   :  { %v598_v53 = vpop.permute.xlu1 %597  ;;  %1394 = vmatmul.bf16.vlgmr.msra.gmra.mxu0 %v3061_v48  ;;  %1546 = vmatmul.bf16.vlgmr.msrb.gmra.mxu1 %v3061_v48  ;;  %vm613_vm11 = vcmp.eq.s32.totalorder %v595_v51, 1  ;;  %vm878_vm1 = vcmp.eq.s32.totalorder %v862_v26, 1 }
 0x281   :  { %vm614_vm12 = vcmp.eq.s32.totalorder %v598_v53, 1  ;;  %v621_v13 = vsel %vm613_vm11, %v557_v7, %v509_v59  ;;  %v515_v26 = vpop.f32.mrf.mxu2  ;;  %v562_v53 = vadd.f32 %v3026_v8, %v3042_v17  ;;  %v564_v17 = vadd.f32 %v3026_v8, %v3055_v24 }
 0x282   :  { %v622_v6 = vsel %vm614_vm12, %v559_v10, %v511_v0  ;;  %v771_v59 = vpop.f32.mrf.mxu3  ;;  %1693 = vmatpush.bf16.msra.mxu2 %v2270_v28 }
 0x283   :  { %v772_v10 = vadd.f32 %v3039_v18, %v771_v59 }
 0x287   :  { %v699_v56 = vpop.permute.xlu0 %698  ;;  %v3069_v57 = vpop.permute.xlu2 %600 }
 0x288   :  { %v702_v4 = vpop.permute.xlu1 %701  ;;  %vm717_vm0 = vcmp.eq.s32.totalorder %v699_v56, 1  ;;  %v667_v56 = vpop.f32.mrf.mxu0  ;;  %vm615_vm3 = vcmp.eq.s32.totalorder %v3069_v57, 1 }
 0x289   :  { %vm718_vm13 = vcmp.eq.s32.totalorder %v702_v4, 1  ;;  %v725_v12 = vsel %vm717_vm0, %v661_v62, %v621_v13  ;;  %v516_v62 = vadd.f32 %v3021_v5, %v515_v26  ;;  %v668_v57 = vadd.f32 %v3031_v9, %v667_v56 }
 0x28a   :  { %v726_v61 = vsel %vm718_vm13, %v663_v1, %v622_v6  ;;  %v829_v21 = vsel %vm821_vm14, %v765_v30, %v725_v12  ;;  %v623_v7 = vsel %vm615_vm3, %v562_v53, %v514_v54  ;;  %v2269_v12 = vld [vmem:[%s3453_s10 + $0xd8] sm:$0xff]  ;;  %v567_v54 = vadd.f32 %v3026_v8, %v3067_v55 }
 0x28b   :  { %1694 = vmatpush.bf16.msra.mxu2 %v2269_v12 }
 0x28f   :  { %v806_v14 = vpop.permute.xlu0 %805  ;;  %v705_v23 = vpop.permute.xlu2 %704 }
 0x290   :  { %vm822_vm15 = vcmp.eq.s32.totalorder %v806_v14, 1  ;;  %v859_v19 = vpop.permute.xlu1 %858  ;;  %vm719_vm4 = vcmp.eq.s32.totalorder %v705_v23, 1  ;;  %v670_v37 = vpop.f32.mrf.mxu0 }
 0x291   :  { %v830_v2 = vsel %vm822_vm15, %v767_v11, %v726_v61  ;;  %vm877_vm2 = vcmp.eq.s32.totalorder %v859_v19, 1  ;;  %v727_v1 = vsel %vm719_vm4, %v666_v58, %v623_v7  ;;  %v2268_v61 = vld [vmem:[%s3453_s10 + $0xd0] sm:$0xff]  ;;  %v671_v56 = vadd.f32 %v3031_v9, %v670_v37 }
 0x292   :  { %v3083_v25 = vsel %vm878_vm1, %v830_v2, 0.0  ;;  %v3085_v20 = vsel %vm877_vm2, %v829_v21, 0.0  ;;  %v518_v2 = vpop.f32.mrf.mxu2  ;;  %1695 = vmatpush.bf16.msra.mxu2 %v2268_v61 }
 0x293   :  { %v894_v29 = vmax.f32 %v3083_v25, 0.0  ;;  %v893_v22 = vmax.f32 %v3085_v20, 0.0 }
 0x295   :  { %v3096_v34 = vpack.c.bf16 %v894_v29, %v893_v22 }
 0x297   :  { %v809_v35 = vpop.permute.xlu0 %808  ;;  %984 = vmatmul.bf16.gmra.mxu2 %v3096_v34  ;;  %1303 = vmatmul.bf16.gmra.mxu3 %v3096_v34  ;;  %v868_v49 = vpop.permute.xlu2 %867 }
 0x298   :  { %1399 = vmatmul.bf16.gmra.mxu0 %v3096_v34  ;;  %1551 = vmatmul.bf16.gmra.mxu1 %v3096_v34  ;;  %v604_v38 = vpop.permute.xlu1 %603  ;;  %vm823_vm5 = vcmp.eq.s32.totalorder %v809_v35, 1  ;;  %vm880_vm10 = vcmp.eq.s32.totalorder %v868_v49, 1  ;;  %v2267_v35 = vld [vmem:[%s3453_s10 + $0xc8] sm:$0xff]  ;;  %v672_v53 = vpop.f32.mrf.mxu0  ;;  %s2515_s10 = smov 125  }
 0x299   :  { %vm616_vm6 = vcmp.eq.s32.totalorder %v604_v38, 1  ;;  %v831_v30 = vsel %vm823_vm5, %v770_v60, %v727_v1  ;;  %v774_v38 = vpop.f32.mrf.mxu3  ;;  %1696 = vmatpush.bf16.msra.mxu2 %v2267_v35 }
 0x29a   :  { %v624_v13 = vsel %vm616_vm6, %v564_v17, %v516_v62  ;;  %v520_v50 = vpop.f32.mrf.mxu2  ;;  %v775_v59 = vadd.f32 %v3039_v18, %v774_v38  ;;  %v673_v62 = vadd.f32 %v3031_v9, %v672_v53 }
 0x29b   :  { %v521_v26 = vadd.f32 %v3021_v5, %v520_v50 }
 0x29d   :  { %1697 = vmatpush.bf16.msra.mxu2 %v2266_v42 }
 0x29f   :  { %v708_v51 = vpop.permute.xlu0 %707  ;;  %v607_v0 = vpop.permute.xlu2 %606 }
 0x2a0   :  { %v865_v4 = vpop.permute.xlu1 %864  ;;  %vm720_vm7 = vcmp.eq.s32.totalorder %v708_v51, 1  ;;  %v519_v51 = vadd.f32 %v3021_v5, %v518_v2  ;;  %vm617_vm11 = vcmp.eq.s32.totalorder %v607_v0, 1 }
 0x2a1   :  { %vm879_vm8 = vcmp.eq.s32.totalorder %v865_v4, 1  ;;  %v728_v24 = vsel %vm720_vm7, %v668_v57, %v624_v13  ;;  %v569_v4 = vadd.f32 %v3026_v8, %v3081_v15  ;;  %v776_v5 = vpop.f32.mrf.mxu3 }
 0x2a2   :  { %v3125_v6 = vsel %vm879_vm8, %v831_v30, 0.0  ;;  %v625_v28 = vsel %vm617_vm11, %v567_v54, %v519_v51  ;;  %v777_v0 = vadd.f32 %v3039_v18, %v776_v5  ;;  %v2348_v18 = vld [vmem:[#allocation7] ss:$0 sm:$0xff] }
 0x2a3   :  { %v895_v21 = vmax.f32 %v3125_v6, 0.0 }
 0x2a7   :  { %v812_v11 = vpop.permute.xlu0 %811  ;;  %v714_v39 = vpop.permute.xlu2 %713 }
 0x2a8   :  { %vm824_vm9 = vcmp.eq.s32.totalorder %v812_v11, 1  ;;  %v711_v49 = vpop.permute.xlu1 %710  ;;  %vm722_vm14 = vcmp.eq.s32.totalorder %v714_v39, 1 }
 0x2a9   :  { %v832_v14 = vsel %vm824_vm9, %v772_v10, %v728_v24  ;;  %vm721_vm0 = vcmp.eq.s32.totalorder %v711_v49, 1 }
 0x2aa   :  { %v3130_v19 = vsel %vm880_vm10, %v832_v14, 0.0  ;;  %v729_v57 = vsel %vm721_vm0, %v671_v56, %v625_v28 }
 0x2ab   :  { %v896_v23 = vmax.f32 %v3130_v19, 0.0 }
 0x2ad   :  { %v901_v32 = vpack.c.bf16 %v896_v23, %v895_v21 }
 0x2af   :  { %v815_v41 = vpop.permute.xlu0 %814  ;;  %989 = vmatmul.bf16.gmra.mxu2 %v901_v32  ;;  %1308 = vmatmul.bf16.gmra.mxu3 %v901_v32  ;;  %v871_v60 = vpop.permute.xlu2 %870 }
 0x2b0   :  { %1404 = vmatmul.bf16.gmra.mxu0 %v901_v32  ;;  %1556 = vmatmul.bf16.gmra.mxu1 %v901_v32  ;;  %vm825_vm13 = vcmp.eq.s32.totalorder %v815_v41, 1  ;;  %v818_v55 = vpop.permute.xlu1 %817  ;;  %vm881_vm15 = vcmp.eq.s32.totalorder %v871_v60, 1 }
 0x2b1   :  { %v833_v7 = vsel %vm825_vm13, %v775_v59, %v729_v57  ;;  %vm826_vm1 = vcmp.eq.s32.totalorder %v818_v55, 1 }
 0x2b2   :  { %v3154_v8 = vsel %vm881_vm15, %v833_v7, 0.0 }
 0x2b3   :  { %v897_v9 = vmax.f32 %v3154_v8, 0.0 }
 0x2b7   :  { %v610_v58 = vpop.permute.xlu0 %609 }
 0x2b8   :  { %vm618_vm12 = vcmp.eq.s32.totalorder %v610_v58, 1 }
 0x2b9   :  { %v626_v17 = vsel %vm618_vm12, %v569_v4, %v521_v26 }
 0x2ba   :  { %v730_v10 = vsel %vm722_vm14, %v673_v62, %v626_v17 }
 0x2bb   :  { %v834_v1 = vsel %vm826_vm1, %v777_v0, %v730_v10 }
 0x2bf   :  { %v874_v15 = vpop.permute.xlu0 %873 }
 0x2c0   :  { %vm882_vm2 = vcmp.eq.s32.totalorder %v874_v15, 1 }
 0x2c1   :  { %v3156_v13 = vsel %vm882_vm2, %v834_v1, 0.0 }
 0x2c2   :  { %v898_v30 = vmax.f32 %v3156_v13, 0.0 }
 0x2c4   :  { %v902_v11 = vpack.c.bf16 %v898_v30, %v897_v9 }
 0x2c6   :  { %994 = vmatmul.bf16.gmra.mxu2 %v902_v11  ;;  %1313 = vmatmul.bf16.gmra.mxu3 %v902_v11 }
 0x2c7   :  { %1409 = vmatmul.bf16.gmra.mxu0 %v902_v11  ;;  %1561 = vmatmul.bf16.gmra.mxu1 %v902_v11 }
 0x2d6   :  { %1698 = vmatmul.bf16.vlgmr.msra.gmra.mxu2 %v3061_v48 }
 0x2e6   :  { %1703 = vmatmul.bf16.gmra.mxu2 %v3096_v34 }
 0x2f6   :  { %1708 = vmatmul.bf16.gmra.mxu2 %v901_v32 }
 0x302   :  { %v980_v12 = vpop.f32.mrf.mxu2 }
 0x303   :  { %v3166_v24 = vadd.f32 %v2348_v18, %v980_v12 }
 0x305   :  { %1008 = vrot.lane.b32.xlu1 %v3166_v24, %s2511_s17 }
 0x306   :  { %1713 = vmatmul.bf16.gmra.mxu2 %v902_v11 }
 0x30a   :  { %v982_v14 = vpop.f32.mrf.mxu2 }
 0x30b   :  { %v3170_v61 = vadd.f32 %v2348_v18, %v982_v14 }
 0x30d   :  { %1010 = vrot.lane.b32.xlu2 %v3170_v61, %s2511_s17 }
 0x31a   :  { %v985_v2 = vpop.f32.mrf.mxu2 }
 0x31b   :  { %v3174_v35 = vadd.f32 %v2348_v18, %v985_v2 }
 0x31d   :  { %1012 = vrot.lane.b32.xlu0 %v3174_v35, %s2511_s17 }
 0x322   :  { %v987_v48 = vpop.f32.mrf.mxu2 }
 0x323   :  { %v3178_v34 = vadd.f32 %v2348_v18, %v987_v48 }
 0x325   :  { %1014 = vrot.lane.b32.xlu1 %v3178_v34, %s2511_s17 }
 0x332   :  { %v990_v32 = vpop.f32.mrf.mxu2 }
 0x333   :  { %v3182_v37 = vadd.f32 %v2348_v18, %v990_v32 }
 0x335   :  { %1016 = vrot.lane.b32.xlu2 %v3182_v37, %s2511_s17 }
 0x33a   :  { %v992_v38 = vpop.f32.mrf.mxu2 }
 0x33b   :  { %v3186_v39 = vadd.f32 %v2348_v18, %v992_v38 }
 0x33d   :  { %1018 = vrot.lane.b32.xlu0 %v3186_v39, %s2511_s17 }
 0x349   :  { %v995_v41 = vpop.f32.mrf.mxu2 }
 0x34a   :  { %v3190_v42 = vadd.f32 %v2348_v18, %v995_v41 }
 0x34c   :  { %1020 = vrot.lane.b32.xlu1 %v3190_v42, %s2511_s17 }
 0x351   :  { %v997_v49 = vpop.f32.mrf.mxu2 }
 0x352   :  { %v3194_v50 = vadd.f32 %v2348_v18, %v997_v49 }
 0x354   :  { %1022 = vrot.lane.b32.xlu2 %v3194_v50, %s2511_s17 }
 0x367   :  { %v1011_v51 = vpop.permute.xlu2 %1010 }
 0x368   :  { %vm1033_vm3 = vcmp.gt.f32.partialorder %v3170_v61, %v1011_v51 }
 0x369   :  { %v1049_v26 = vsel %vm1033_vm3, %v3170_v61, %v1011_v51  ;;  %v1041_v58 = vsel %vm1033_vm3, 1, %v2512_v33 }
 0x36a   :  { %1066 = vrot.lane.b32.xlu1 %v1049_v26, %s2511_s17 }
 0x377   :  { %v1009_v53 = vpop.permute.xlu1 %1008 }
 0x378   :  { %vm1032_vm4 = vcmp.gt.f32.partialorder %v3166_v24, %v1009_v53 }
 0x379   :  { %v1048_v54 = vsel %vm1032_vm4, %v3166_v24, %v1009_v53  ;;  %v1040_v56 = vsel %vm1032_vm4, 1, %v2512_v33 }
 0x37a   :  { %1064 = vrot.lane.b32.xlu0 %v1048_v54, %s2511_s17  ;;  %1096 = vrot.lane.b32.xlu2 %v1040_v56, %s2511_s17 }
 0x382   :  { %1098 = vrot.lane.b32.xlu0 %v1041_v58, %s2511_s17 }
 0x38f   :  { %v1013_v4 = vpop.permute.xlu0 %1012  ;;  %v1017_v62 = vpop.permute.xlu2 %1016 }
 0x390   :  { %vm1034_vm5 = vcmp.gt.f32.partialorder %v3174_v35, %v1013_v4  ;;  %vm1036_vm6 = vcmp.gt.f32.partialorder %v3182_v37, %v1017_v62 }
 0x391   :  { %v1042_v59 = vsel %vm1034_vm5, 1, %v2512_v33  ;;  %v1050_v60 = vsel %vm1034_vm5, %v3174_v35, %v1013_v4  ;;  %v1052_v28 = vsel %vm1036_vm6, %v3182_v37, %v1017_v62  ;;  %v1044_v55 = vsel %vm1036_vm6, 1, %v2512_v33 }
 0x392   :  { %1100 = vrot.lane.b32.xlu1 %v1042_v59, %s2511_s17  ;;  %1068 = vrot.lane.b32.xlu2 %v1050_v60, %s2511_s17 }
 0x397   :  { %v1015_v5 = vpop.permute.xlu1 %1014 }
 0x398   :  { %vm1035_vm7 = vcmp.gt.f32.partialorder %v3178_v34, %v1015_v5 }
 0x399   :  { %v1051_v17 = vsel %vm1035_vm7, %v3178_v34, %v1015_v5  ;;  %v1043_v57 = vsel %vm1035_vm7, 1, %v2512_v33 }
 0x39a   :  { %1072 = vrot.lane.b32.xlu1 %v1052_v28, %s2511_s17  ;;  %1070 = vrot.lane.b32.xlu0 %v1051_v17, %s2511_s17 }
 0x39b   :  { %1102 = vrot.lane.b32.xlu2 %v1043_v57, %s2511_s17 }
 0x3a2   :  { %1104 = vrot.lane.b32.xlu0 %v1044_v55, %s2511_s17 }
 0x3ae   :  { %v1023_v15 = vpop.permute.xlu2 %1022 }
 0x3af   :  { %v1019_v7 = vpop.permute.xlu0 %1018  ;;  %vm1039_vm9 = vcmp.gt.f32.partialorder %v3194_v50, %v1023_v15 }
 0x3b0   :  { %vm1037_vm8 = vcmp.gt.f32.partialorder %v3186_v39, %v1019_v7  ;;  %v1055_v1 = vsel %vm1039_vm9, %v3194_v50, %v1023_v15  ;;  %v1047_v14 = vsel %vm1039_vm9, 1, %v2512_v33 }
 0x3b1   :  { %v1045_v0 = vsel %vm1037_vm8, 1, %v2512_v33  ;;  %v1053_v10 = vsel %vm1037_vm8, %v3186_v39, %v1019_v7 }
 0x3b2   :  { %1106 = vrot.lane.b32.xlu1 %v1045_v0, %s2511_s17  ;;  %1074 = vrot.lane.b32.xlu2 %v1053_v10, %s2511_s17 }
 0x3ba   :  { %1078 = vrot.lane.b32.xlu1 %v1055_v1, %s2511_s17 }
 0x3be   :  { %v1021_v11 = vpop.permute.xlu1 %1020 }
 0x3bf   :  { %vm1038_vm10 = vcmp.gt.f32.partialorder %v3190_v42, %v1021_v11 }
 0x3c0   :  { %v1054_v18 = vsel %vm1038_vm10, %v3190_v42, %v1021_v11  ;;  %v1046_v12 = vsel %vm1038_vm10, 1, %v2512_v33 }
 0x3c1   :  { %1076 = vrot.lane.b32.xlu0 %v1054_v18, %s2511_s17  ;;  %1108 = vrot.lane.b32.xlu2 %v1046_v12, %s2511_s17 }
 0x3c9   :  { %1110 = vrot.lane.b32.xlu0 %v1047_v14, %s2511_s17 }
 0x3d4   :  { %v1097_v32 = vpop.permute.xlu2 %1096 }
 0x3dc   :  { %v1067_v2 = vpop.permute.xlu1 %1066 }
 0x3dd   :  { %vm1089_vm11 = vcmp.gt.f32.partialorder %v3170_v61, %v1067_v2 }
 0x3de   :  { %v1121_v48 = vsel %vm1089_vm11, %v3170_v61, %v1067_v2 }
 0x3df   :  { %1138 = vrot.lane.b32.xlu2 %v1121_v48, %s2511_s17 }
 0x3ec   :  { %v1065_v38 = vpop.permute.xlu0 %1064  ;;  %v1069_v51 = vpop.permute.xlu2 %1068 }
 0x3ed   :  { %vm1088_vm0 = vcmp.gt.f32.partialorder %v3166_v24, %v1065_v38  ;;  %vm1090_vm12 = vcmp.gt.f32.partialorder %v3174_v35, %v1069_v51 }
 0x3ee   :  { %v1120_v41 = vsel %vm1088_vm0, %v3166_v24, %v1065_v38  ;;  %v1112_v49 = vsel %vm1088_vm0, 2, %v1097_v32  ;;  %v1122_v54 = vsel %vm1090_vm12, %v3174_v35, %v1069_v51 }
 0x3ef   :  { %1136 = vrot.lane.b32.xlu1 %v1120_v41, %s2511_s17  ;;  %1168 = vrot.lane.b32.xlu0 %v1112_v49, %s2511_s17 }
 0x3f4   :  { %v1099_v26 = vpop.permute.xlu0 %1098 }
 0x3f5   :  { %v1113_v53 = vsel %vm1089_vm11, 2, %v1099_v26  ;;  %v1103_v4 = vpop.permute.xlu2 %1102 }
 0x3f7   :  { %1140 = vrot.lane.b32.xlu0 %v1122_v54, %s2511_s17  ;;  %1170 = vrot.lane.b32.xlu1 %v1113_v53, %s2511_s17 }
 0x404   :  { %v1101_v56 = vpop.permute.xlu1 %1100 }
 0x405   :  { %v1114_v58 = vsel %vm1090_vm12, 2, %v1101_v56 }
 0x406   :  { %1172 = vrot.lane.b32.xlu2 %v1114_v58, %s2511_s17 }
 0x40c   :  { %v1071_v59 = vpop.permute.xlu0 %1070  ;;  %v1073_v60 = vpop.permute.xlu1 %1072 }
 0x40d   :  { %vm1091_vm13 = vcmp.gt.f32.partialorder %v3178_v34, %v1071_v59  ;;  %vm1092_vm14 = vcmp.gt.f32.partialorder %v3182_v37, %v1073_v60  ;;  %v1075_v17 = vpop.permute.xlu2 %1074 }
 0x40e   :  { %v1115_v62 = vsel %vm1091_vm13, 2, %v1103_v4  ;;  %v1123_v5 = vsel %vm1091_vm13, %v3178_v34, %v1071_v59  ;;  %v1124_v28 = vsel %vm1092_vm14, %v3182_v37, %v1073_v60  ;;  %vm1093_vm15 = vcmp.gt.f32.partialorder %v3186_v39, %v1075_v17 }
 0x40f   :  { %1174 = vrot.lane.b32.xlu0 %v1115_v62, %s2511_s17  ;;  %1142 = vrot.lane.b32.xlu1 %v1123_v5, %s2511_s17  ;;  %v1125_v7 = vsel %vm1093_vm15, %v3186_v39, %v1075_v17 }
 0x410   :  { %1144 = vrot.lane.b32.xlu2 %v1124_v28, %s2511_s17 }
 0x414   :  { %v1105_v57 = vpop.permute.xlu0 %1104 }
 0x415   :  { %v1116_v55 = vsel %vm1092_vm14, 2, %v1105_v57 }
 0x417   :  { %1146 = vrot.lane.b32.xlu0 %v1125_v7, %s2511_s17  ;;  %1176 = vrot.lane.b32.xlu1 %v1116_v55, %s2511_s17 }
 0x41b   :  { %v1109_v18 = vpop.permute.xlu2 %1108 }
 0x424   :  { %v1107_v0 = vpop.permute.xlu1 %1106 }
 0x425   :  { %v1117_v10 = vsel %vm1093_vm15, 2, %v1107_v0 }
 0x426   :  { %1178 = vrot.lane.b32.xlu2 %v1117_v10, %s2511_s17 }
 0x42c   :  { %v1079_v15 = vpop.permute.xlu1 %1078 }
 0x42d   :  { %vm1095_vm1 = vcmp.gt.f32.partialorder %v3194_v50, %v1079_v15 }
 0x42e   :  { %v1127_v1 = vsel %vm1095_vm1, %v3194_v50, %v1079_v15 }
 0x42f   :  { %1150 = vrot.lane.b32.xlu2 %v1127_v1, %s2511_s17 }
 0x433   :  { %v1077_v11 = vpop.permute.xlu0 %1076 }
 0x434   :  { %vm1094_vm2 = vcmp.gt.f32.partialorder %v3190_v42, %v1077_v11 }
 0x435   :  { %v1118_v12 = vsel %vm1094_vm2, 2, %v1109_v18  ;;  %v1126_v14 = vsel %vm1094_vm2, %v3190_v42, %v1077_v11 }
 0x436   :  { %1180 = vrot.lane.b32.xlu0 %v1118_v12, %s2511_s17  ;;  %1148 = vrot.lane.b32.xlu1 %v1126_v14, %s2511_s17 }
 0x439   :  { %v1139_v54 = vpop.permute.xlu2 %1138 }
 0x43a   :  { %vm1161_vm8 = vcmp.gt.f32.partialorder %v3170_v61, %v1139_v54 }
 0x43b   :  { %v1111_v2 = vpop.permute.xlu0 %1110 }
 0x43c   :  { %v1119_v48 = vsel %vm1095_vm1, 2, %v1111_v2 }
 0x43e   :  { %1182 = vrot.lane.b32.xlu1 %v1119_v48, %s2511_s17 }
 0x460   :  { %v1173_v61 = vpop.permute.xlu2 %1172 }
 0x461   :  { %v1169_v32 = vpop.permute.xlu0 %1168  ;;  %v1137_v38 = vpop.permute.xlu1 %1136 }
 0x462   :  { %vm1160_vm3 = vcmp.gt.f32.partialorder %v3166_v24, %v1137_v38 }
 0x463   :  { %v1184_v41 = vsel %vm1160_vm3, 3, %v1169_v32 }
 0x464   :  { %vm1192_vm4 = vcmp.ne.s32.totalorder %v1184_v41, 0  ;;  %vm1719_vm5 = vcmp.eq.s32.totalorder %v1184_v41, 3  ;;  %vm1567_vm6 = vcmp.eq.s32.totalorder %v1184_v41, 2  ;;  %vm1415_vm7 = vcmp.eq.s32.totalorder %v1184_v41, 1 }
 0x465   :  { %v1727_v49 = vsel %vm1719_vm5, 1, %v2512_v33  ;;  %v1575_v51 = vsel %vm1567_vm6, 1, %v2512_v33  ;;  %v1423_v26 = vsel %vm1415_vm7, 1, %v2512_v33  ;;  %v2039_v53 = vsel %vm1192_vm4, 1.0, %v2514_v16 }
 0x466   :  { %1736 = vperm.xlu0 %2338, %v1727_v49   ;;  %1584 = vperm.xlu1 %2337, %v1575_v51   ;;  %v1216_v56 = vmul.f32 %v2039_v53, %v2826_v63 }
 0x467   :  { %1432 = vperm.xlu2 %2339, %v1423_v26  }
 0x468   :  { %vm1775_vm10 = vcmp.gt.f32.partialorder %v1216_v56, 0.0 }
 0x469   :  { %v1171_v24 = vpop.permute.xlu1 %1170  ;;  %v1783_v60 = vsel %vm1775_vm10, 1, %v2512_v33  ;;  %v1141_v63 = vpop.permute.xlu0 %1140 }
 0x46a   :  { %v1185_v58 = vsel %vm1161_vm8, 3, %v1171_v24  ;;  %vm1162_vm0 = vcmp.gt.f32.partialorder %v3174_v35, %v1141_v63  ;;  %v1145_v18 = vpop.permute.xlu2 %1144 }
 0x46b   :  { %vm1193_vm9 = vcmp.ne.s32.totalorder %v1185_v58, 0  ;;  %vm1416_vm11 = vcmp.eq.s32.totalorder %v1185_v58, 1  ;;  %vm1720_vm12 = vcmp.eq.s32.totalorder %v1185_v58, 3  ;;  %vm1568_vm14 = vcmp.eq.s32.totalorder %v1185_v58, 2 }
 0x46c   :  { %v2040_v4 = vsel %vm1193_vm9, 1.0, %v2514_v16  ;;  %v1424_v59 = vsel %vm1416_vm11, 1, %v2512_v33  ;;  %v1186_v5 = vsel %vm1162_vm0, 3, %v1173_v61  ;;  %v1728_v28 = vsel %vm1720_vm12, 1, %v2512_v33 }
 0x46d   :  { %v1217_v62 = vmul.f32 %v2040_v4, %v2850_v27  ;;  %v1576_v57 = vsel %vm1568_vm14, 1, %v2512_v33  ;;  %vm1194_vm15 = vcmp.ne.s32.totalorder %v1186_v5, 0  ;;  %vm1417_vm1 = vcmp.eq.s32.totalorder %v1186_v5, 1 }
 0x46e   :  { %1855 = vrot.lane.b32.xlu1 %v1216_v56, %s2515_s10  ;;  %1435 = vperm.xlu0 %2338, %v1424_v59   ;;  %vm1569_vm2 = vcmp.eq.s32.totalorder %v1186_v5, 2  ;;  %v2041_v27 = vsel %vm1194_vm15, 1.0, %v2514_v16  ;;  %v1425_v35 = vsel %vm1417_vm1, 1, %v2512_v33  ;;  %vm1721_vm5 = vcmp.eq.s32.totalorder %v1186_v5, 3 }
 0x46f   :  { %1792 = vperm.xlu2 %2339, %v1783_v60   ;;  %vm1776_vm13 = vcmp.gt.f32.partialorder %v1217_v62, 0.0  ;;  %v1577_v55 = vsel %vm1569_vm2, 1, %v2512_v33  ;;  %v1218_v7 = vmul.f32 %v2041_v27, %v2858_v36  ;;  %v1729_v11 = vsel %vm1721_vm5, 1, %v2512_v33 }
 0x470   :  { %v1784_v17 = vsel %vm1776_vm13, 1, %v2512_v33  ;;  %vm1164_vm10 = vcmp.gt.f32.partialorder %v3182_v37, %v1145_v18 }
 0x471   :  { %vm1777_vm3 = vcmp.gt.f32.partialorder %v1218_v7, 0.0 }
 0x472   :  { %v1785_v15 = vsel %vm1777_vm3, 1, %v2512_v33 }
 0x476   :  { %1739 = vperm.xlu1 %2337, %v1728_v28   ;;  %1795 = vperm.xlu0 %2338, %v1784_v17  }
 0x477   :  { %1587 = vperm.xlu2 %2339, %v1576_v57  }
 0x47e   :  { %1438 = vperm.xlu1 %2337, %v1425_v35   ;;  %1590 = vperm.xlu0 %2338, %v1577_v55  }
 0x47f   :  { %1857 = vrot.lane.b32.xlu2 %v1217_v62, %s2515_s10 }
 0x481   :  { %v1143_v0 = vpop.permute.xlu1 %1142  ;;  %v1175_v10 = vpop.permute.xlu0 %1174 }
 0x482   :  { %vm1163_vm4 = vcmp.gt.f32.partialorder %v3178_v34, %v1143_v0 }
 0x483   :  { %v1187_v1 = vsel %vm1163_vm4, 3, %v1175_v10 }
 0x484   :  { %vm1195_vm6 = vcmp.ne.s32.totalorder %v1187_v1, 0  ;;  %vm1722_vm7 = vcmp.eq.s32.totalorder %v1187_v1, 3  ;;  %vm1570_vm8 = vcmp.eq.s32.totalorder %v1187_v1, 2  ;;  %vm1418_vm9 = vcmp.eq.s32.totalorder %v1187_v1, 1  ;;  %v1395_v1 = vpop.f32.mrf.mxu0 }
 0x485   :  { %v2042_v34 = vsel %vm1195_vm6, 1.0, %v2514_v16  ;;  %v1730_v14 = vsel %vm1722_vm7, 1, %v2512_v33  ;;  %v1578_v2 = vsel %vm1570_vm8, 1, %v2512_v33  ;;  %v1426_v48 = vsel %vm1418_vm9, 1, %v2512_v33 }
 0x486   :  { %1798 = vperm.xlu1 %2337, %v1785_v15   ;;  %1859 = vrot.lane.b32.xlu0 %v1218_v7, %s2515_s10  ;;  %v1219_v32 = vmul.f32 %v2042_v34, %v2868_v47  ;;  %v1179_v47 = vpop.permute.xlu2 %1178 }
 0x487   :  { %1742 = vperm.xlu2 %2339, %v1729_v11   ;;  %v1299_v11 = vpop.f32.mrf.mxu3 }
 0x488   :  { %vm1778_vm12 = vcmp.gt.f32.partialorder %v1219_v32, 0.0 }
 0x489   :  { %v1177_v36 = vpop.permute.xlu1 %1176  ;;  %v1786_v41 = vsel %vm1778_vm12, 1, %v2512_v33  ;;  %v1147_v51 = vpop.permute.xlu0 %1146 }
 0x48a   :  { %v1188_v12 = vsel %vm1164_vm10, 3, %v1177_v36  ;;  %vm1165_vm13 = vcmp.gt.f32.partialorder %v3186_v39, %v1147_v51 }
 0x48b   :  { %vm1196_vm11 = vcmp.ne.s32.totalorder %v1188_v12, 0  ;;  %vm1419_vm0 = vcmp.eq.s32.totalorder %v1188_v12, 1  ;;  %vm1723_vm14 = vcmp.eq.s32.totalorder %v1188_v12, 3  ;;  %vm1571_vm1 = vcmp.eq.s32.totalorder %v1188_v12, 2  ;;  %v1547_v12 = vpop.f32.mrf.mxu1 }
 0x48c   :  { %v2043_v38 = vsel %vm1196_vm11, 1.0, %v2514_v16  ;;  %v1427_v37 = vsel %vm1419_vm0, 1, %v2512_v33  ;;  %v1189_v26 = vsel %vm1165_vm13, 3, %v1179_v47  ;;  %v1731_v53 = vsel %vm1723_vm14, 1, %v2512_v33 }
 0x48d   :  { %v1220_v49 = vmul.f32 %v2043_v38, %v2876_v52  ;;  %v1579_v56 = vsel %vm1571_vm1, 1, %v2512_v33  ;;  %vm1197_vm2 = vcmp.ne.s32.totalorder %v1189_v26, 0  ;;  %vm1420_vm3 = vcmp.eq.s32.totalorder %v1189_v26, 1 }
 0x48e   :  { %1745 = vperm.xlu0 %2338, %v1730_v14   ;;  %1593 = vperm.xlu1 %2337, %v1578_v2   ;;  %vm1572_vm4 = vcmp.eq.s32.totalorder %v1189_v26, 2  ;;  %v2044_v52 = vsel %vm1197_vm2, 1.0, %v2514_v16  ;;  %v1428_v39 = vsel %vm1420_vm3, 1, %v2512_v33  ;;  %vm1724_vm7 = vcmp.eq.s32.totalorder %v1189_v26, 3  ;;  %v1151_v62 = vpop.permute.xlu2 %1150  ;;  %v3344_v14 = vld [vmem:[#allocation8 + $0x1] ss:$0 sm:$0xff] }
 0x48f   :  { %1441 = vperm.xlu2 %2339, %v1426_v48   ;;  %vm1779_vm15 = vcmp.gt.f32.partialorder %v1220_v49, 0.0  ;;  %v1580_v24 = vsel %vm1572_vm4, 1, %v2512_v33  ;;  %v1221_v58 = vmul.f32 %v2044_v52, %v2898_v3  ;;  %v1732_v5 = vsel %vm1724_vm7, 1, %v2512_v33  ;;  %v3346_v2 = vld [vmem:[#allocation8] ss:$0 sm:$0xff] }
 0x490   :  { %v1787_v54 = vsel %vm1779_vm15, 1, %v2512_v33  ;;  %vm1167_vm9 = vcmp.gt.f32.partialorder %v3194_v50, %v1151_v62  ;;  %vm1879_vm3 = vcmask 7168   ;;  %v3348_v48 = vld [vmem:[#allocation8 + $0x2] ss:$0 sm:$0xff]  ;;  %v1396_v51 = vadd.f32 %v3344_v14, %v1395_v1  ;;  %v3358_v26 = vld [vmem:[#allocation8 + $0x3] ss:$0 sm:$0xff] }
 0x491   :  { %vm1780_vm6 = vcmp.gt.f32.partialorder %v1221_v58, 0.0  ;;  %v1300_v47 = vadd.f32 %v3346_v2, %v1299_v11 }
 0x492   :  { %v1788_v63 = vsel %vm1780_vm6, 1, %v2512_v33 }
 0x496   :  { %1861 = vrot.lane.b32.xlu1 %v1219_v32, %s2515_s10  ;;  %1444 = vperm.xlu0 %2338, %v1427_v37   ;;  %v1397_v32 = vpop.f32.mrf.mxu0 }
 0x497   :  { %1801 = vperm.xlu2 %2339, %v1786_v41   ;;  %v1301_v41 = vpop.f32.mrf.mxu3 }
 0x498   :  { %v1302_v52 = vadd.f32 %v3346_v2, %v1301_v41 }
 0x49e   :  { %1748 = vperm.xlu1 %2337, %v1731_v53   ;;  %1804 = vperm.xlu0 %2338, %v1787_v54   ;;  %v1548_v53 = vadd.f32 %v3348_v48, %v1547_v12  ;;  %v1398_v54 = vadd.f32 %v3344_v14, %v1397_v32 }
 0x49f   :  { %1596 = vperm.xlu2 %2339, %v1579_v56   ;;  %v1549_v56 = vpop.f32.mrf.mxu1 }
 0x4a6   :  { %1447 = vperm.xlu1 %2337, %v1428_v39   ;;  %1599 = vperm.xlu0 %2338, %v1580_v24  }
 0x4a7   :  { %1863 = vrot.lane.b32.xlu2 %v1220_v49, %s2515_s10 }
 0x4a8   :  { %v1181_v4 = vpop.permute.xlu0 %1180  ;;  %v1149_v59 = vpop.permute.xlu1 %1148 }
 0x4a9   :  { %vm1166_vm5 = vcmp.gt.f32.partialorder %v3190_v42, %v1149_v59 }
 0x4aa   :  { %v1190_v60 = vsel %vm1166_vm5, 3, %v1181_v4 }
 0x4ab   :  { %vm1725_vm8 = vcmp.eq.s32.totalorder %v1190_v60, 3  ;;  %vm1198_vm10 = vcmp.ne.s32.totalorder %v1190_v60, 0  ;;  %vm1573_vm0 = vcmp.eq.s32.totalorder %v1190_v60, 2  ;;  %vm1421_vm13 = vcmp.eq.s32.totalorder %v1190_v60, 1 }
 0x4ac   :  { %v1733_v61 = vsel %vm1725_vm8, 1, %v2512_v33  ;;  %v2045_v17 = vsel %vm1198_vm10, 1.0, %v2514_v16  ;;  %v1581_v57 = vsel %vm1573_vm0, 1, %v2512_v33  ;;  %v1429_v35 = vsel %vm1421_vm13, 1, %v2512_v33 }
 0x4ad   :  { %v1222_v55 = vmul.f32 %v2045_v17, %v2968_v44  ;;  %v1550_v60 = vadd.f32 %v3348_v48, %v1549_v56 }
 0x4ae   :  { %1807 = vperm.xlu1 %2337, %v1788_v63   ;;  %1754 = vperm.xlu0 %2338, %v1733_v61  }
 0x4af   :  { %1751 = vperm.xlu2 %2339, %v1732_v5   ;;  %vm1781_vm1 = vcmp.gt.f32.partialorder %v1222_v55, 0.0 }
 0x4b0   :  { %v1183_v3 = vpop.permute.xlu1 %1182 }
 0x4b1   :  { %v1191_v28 = vsel %vm1167_vm9, 3, %v1183_v3 }
 0x4b2   :  { %vm1199_vm11 = vcmp.ne.s32.totalorder %v1191_v28, 0  ;;  %vm1422_vm12 = vcmp.eq.s32.totalorder %v1191_v28, 1  ;;  %vm1726_vm14 = vcmp.eq.s32.totalorder %v1191_v28, 3  ;;  %vm1574_vm2 = vcmp.eq.s32.totalorder %v1191_v28, 2 }
 0x4b3   :  { %v2046_v42 = vsel %vm1199_vm11, 1.0, %v2514_v16  ;;  %v1430_v27 = vsel %vm1422_vm12, 1, %v2512_v33  ;;  %v1734_v16 = vsel %vm1726_vm14, 1, %v2512_v33  ;;  %v1582_v0 = vsel %vm1574_vm2, 1, %v2512_v33 }
 0x4b4   :  { %v1223_v50 = vmul.f32 %v2046_v42, %v2938_v31  ;;  %v1789_v31 = vsel %vm1781_vm1, 1, %v2512_v33 }
 0x4b6   :  { %1602 = vperm.xlu1 %2337, %v1581_v57   ;;  %1453 = vperm.xlu0 %2338, %v1430_v27   ;;  %vm1782_vm15 = vcmp.gt.f32.partialorder %v1223_v50, 0.0 }
 0x4b7   :  { %1450 = vperm.xlu2 %2339, %v1429_v35   ;;  %v1790_v7 = vsel %vm1782_vm15, 1, %v2512_v33  ;;  %v1699_v33 = vpop.f32.mrf.mxu2 }
 0x4b8   :  { %v1700_v4 = vadd.f32 %v3358_v26, %v1699_v33 }
 0x4be   :  { %1757 = vperm.xlu1 %2337, %v1734_v16   ;;  %1813 = vperm.xlu0 %2338, %v1790_v7   ;;  %v1400_v16 = vpop.f32.mrf.mxu0  ;;  %v1304_v7 = vpop.f32.mrf.mxu3 }
 0x4bf   :  { %1810 = vperm.xlu2 %2339, %v1789_v31   ;;  %v1701_v24 = vpop.f32.mrf.mxu2  ;;  %v1552_v31 = vpop.f32.mrf.mxu1  ;;  %v1401_v43 = vadd.f32 %v3344_v14, %v1400_v16 }
 0x4c0   :  { %v1702_v62 = vadd.f32 %v3358_v26, %v1701_v24 }
 0x4c1   :  { %v1433_v44 = vpop.permute.xlu2 %1432 }
 0x4c2   :  { %vm1455_vm4 = vcmp.eq.s32.totalorder %v1433_v44, 1 }
 0x4c3   :  { %v1463_v39 = vsel %vm1455_vm4, %v1396_v51, %v1300_v47 }
 0x4c6   :  { %1867 = vrot.lane.b32.xlu1 %v1222_v55, %s2515_s10  ;;  %1865 = vrot.lane.b32.xlu0 %v1221_v58, %s2515_s10 }
 0x4c7   :  { %1605 = vperm.xlu2 %2339, %v1582_v0   ;;  %v1704_v44 = vpop.f32.mrf.mxu2  ;;  %v1554_v1 = vpop.f32.mrf.mxu1 }
 0x4c8   :  { %v1555_v33 = vadd.f32 %v3348_v48, %v1554_v1  ;;  %v1705_v32 = vadd.f32 %v3358_v26, %v1704_v44 }
 0x4c9   :  { %v1793_v10 = vpop.permute.xlu2 %1792 }
 0x4ca   :  { %vm1815_vm11 = vcmp.eq.s32.totalorder %v1793_v10, 1  ;;  %v1306_v10 = vpop.f32.mrf.mxu3 }
 0x4cb   :  { %v1307_v12 = vadd.f32 %v3346_v2, %v1306_v10 }
 0x4cf   :  { %1869 = vrot.lane.b32.xlu2 %v1223_v50, %s2515_s10  ;;  %v1706_v11 = vpop.f32.mrf.mxu2 }
 0x4d1   :  { %v1588_v15 = vpop.permute.xlu2 %1587 }
 0x4d2   :  { %vm1608_vm8 = vcmp.eq.s32.totalorder %v1588_v15, 1 }
 0x4d8   :  { %v1737_v18 = vpop.permute.xlu0 %1736  ;;  %v1585_v36 = vpop.permute.xlu1 %1584 }
 0x4d9   :  { %v1858_v34 = vpop.permute.xlu2 %1857  ;;  %vm1607_vm5 = vcmp.eq.s32.totalorder %v1585_v36, 1  ;;  %vm1759_vm7 = vcmp.eq.s32.totalorder %v1737_v18, 1  ;;  %v1553_v36 = vadd.f32 %v3348_v48, %v1552_v31 }
 0x4da   :  { %1881 = vst.msk [vmem:[%s3457_s14 + $0x8] sm:$0xff] %vm1879_vm3, %v1858_v34  ;;  %v1615_v58 = vsel %vm1607_vm5, %v1548_v53, %v1463_v39 }
 0x4db   :  { %v1767_v63 = vsel %vm1759_vm7, %v1700_v4, %v1615_v58 }
 0x4dc   :  { %v1823_v17 = vsel %vm1815_vm11, %v1767_v63, %v891_v45  ;;  %v1305_v45 = vadd.f32 %v3346_v2, %v1304_v7  ;;  %v1557_v63 = vpop.f32.mrf.mxu1 }
 0x4dd   :  { %v1558_v31 = vadd.f32 %v3348_v48, %v1557_v63 }
 0x4e0   :  { %v1436_v38 = vpop.permute.xlu0 %1435  ;;  %v1856_v37 = vpop.permute.xlu1 %1855 }
 0x4e1   :  { %v3350_v49 = vpop.permute.xlu2 %1742  ;;  %1880 = vst.msk [vmem:[%s3457_s14] sm:$0xff] %vm1879_vm3, %v1856_v37  ;;  %vm1456_vm6 = vcmp.eq.s32.totalorder %v1436_v38, 1  ;;  %v1707_v38 = vadd.f32 %v3358_v26, %v1706_v11 }
 0x4e2   :  { %v1464_v59 = vsel %vm1456_vm6, %v1398_v54, %v1302_v52  ;;  %vm1761_vm2 = vcmp.eq.s32.totalorder %v3350_v49, 1 }
 0x4e3   :  { %v1616_v28 = vsel %vm1608_vm8, %v1550_v60, %v1464_v59 }
 0x4e8   :  { %v1796_v61 = vpop.permute.xlu0 %1795  ;;  %v1740_v5 = vpop.permute.xlu1 %1739 }
 0x4e9   :  { %vm1816_vm9 = vcmp.eq.s32.totalorder %v1796_v61, 1  ;;  %v1442_v3 = vpop.permute.xlu2 %1441  ;;  %vm1760_vm10 = vcmp.eq.s32.totalorder %v1740_v5, 1  ;;  %v1709_v61 = vpop.f32.mrf.mxu2 }
 0x4ea   :  { %v1768_v42 = vsel %vm1760_vm10, %v1702_v62, %v1616_v28  ;;  %vm1458_vm13 = vcmp.eq.s32.totalorder %v1442_v3, 1  ;;  %v1309_v62 = vpop.f32.mrf.mxu3 }
 0x4eb   :  { %v1824_v57 = vsel %vm1816_vm9, %v1768_v42, %v892_v46  ;;  %v1402_v46 = vpop.f32.mrf.mxu0 }
 0x4ec   :  { %v2297_v27 = vpack.c.bf16 %v1824_v57, %v1823_v17  ;;  %v1403_v34 = vadd.f32 %v3344_v14, %v1402_v46  ;;  %v1310_v57 = vadd.f32 %v3346_v2, %v1309_v62 }
 0x4ee   :  { %2298 = vst [vmem:[#allocation11] sm:$0xff] %v2297_v27   ;;  %v1466_v47 = vsel %vm1458_vm13, %v1403_v34, %v1307_v12 }
 0x4f0   :  { %v1591_v35 = vpop.permute.xlu0 %1590  ;;  %v1439_v50 = vpop.permute.xlu1 %1438 }
 0x4f1   :  { %v1802_v55 = vpop.permute.xlu2 %1801  ;;  %vm1457_vm0 = vcmp.eq.s32.totalorder %v1439_v50, 1  ;;  %vm1609_vm12 = vcmp.eq.s32.totalorder %v1591_v35, 1  ;;  %v1711_v50 = vpop.f32.mrf.mxu2 }
 0x4f2   :  { %v1465_v18 = vsel %vm1457_vm0, %v1401_v43, %v1305_v45  ;;  %vm1818_vm4 = vcmp.eq.s32.totalorder %v1802_v55, 1  ;;  %v1311_v25 = vpop.f32.mrf.mxu3  ;;  %v1712_v10 = vadd.f32 %v3358_v26, %v1711_v50 }
 0x4f3   :  { %v1617_v37 = vsel %vm1609_vm12, %v1553_v36, %v1465_v18  ;;  %v1405_v60 = vpop.f32.mrf.mxu0  ;;  %v1312_v35 = vadd.f32 %v3346_v2, %v1311_v25 }
 0x4f4   :  { %v1769_v56 = vsel %vm1761_vm2, %v1705_v32, %v1617_v37  ;;  %v1406_v28 = vadd.f32 %v3344_v14, %v1405_v60 }
 0x4f8   :  { %v1860_v0 = vpop.permute.xlu0 %1859  ;;  %v1799_v15 = vpop.permute.xlu1 %1798 }
 0x4f9   :  { %1882 = vst.msk [vmem:[%s3457_s14 + $0x10] sm:$0xff] %vm1879_vm3, %v1860_v0  ;;  %v3374_v40 = vpop.permute.xlu2 %1596  ;;  %vm1817_vm14 = vcmp.eq.s32.totalorder %v1799_v15, 1  ;;  %v1710_v15 = vadd.f32 %v3358_v26, %v1709_v61  ;;  %v1714_v32 = vpop.f32.mrf.mxu2 }
 0x4fa   :  { %v1825_v39 = vsel %vm1817_vm14, %v1769_v56, %v893_v22  ;;  %vm1611_vm9 = vcmp.eq.s32.totalorder %v3374_v40, 1  ;;  %v1314_v46 = vpop.f32.mrf.mxu3 }
 0x4fb   :  { %v1407_v3 = vpop.f32.mrf.mxu0  ;;  %v1315_v56 = vadd.f32 %v3346_v2, %v1314_v46 }
 0x4fc   :  { %v1408_v27 = vadd.f32 %v3344_v14, %v1407_v3 }
 0x500   :  { %v1746_v41 = vpop.permute.xlu0 %1745  ;;  %v1594_v51 = vpop.permute.xlu1 %1593 }
 0x501   :  { %vm1762_vm15 = vcmp.eq.s32.totalorder %v1746_v41, 1  ;;  %v1864_v53 = vpop.permute.xlu2 %1863  ;;  %vm1610_vm1 = vcmp.eq.s32.totalorder %v1594_v51, 1 }
 0x502   :  { %1884 = vst.msk [vmem:[%s3457_s14 + $0x20] sm:$0xff] %vm1879_vm3, %v1864_v53  ;;  %v1618_v54 = vsel %vm1610_vm1, %v1555_v33, %v1466_v47  ;;  %v1316_v47 = vpop.f32.mrf.mxu3 }
 0x503   :  { %v1770_v52 = vsel %vm1762_vm15, %v1707_v38, %v1618_v54  ;;  %v1410_v0 = vpop.f32.mrf.mxu0 }
 0x504   :  { %v1826_v24 = vsel %vm1818_vm4, %v1770_v52, %v894_v29  ;;  %v1559_v29 = vpop.f32.mrf.mxu1  ;;  %v1411_v54 = vadd.f32 %v3344_v14, %v1410_v0 }
 0x505   :  { %v2302_v58 = vpack.c.bf16 %v1826_v24, %v1825_v39  ;;  %v1560_v44 = vadd.f32 %v3348_v48, %v1559_v29  ;;  %v1716_v39 = vpop.f32.mrf.mxu2 }
 0x507   :  { %2317 = vst [vmem:[#allocation11 + $0x8] sm:$0xff] %v2302_v58   ;;  %v1715_v58 = vadd.f32 %v3358_v26, %v1714_v32 }
 0x508   :  { %v1445_v4 = vpop.permute.xlu0 %1444  ;;  %v1862_v59 = vpop.permute.xlu1 %1861 }
 0x509   :  { %v1752_v49 = vpop.permute.xlu2 %1751  ;;  %1883 = vst.msk [vmem:[%s3457_s14 + $0x18] sm:$0xff] %vm1879_vm3, %v1862_v59  ;;  %vm1459_vm5 = vcmp.eq.s32.totalorder %v1445_v4, 1 }
 0x50a   :  { %v1467_v16 = vsel %vm1459_vm5, %v1406_v28, %v1310_v57  ;;  %vm1764_vm11 = vcmp.eq.s32.totalorder %v1752_v49, 1  ;;  %v1717_v49 = vadd.f32 %v3358_v26, %v1716_v39 }
 0x50b   :  { %v1619_v43 = vsel %vm1611_vm9, %v1558_v31, %v1467_v16  ;;  %v1412_v37 = vpop.f32.mrf.mxu0 }
 0x50c   :  { %v1562_v12 = vpop.f32.mrf.mxu1  ;;  %v1413_v19 = vadd.f32 %v3344_v14, %v1412_v37 }
 0x50d   :  { %v1563_v6 = vadd.f32 %v3348_v48, %v1562_v12 }
 0x510   :  { %v1805_v5 = vpop.permute.xlu0 %1804  ;;  %v1749_v20 = vpop.permute.xlu1 %1748 }
 0x511   :  { %v1451_v22 = vpop.permute.xlu2 %1450  ;;  %vm1763_vm8 = vcmp.eq.s32.totalorder %v1749_v20, 1  ;;  %vm1819_vm10 = vcmp.eq.s32.totalorder %v1805_v5, 1 }
 0x512   :  { %v1771_v1 = vsel %vm1763_vm8, %v1710_v15, %v1619_v43  ;;  %vm1461_vm12 = vcmp.eq.s32.totalorder %v1451_v22, 1 }
 0x513   :  { %v1827_v33 = vsel %vm1819_vm10, %v1771_v1, %v895_v21  ;;  %v1469_v52 = vsel %vm1461_vm12, %v1411_v54, %v1315_v56 }
 0x514   :  { %v1564_v21 = vpop.f32.mrf.mxu1 }
 0x515   :  { %v1565_v59 = vadd.f32 %v3348_v48, %v1564_v21 }
 0x518   :  { %v1600_v42 = vpop.permute.xlu0 %1599  ;;  %v1448_v17 = vpop.permute.xlu1 %1447 }
 0x519   :  { %v3401_v55 = vpop.permute.xlu2 %1810  ;;  %vm1460_vm6 = vcmp.eq.s32.totalorder %v1448_v17, 1  ;;  %vm1612_vm7 = vcmp.eq.s32.totalorder %v1600_v42, 1 }
 0x51a   :  { %v1468_v7 = vsel %vm1460_vm6, %v1408_v27, %v1312_v35  ;;  %vm1821_vm5 = vcmp.eq.s32.totalorder %v3401_v55, 1 }
 0x51b   :  { %v1620_v45 = vsel %vm1612_vm7, %v1560_v44, %v1468_v7 }
 0x51c   :  { %v1772_v34 = vsel %vm1764_vm11, %v1712_v10, %v1620_v45 }
 0x520   :  { %v1755_v11 = vpop.permute.xlu0 %1754  ;;  %v1808_v18 = vpop.permute.xlu1 %1807 }
 0x521   :  { %v1606_v36 = vpop.permute.xlu2 %1605  ;;  %vm1820_vm0 = vcmp.eq.s32.totalorder %v1808_v18, 1  ;;  %vm1765_vm15 = vcmp.eq.s32.totalorder %v1755_v11, 1 }
 0x522   :  { %v1828_v40 = vsel %vm1820_vm0, %v1772_v34, %v896_v23  ;;  %v1317_v23 = vadd.f32 %v3346_v2, %v1316_v47  ;;  %vm1614_vm1 = vcmp.eq.s32.totalorder %v1606_v36, 1 }
 0x523   :  { %v2307_v38 = vpack.c.bf16 %v1828_v40, %v1827_v33 }
 0x525   :  { %2318 = vst [vmem:[#allocation11 + $0x10] sm:$0xff] %v2307_v38  }
 0x528   :  { %v1454_v41 = vpop.permute.xlu0 %1453  ;;  %v1603_v51 = vpop.permute.xlu1 %1602 }
 0x529   :  { %v1870_v53 = vpop.permute.xlu2 %1869  ;;  %vm1613_vm13 = vcmp.eq.s32.totalorder %v1603_v51, 1  ;;  %vm1462_vm14 = vcmp.eq.s32.totalorder %v1454_v41, 1 }
 0x52a   :  { %1887 = vst.msk [vmem:[%s3457_s14 + $0x38] sm:$0xff] %vm1879_vm3, %v1870_v53  ;;  %v1621_v24 = vsel %vm1613_vm13, %v1563_v6, %v1469_v52  ;;  %v1470_v4 = vsel %vm1462_vm14, %v1413_v19, %v1317_v23 }
 0x52b   :  { %v1773_v60 = vsel %vm1765_vm15, %v1715_v58, %v1621_v24  ;;  %v1622_v14 = vsel %vm1614_vm1, %v1565_v59, %v1470_v4 }
 0x52c   :  { %v1829_v48 = vsel %vm1821_vm5, %v1773_v60, %v897_v9 }
 0x530   :  { %v1814_v62 = vpop.permute.xlu0 %1813  ;;  %v1758_v63 = vpop.permute.xlu1 %1757 }
 0x531   :  { %vm1822_vm2 = vcmp.eq.s32.totalorder %v1814_v62, 1  ;;  %vm1766_vm4 = vcmp.eq.s32.totalorder %v1758_v63, 1 }
 0x532   :  { %v1774_v2 = vsel %vm1766_vm4, %v1717_v49, %v1622_v14 }
 0x533   :  { %v1830_v26 = vsel %vm1822_vm2, %v1774_v2, %v898_v30 }
 0x534   :  { %v2312_v61 = vpack.c.bf16 %v1830_v26, %v1829_v48 }
 0x536   :  { %2319 = vst [vmem:[#allocation11 + $0x18] sm:$0xff] %v2312_v61  }
 0x537   :  { %1913 = dma.vmem_to_hbm [thread:$0]  %s1906_s4, 512, %s1908_s28, [#allocation12], %s2506_s21, %s2506_s21, %s2507_s22  }
 0x538   :  { %v1866_v5 = vpop.permute.xlu0 %1865  ;;  %v1868_v20 = vpop.permute.xlu1 %1867 }
 0x539   :  { %1885 = vst.msk [vmem:[%s3457_s14 + $0x28] sm:$0xff] %vm1879_vm3, %v1866_v5 }
 0x53a   :  { %1886 = vst.msk [vmem:[%s3457_s14 + $0x30] sm:$0xff] %vm1879_vm3, %v1868_v20 }
 0x53b   :  { %2501 = dma.done.wait [#allocation4], 512  }
 0x53c   :  { %2502 = vsyncadd [#allocation4], 4294966784 }
 0x53d   :  { %2503 = dma.done.wait [#allocation12], 512  }
 0x53e   :  { %2504 = vsyncadd [#allocation12], 4294966784 }
 0x53f   :  { %1926 = vsyncpa [#allocation3], 1 }
 0x540   :  { %1927 = vsyncpa [#allocation6], 1 }
 0x541   :  { %1928 = vsyncpa [#allocation9], 1 }
 0x542   :  { %1929 = vsyncpa [#allocation4], 1 }
 0x543   :  { %1930 = vsyncpa [#allocation12], 1 }

// kernel: tpu_custom_call.1
= control target key start
LH: loop header
LB: loop body
LE: loop exit
PB: predicated region body
PF: predicated region fallthrough
CT: control target
= control target key end

     0   :  { %20 = vsyncpa [#allocation3], 0  ;;  %s3443_s0 = inlined_call_operand.vmem [shape: f32[64,16], index: 0, kind: input, shape index: {}]   ;;  %s3444_s1 = inlined_call_operand.vmem [shape: f32[64,32], index: 1, kind: input, shape index: {}]   ;;  %s3445_s2 = inlined_call_operand.vmem [shape: bf16[16,128], index: 2, kind: input, shape index: {}]   ;;  %s3446_s3 = inlined_call_operand.vmem [shape: f32[1,128], index: 3, kind: input, shape index: {}]   ;;  %s3447_s4 = inlined_call_operand.vmem [shape: bf16[32,4], index: 4, kind: input, shape index: {}]   ;;  %s3448_s5 = inlined_call_operand.hbm [shape: f32[1,4], index: 5, kind: input, shape index: {}]   ;;  %s3449_s6 = inlined_call_operand.hbm [shape: bf16[4,32,128], index: 6, kind: input, shape index: {}]   ;;  %s3450_s7 = inlined_call_operand.vmem [shape: f32[4,128], index: 7, kind: input, shape index: {}]   ;;  %s3451_s8 = inlined_call_operand.vmem [shape: bf16[128,4], index: 8, kind: input, shape index: {}]   ;;  %s3452_s9 = inlined_call_operand.hbm [shape: f32[1,4], index: 9, kind: input, shape index: {}]   ;;  %s3453_s10 = inlined_call_operand.vmem [shape: bf16[4,128,128], index: 10, kind: input, shape index: {}]   ;;  %s3454_s11 = inlined_call_operand.hbm [shape: f32[4,128], index: 11, kind: input, shape index: {}]   ;;  %s3455_s12 = inlined_call_operand.hbm [shape: bf16[64,128], index: 12, kind: output, shape index: {0}]   ;;  %s3456_s13 = inlined_call_operand.hbm [shape: bf16[64,128], index: 13, kind: output, shape index: {1}]   ;;  %s3457_s14 = inlined_call_operand.vmem [shape: f32[64,1], index: 14, kind: output, shape index: {2}]  }
   0x1   :  { %21 = vsyncpa [#allocation6], 0 }
   0x2   :  { %22 = vsyncpa [#allocation9], 0 }
   0x3   :  { %23 = vsyncpa [#allocation4], 0  ;;  %s50_s15 = sshll.u32 %s3449_s6, 4  ;;  %s51_s15 = int_to_ptr.hbm [resolvable:$true] %s50_s15 }
   0x4   :  { %24 = vsyncpa [#allocation12], 0  ;;  %s2505_s16 = smov [#allocation5]   ;;  %s40_s20 = sshll.u32 %s3448_s5, 4  ;;  %s41_s20 = int_to_ptr.hbm [resolvable:$true] %s40_s20 }
   0x5   :  { %s52_s17 = sshll.u32 %s2505_s16, 4  ;;  %s2506_s21 = smov 64   ;;  %s53_s17 = int_to_ptr.vmem [resolvable:$true] %s52_s17 }
   0x6   :  { %s2507_s22 = smov 4   ;;  %s2508_s23 = smov [#allocation2]  }
   0x7   :  { %58 = dma.hbm_to_vmem [thread:$0]  %s51_s15, 1024, %s53_s17, [#allocation6], %s2506_s21, %s2506_s21, %s2507_s22  }
   0x8   :  { %s42_s24 = sshll.u32 %s2508_s23, 4  ;;  %s68_s26 = sshll.u32 %s3452_s9, 4  ;;  %s43_s24 = int_to_ptr.vmem [resolvable:$true] %s42_s24  ;;  %s69_s26 = int_to_ptr.hbm [resolvable:$true] %s68_s26 }
   0x9   :  { %45 = dma.hbm_to_vmem [thread:$0]  %s41_s20, 16, %s43_s24, [#allocation3]  }
   0xa   :  { %s81_s5 = sshll.u32 %s3454_s11, 4  ;;  %s2509_s29 = smov [#allocation7]   ;;  %s82_s5 = int_to_ptr.hbm [resolvable:$true] %s81_s5 }
   0xb   :  { %s70_s30 = sshll.u32 %s2509_s29, 4  ;;  %s2510_s15 = smov [#allocation8]   ;;  %s71_s30 = int_to_ptr.vmem [resolvable:$true] %s70_s30 }
   0xc   :  { %73 = dma.hbm_to_vmem [thread:$0]  %s69_s26, 16, %s71_s30, [#allocation6]  }
   0xd   :  { %s83_s16 = sshll.u32 %s2510_s15, 4  ;;  %s84_s16 = int_to_ptr.vmem [resolvable:$true] %s83_s16 }
   0xe   :  { %86 = dma.hbm_to_vmem [thread:$0]  %s82_s5, 64, %s84_s16, [#allocation9]  }
   0xf   :  { %2495 = dma.done.wait [#allocation3], 16  }
  0x10   :  { %2496 = vsyncadd [#allocation3], 4294967280 }
  0x11   :  { %2497 = dma.done.wait [#allocation6], 1040  }
  0x12   :  { %2498 = vsyncadd [#allocation6], 4294966256 }
  0x13   :  { %2499 = dma.done.wait [#allocation9], 64  }
  0x14   :  { %2500 = vsyncadd [#allocation9], 4294967232  ;;  %v2225_v0 = vld [vmem:[%s3447_s4 + $0x8] sm:$0xff]  ;;  %v2224_v1 = vld [vmem:[%s3447_s4] sm:$0xff]  ;;  %vm218_vm0 = vcmask 261120   ;;  %s2511_s17 = smov 1  }
  0x15   :  { %237 = vmatpush.bf16.msra.mxu1 %v2225_v0  ;;  %v186_v2 = vld [vmem:[%s3444_s1] sm:$0xff]  ;;  %v187_v3 = vld [vmem:[%s3444_s1 + $0x8] sm:$0xff]  ;;  %v188_v5 = vld [vmem:[%s3444_s1 + $0x10] sm:$0xff]  ;;  %v2512_v33 = vmov 0   ;;  %vm128_vm10 = vcmask 130048   ;;  %s2516_s16 = smov [#allocation10]  }
  0x16   :  { %v2620_v4 = vpack.c.bf16 %v187_v3, %v186_v2  ;;  %v189_v6 = vld [vmem:[%s3444_s1 + $0x18] sm:$0xff]  ;;  %v190_v8 = vld [vmem:[%s3444_s1 + $0x20] sm:$0xff]  ;;  %v191_v9 = vld [vmem:[%s3444_s1 + $0x28] sm:$0xff]  ;;  %s2517_s6 = smov [#allocation11]   ;;  %s1907_s28 = sshll.u32 %s3456_s13, 4  ;;  %s1908_s28 = int_to_ptr.hbm [resolvable:$true] %s1907_s28 }
  0x17   :  { %v2630_v7 = vpack.c.bf16 %v189_v6, %v188_v5  ;;  %v2640_v10 = vpack.c.bf16 %v191_v9, %v190_v8  ;;  %v192_v11 = vld [vmem:[%s3444_s1 + $0x30] sm:$0xff]  ;;  %v193_v12 = vld [vmem:[%s3444_s1 + $0x38] sm:$0xff]  ;;  %v2340_v14 = vld [vmem:[#allocation2] ss:$0 sm:$0xff]  ;;  %s1905_s4 = sshll.u32 %s2517_s6, 4  ;;  %s1906_s4 = int_to_ptr.vmem [resolvable:$true] %s1905_s4 }
  0x18   :  { %v2650_v13 = vpack.c.bf16 %v193_v12, %v192_v11  ;;  %v2223_v58 = vld [vmem:[%s3445_s2] sm:$0xff]  ;;  %v105_v60 = vld [vmem:[%s3443_s0 + $0x8] sm:$0xff]  ;;  %v106_v5 = vld [vmem:[%s3443_s0 + $0x10] sm:$0xff] }
  0x19   :  { %238 = vmatpush.bf16.msra.mxu1 %v2224_v1  ;;  %148 = vmatpush.bf16.msra.mxu0 %v2223_v58  ;;  %v104_v59 = vld [vmem:[%s3443_s0] sm:$0xff]  ;;  %v2227_v61 = vld [vmem:[#allocation5 + $0x8] sm:$0xff]  ;;  %v107_v6 = vld [vmem:[%s3443_s0 + $0x18] sm:$0xff]  ;;  %v2513_v58 = vmov 3  }
  0x1a   :  { %v112_v62 = vpack.c.bf16 %v105_v60, %v104_v59  ;;  %2320 = vmatpush.bf16.msra.mxu2 %v2227_v61  ;;  %v2231_v2 = vld [vmem:[#allocation5 + $0x28] sm:$0xff]  ;;  %v113_v12 = vpack.c.bf16 %v107_v6, %v106_v5  ;;  %2338 = vset.pattern.permute.xlu0 %v2513_v58  ;;  %v2838_v6 = vld [vmem:[%s3446_s3] ss:$0 sm:$0xff]  ;;  %s1892_s3 = sshll.u32 %s2516_s16, 4  ;;  %s1893_s3 = int_to_ptr.vmem [resolvable:$true] %s1892_s3 }
  0x1b   :  { %2337 = vset.pattern.permute.xlu1 %v2513_v58  ;;  %2339 = vset.pattern.permute.xlu2 %v2513_v58 }
  0x1c   :  { %1947 = vmatmul.msk.bf16.vlgmr.msra.gmra.mxu1 %vm218_vm0, %v2620_v4  ;;  %1935 = vmatmul.msk.bf16.vlgmr.msra.gmra.mxu0 %vm128_vm10, %v112_v62 }
  0x1d   :  { %500 = vmatpush.bf16.msrb.mxu1 %v2227_v61  ;;  %652 = vmatpush.bf16.msrb.mxu0 %v2231_v2 }
  0x2c   :  { %1948 = vmatmul.msk.bf16.gmra.mxu1 %vm218_vm0, %v2630_v7  ;;  %1936 = vmatmul.msk.bf16.gmra.mxu0 %vm128_vm10, %v113_v12 }
  0x3c   :  { %1949 = vmatmul.msk.bf16.gmra.mxu1 %vm218_vm0, %v2640_v10 }
  0x4c   :  { %1950 = vmatmul.msk.bf16.gmra.mxu1 %vm218_vm0, %v2650_v13 }
  0x99   :  { %v240_v15 = vpop.f32.mrf.mxu1 }
  0x9a   :  { %v2654_v16 = vadd.f32 %v2340_v14, %v240_v15 }
  0x9c   :  { %268 = vrot.lane.b32.xlu0 %v2654_v16, %s2511_s17 }
  0xa1   :  { %v242_v17 = vpop.f32.mrf.mxu1 }
  0xa2   :  { %v2658_v18 = vadd.f32 %v2340_v14, %v242_v17 }
  0xa4   :  { %270 = vrot.lane.b32.xlu0 %v2658_v18, %s2511_s17 }
  0xa9   :  { %v245_v19 = vpop.f32.mrf.mxu1 }
  0xaa   :  { %v2662_v20 = vadd.f32 %v2340_v14, %v245_v19 }
  0xac   :  { %272 = vrot.lane.b32.xlu1 %v2662_v20, %s2511_s17 }
  0xb1   :  { %v247_v21 = vpop.f32.mrf.mxu1 }
  0xb2   :  { %v2666_v22 = vadd.f32 %v2340_v14, %v247_v21 }
  0xb4   :  { %274 = vrot.lane.b32.xlu1 %v2666_v22, %s2511_s17 }
  0xb9   :  { %v250_v23 = vpop.f32.mrf.mxu1 }
  0xba   :  { %v2670_v24 = vadd.f32 %v2340_v14, %v250_v23 }
  0xbc   :  { %276 = vrot.lane.b32.xlu2 %v2670_v24, %s2511_s17 }
  0xc1   :  { %v252_v25 = vpop.f32.mrf.mxu1 }
  0xc2   :  { %v2674_v26 = vadd.f32 %v2340_v14, %v252_v25 }
  0xc4   :  { %278 = vrot.lane.b32.xlu2 %v2674_v26, %s2511_s17 }
  0xc9   :  { %v255_v27 = vpop.f32.mrf.mxu1 }
  0xca   :  { %v2678_v28 = vadd.f32 %v2340_v14, %v255_v27 }
  0xcc   :  { %280 = vrot.lane.b32.xlu0 %v2678_v28, %s2511_s17 }
  0xd1   :  { %v257_v29 = vpop.f32.mrf.mxu1 }
  0xd2   :  { %v2682_v30 = vadd.f32 %v2340_v14, %v257_v29 }
  0xd4   :  { %282 = vrot.lane.b32.xlu1 %v2682_v30, %s2511_s17 }
 0x10e   :  { %v269_v31 = vpop.permute.xlu0 %268 }
 0x10f   :  { %vm292_vm1 = vcmp.gt.f32.partialorder %v2654_v16, %v269_v31 }
 0x110   :  { %v308_v32 = vsel %vm292_vm1, %v2654_v16, %v269_v31  ;;  %v300_v34 = vsel %vm292_vm1, 1, %v2512_v33 }
 0x111   :  { %324 = vrot.lane.b32.xlu2 %v308_v32, %s2511_s17  ;;  %356 = vrot.lane.b32.xlu1 %v300_v34, %s2511_s17  ;;  %v108_v34 = vld [vmem:[%s3443_s0 + $0x20] sm:$0xff] }
 0x116   :  { %v271_v35 = vpop.permute.xlu0 %270  ;;  %v277_v39 = vpop.permute.xlu2 %276 }
 0x117   :  { %vm293_vm2 = vcmp.gt.f32.partialorder %v2658_v18, %v271_v35  ;;  %vm296_vm4 = vcmp.gt.f32.partialorder %v2670_v24, %v277_v39 }
 0x118   :  { %v309_v36 = vsel %vm293_vm2, %v2658_v18, %v271_v35  ;;  %v301_v37 = vsel %vm293_vm2, 1, %v2512_v33  ;;  %v312_v44 = vsel %vm296_vm4, %v2670_v24, %v277_v39  ;;  %v304_v49 = vsel %vm296_vm4, 1, %v2512_v33  ;;  %v109_v35 = vld [vmem:[%s3443_s0 + $0x28] sm:$0xff] }
 0x119   :  { %326 = vrot.lane.b32.xlu0 %v309_v36, %s2511_s17  ;;  %358 = vrot.lane.b32.xlu2 %v301_v37, %s2511_s17  ;;  %v2226_v36 = vld [vmem:[#allocation5] sm:$0xff]  ;;  %v114_v37 = vpack.c.bf16 %v109_v35, %v108_v34 }
 0x11a   :  { %v2230_v39 = vld [vmem:[#allocation5 + $0x20] sm:$0xff]  ;;  %501 = vmatpush.bf16.msrb.mxu1 %v2226_v36  ;;  %2321 = vmatpush.bf16.msra.mxu2 %v2226_v36 }
 0x11b   :  { %653 = vmatpush.bf16.msrb.mxu0 %v2230_v39 }
 0x11c   :  { %1937 = vmatmul.msk.bf16.gmra.mxu0 %vm128_vm10, %v114_v37 }
 0x11d   :  { %1967 = vmatmul.msk.bf16.vlgmr.msrb.gmra.mxu1 %vm218_vm0, %v2620_v4  ;;  %1968 = vmatmul.msk.bf16.vlgmr.msra.gmra.mxu2 %vm218_vm0, %v2630_v7 }
 0x11e   :  { %v273_v38 = vpop.permute.xlu1 %272  ;;  %v279_v46 = vpop.permute.xlu2 %278 }
 0x11f   :  { %vm294_vm3 = vcmp.gt.f32.partialorder %v2662_v20, %v273_v38  ;;  %vm297_vm6 = vcmp.gt.f32.partialorder %v2674_v26, %v279_v46 }
 0x120   :  { %v310_v40 = vsel %vm294_vm3, %v2662_v20, %v273_v38  ;;  %v302_v41 = vsel %vm294_vm3, 1, %v2512_v33  ;;  %v313_v47 = vsel %vm297_vm6, %v2674_v26, %v279_v46  ;;  %v305_v48 = vsel %vm297_vm6, 1, %v2512_v33  ;;  %v2229_v38 = vld [vmem:[#allocation5 + $0x18] sm:$0xff] }
 0x121   :  { %328 = vrot.lane.b32.xlu1 %v310_v40, %s2511_s17  ;;  %360 = vrot.lane.b32.xlu0 %v302_v41, %s2511_s17  ;;  %v2233_v41 = vld [vmem:[#allocation5 + $0x38] sm:$0xff] }
 0x122   :  { %548 = vmatpush.bf16.msra.mxu3 %v2229_v38  ;;  %756 = vmatpush.bf16.msra.mxu1 %v2233_v41 }
 0x126   :  { %v275_v42 = vpop.permute.xlu1 %274 }
 0x127   :  { %vm295_vm5 = vcmp.gt.f32.partialorder %v2666_v22, %v275_v42 }
 0x128   :  { %v303_v43 = vsel %vm295_vm5, 1, %v2512_v33  ;;  %v311_v45 = vsel %vm295_vm5, %v2666_v22, %v275_v42  ;;  %v2228_v42 = vld [vmem:[#allocation5 + $0x10] sm:$0xff] }
 0x129   :  { %362 = vrot.lane.b32.xlu1 %v303_v43, %s2511_s17  ;;  %332 = vrot.lane.b32.xlu0 %v312_v44, %s2511_s17  ;;  %v2232_v43 = vld [vmem:[#allocation5 + $0x30] sm:$0xff] }
 0x12a   :  { %330 = vrot.lane.b32.xlu2 %v311_v45, %s2511_s17  ;;  %549 = vmatpush.bf16.msra.mxu3 %v2228_v42 }
 0x12b   :  { %757 = vmatpush.bf16.msra.mxu1 %v2232_v43 }
 0x12d   :  { %1979 = vmatmul.msk.bf16.vlgmr.msra.gmra.mxu3 %vm218_vm0, %v2620_v4  ;;  %1969 = vmatmul.msk.bf16.gmra.mxu2 %vm218_vm0, %v2640_v10 }
 0x12e   :  { %2322 = vmatpush.bf16.msrb.mxu3 %v2233_v41  ;;  %2003 = vmatmul.msk.bf16.vlgmr.msra.gmra.mxu1 %vm218_vm0, %v2620_v4 }
 0x131   :  { %334 = vrot.lane.b32.xlu1 %v313_v47, %s2511_s17  ;;  %366 = vrot.lane.b32.xlu0 %v305_v48, %s2511_s17 }
 0x132   :  { %364 = vrot.lane.b32.xlu2 %v304_v49, %s2511_s17  ;;  %v110_v49 = vld [vmem:[%s3443_s0 + $0x30] sm:$0xff]  ;;  %2323 = vmatpush.bf16.msrb.mxu3 %v2232_v43 }
 0x13d   :  { %1980 = vmatmul.msk.bf16.gmra.mxu3 %vm218_vm0, %v2630_v7  ;;  %1970 = vmatmul.msk.bf16.gmra.mxu2 %vm218_vm0, %v2650_v13 }
 0x13e   :  { %v281_v50 = vpop.permute.xlu0 %280  ;;  %2004 = vmatmul.msk.bf16.gmra.mxu1 %vm218_vm0, %v2630_v7 }
 0x13f   :  { %vm298_vm7 = vcmp.gt.f32.partialorder %v2678_v28, %v281_v50 }
 0x140   :  { %v314_v51 = vsel %vm298_vm7, %v2678_v28, %v281_v50  ;;  %v306_v52 = vsel %vm298_vm7, 1, %v2512_v33  ;;  %v111_v50 = vld [vmem:[%s3443_s0 + $0x38] sm:$0xff]  ;;  %s1894_s0 = sshll.u32 %s3455_s12, 4  ;;  %s1895_s0 = int_to_ptr.hbm [resolvable:$true] %s1894_s0 }
 0x141   :  { %336 = vrot.lane.b32.xlu2 %v314_v51, %s2511_s17  ;;  %368 = vrot.lane.b32.xlu1 %v306_v52, %s2511_s17  ;;  %v115_v51 = vpack.c.bf16 %v111_v50, %v110_v49 }
 0x143   :  { %1938 = vmatmul.msk.bf16.gmra.mxu0 %vm128_vm10, %v115_v51 }
 0x146   :  { %v283_v53 = vpop.permute.xlu1 %282 }
 0x147   :  { %vm299_vm8 = vcmp.gt.f32.partialorder %v2682_v30, %v283_v53 }
 0x148   :  { %v315_v54 = vsel %vm299_vm8, %v2682_v30, %v283_v53  ;;  %v307_v55 = vsel %vm299_vm8, 1, %v2512_v33 }
 0x149   :  { %338 = vrot.lane.b32.xlu0 %v315_v54, %s2511_s17  ;;  %370 = vrot.lane.b32.xlu2 %v307_v55, %s2511_s17 }
 0x14d   :  { %1981 = vmatmul.msk.bf16.gmra.mxu3 %vm218_vm0, %v2640_v10 }
 0x153   :  { %1991 = vmatmul.msk.bf16.vlgmr.msrb.gmra.mxu0 %vm218_vm0, %v2620_v4 }
 0x15d   :  { %1982 = vmatmul.msk.bf16.gmra.mxu3 %vm218_vm0, %v2650_v13 }
 0x163   :  { %1992 = vmatmul.msk.bf16.gmra.mxu0 %vm218_vm0, %v2630_v7 }
 0x16b   :  { %v325_v56 = vpop.permute.xlu2 %324 }
 0x16c   :  { %vm348_vm9 = vcmp.gt.f32.partialorder %v2654_v16, %v325_v56 }
 0x16d   :  { %v380_v57 = vsel %vm348_vm9, %v2654_v16, %v325_v56  ;;  %2005 = vmatmul.msk.bf16.vlgmr.msrb.gmra.mxu3 %vm218_vm0, %v2640_v10 }
 0x16e   :  { %396 = vrot.lane.b32.xlu0 %v380_v57, %s2511_s17 }
 0x173   :  { %v359_v1 = vpop.permute.xlu2 %358  ;;  %1993 = vmatmul.msk.bf16.gmra.mxu0 %vm218_vm0, %v2640_v10  ;;  %v150_v10 = vpop.f32.mrf.mxu0 }
 0x17d   :  { %2006 = vmatmul.msk.bf16.gmra.mxu3 %vm218_vm0, %v2650_v13 }
 0x183   :  { %v357_v63 = vpop.permute.xlu1 %356  ;;  %1994 = vmatmul.msk.bf16.gmra.mxu0 %vm218_vm0, %v2650_v13  ;;  %v151_v13 = vadd.f32 %v2838_v6, %v150_v10 }
 0x184   :  { %v372_v0 = vsel %vm348_vm9, 2, %v357_v63  ;;  %v331_v11 = vpop.permute.xlu2 %330 }
 0x185   :  { %428 = vrot.lane.b32.xlu2 %v372_v0, %s2511_s17  ;;  %vm351_vm12 = vcmp.gt.f32.partialorder %v2666_v22, %v331_v11 }
 0x186   :  { %v383_v21 = vsel %vm351_vm12, %v2666_v22, %v331_v11  ;;  %v152_v11 = vpop.f32.mrf.mxu0 }
 0x18b   :  { %v327_v3 = vpop.permute.xlu0 %326 }
 0x18c   :  { %vm349_vm11 = vcmp.gt.f32.partialorder %v2658_v18, %v327_v3  ;;  %v365_v23 = vpop.permute.xlu2 %364 }
 0x18d   :  { %v381_v8 = vsel %vm349_vm11, %v2658_v18, %v327_v3  ;;  %v373_v9 = vsel %vm349_vm11, 2, %v359_v1 }
 0x18e   :  { %398 = vrot.lane.b32.xlu1 %v381_v8, %s2511_s17  ;;  %430 = vrot.lane.b32.xlu0 %v373_v9, %s2511_s17 }
 0x193   :  { %v329_v14 = vpop.permute.xlu1 %328  ;;  %v361_v15 = vpop.permute.xlu0 %360 }
 0x194   :  { %vm350_vm13 = vcmp.gt.f32.partialorder %v2662_v20, %v329_v14 }
 0x195   :  { %v374_v17 = vsel %vm350_vm13, 2, %v361_v15  ;;  %v382_v19 = vsel %vm350_vm13, %v2662_v20, %v329_v14 }
 0x196   :  { %400 = vrot.lane.b32.xlu2 %v382_v19, %s2511_s17  ;;  %402 = vrot.lane.b32.xlu0 %v383_v21, %s2511_s17 }
 0x197   :  { %432 = vrot.lane.b32.xlu1 %v374_v17, %s2511_s17 }
 0x19b   :  { %v363_v25 = vpop.permute.xlu1 %362  ;;  %v333_v29 = vpop.permute.xlu0 %332 }
 0x19c   :  { %v375_v27 = vsel %vm351_vm12, 2, %v363_v25  ;;  %vm352_vm14 = vcmp.gt.f32.partialorder %v2670_v24, %v333_v29  ;;  %v337_v40 = vpop.permute.xlu2 %336 }
 0x19d   :  { %v384_v31 = vsel %vm352_vm14, %v2670_v24, %v333_v29  ;;  %v376_v32 = vsel %vm352_vm14, 2, %v365_v23  ;;  %vm354_vm15 = vcmp.gt.f32.partialorder %v2678_v28, %v337_v40  ;;  %v155_v29 = vpop.f32.mrf.mxu0 }
 0x19e   :  { %434 = vrot.lane.b32.xlu2 %v375_v27, %s2511_s17  ;;  %436 = vrot.lane.b32.xlu0 %v376_v32, %s2511_s17  ;;  %v386_v48 = vsel %vm354_vm15, %v2678_v28, %v337_v40  ;;  %v156_v35 = vadd.f32 %v2838_v6, %v155_v29  ;;  %v2264_v29 = vld [vmem:[%s3453_s10 + $0xb0] sm:$0xff] }
 0x19f   :  { %404 = vrot.lane.b32.xlu1 %v384_v31, %s2511_s17 }
 0x1a3   :  { %v335_v44 = vpop.permute.xlu1 %334  ;;  %v367_v45 = vpop.permute.xlu0 %366 }
 0x1a4   :  { %vm353_vm1 = vcmp.gt.f32.partialorder %v2674_v26, %v335_v44  ;;  %v371_v55 = vpop.permute.xlu2 %370 }
 0x1a5   :  { %v377_v46 = vsel %vm353_vm1, 2, %v367_v45  ;;  %v385_v47 = vsel %vm353_vm1, %v2674_v26, %v335_v44  ;;  %v157_v37 = vpop.f32.mrf.mxu0 }
 0x1a6   :  { %406 = vrot.lane.b32.xlu2 %v385_v47, %s2511_s17  ;;  %408 = vrot.lane.b32.xlu0 %v386_v48, %s2511_s17  ;;  %v158_v38 = vadd.f32 %v2838_v6, %v157_v37 }
 0x1a7   :  { %438 = vrot.lane.b32.xlu1 %v377_v46, %s2511_s17 }
 0x1a8   :  { %v2282_v39 = vpack.c.bf16 %v158_v38, %v156_v35  ;;  %v2263_v35 = vld [vmem:[%s3453_s10 + $0xa8] sm:$0xff]  ;;  %v2246_v38 = vld [vmem:[%s3453_s10 + $0x20] sm:$0xff] }
 0x1aa   :  { %2314 = vst [vmem:[#allocation10 + $0x8] sm:$0xff] %v2282_v39   ;;  %v2254_v39 = vld [vmem:[%s3453_s10 + $0x60] sm:$0xff] }
 0x1ad   :  { %v160_v48 = vpop.f32.mrf.mxu0 }
 0x1b0   :  { %v2950_v37 = vpop.f32.mrf.mxu3 }
 0x1b3   :  { %v369_v52 = vpop.permute.xlu1 %368 }
 0x1b4   :  { %v378_v53 = vsel %vm354_vm15, 2, %v369_v52 }
 0x1b5   :  { %440 = vrot.lane.b32.xlu2 %v378_v53, %s2511_s17  ;;  %v162_v53 = vpop.f32.mrf.mxu0 }
 0x1bb   :  { %v339_v54 = vpop.permute.xlu0 %338 }
 0x1bc   :  { %vm355_vm2 = vcmp.gt.f32.partialorder %v2682_v30, %v339_v54 }
 0x1bd   :  { %v387_v56 = vsel %vm355_vm2, %v2682_v30, %v339_v54  ;;  %v379_v57 = vsel %vm355_vm2, 2, %v371_v55  ;;  %v163_v54 = vadd.f32 %v2838_v6, %v162_v53  ;;  %v2260_v53 = vld [vmem:[%s3453_s10 + $0x90] sm:$0xff] }
 0x1be   :  { %410 = vrot.lane.b32.xlu1 %v387_v56, %s2511_s17  ;;  %442 = vrot.lane.b32.xlu0 %v379_v57, %s2511_s17 }
 0x1df   :  { %v429_v59 = vpop.permute.xlu2 %428 }
 0x1e0   :  { %v397_v4 = vpop.permute.xlu0 %396 }
 0x1e1   :  { %vm420_vm3 = vcmp.gt.f32.partialorder %v2654_v16, %v397_v4  ;;  %v2514_v16 = vmov 0.0  }
 0x1e2   :  { %v444_v60 = vsel %vm420_vm3, 3, %v429_v59  ;;  %v2241_v59 = vld [vmem:[%s3451_s8 + $0x38] sm:$0xff] }
 0x1e3   :  { %vm779_vm4 = vcmp.eq.s32.totalorder %v444_v60, 3  ;;  %vm571_vm5 = vcmp.eq.s32.totalorder %v444_v60, 1  ;;  %vm675_vm6 = vcmp.eq.s32.totalorder %v444_v60, 2  ;;  %vm452_vm7 = vcmp.ne.s32.totalorder %v444_v60, 0  ;;  %971 = vmatpush.bf16.msrb.mxu2 %v2241_v59  ;;  %v2242_v59 = vld [vmem:[%s3453_s10] sm:$0xff] }
 0x1e4   :  { %v787_v61 = vsel %vm779_vm4, 1, %v2512_v33  ;;  %v579_v62 = vsel %vm571_vm5, 1, %v2512_v33  ;;  %v683_v7 = vsel %vm675_vm6, 1, %v2512_v33  ;;  %v2826_v63 = vsel %vm452_vm7, 1.0, %v2514_v16 }
 0x1e5   :  { %796 = vperm.xlu0 %2338, %v787_v61   ;;  %588 = vperm.xlu1 %2337, %v579_v62   ;;  %vm835_vm8 = vcmp.gt.f32.partialorder %v2826_v63, 0.0  ;;  %v165_v62 = vpop.f32.mrf.mxu0 }
 0x1e6   :  { %v843_v0 = vsel %vm835_vm8, 1, %v2512_v33 }
 0x1ed   :  { %692 = vperm.xlu1 %2337, %v683_v7  }
 0x1f0   :  { %v401_v1 = vpop.permute.xlu2 %400 }
 0x1f1   :  { %vm422_vm0 = vcmp.gt.f32.partialorder %v2662_v20, %v401_v1 }
 0x1f5   :  { %852 = vperm.xlu1 %2337, %v843_v0  }
 0x1f8   :  { %v435_v15 = vpop.permute.xlu2 %434 }
 0x200   :  { %v399_v2 = vpop.permute.xlu1 %398  ;;  %v431_v3 = vpop.permute.xlu0 %430 }
 0x201   :  { %vm421_vm9 = vcmp.gt.f32.partialorder %v2658_v18, %v399_v2  ;;  %v153_v18 = vadd.f32 %v2838_v6, %v152_v11  ;;  %v407_v40 = vpop.permute.xlu2 %406 }
 0x202   :  { %v445_v5 = vsel %vm421_vm9, 3, %v431_v3 }
 0x203   :  { %vm780_vm10 = vcmp.eq.s32.totalorder %v445_v5, 3  ;;  %vm572_vm11 = vcmp.eq.s32.totalorder %v445_v5, 1  ;;  %vm676_vm12 = vcmp.eq.s32.totalorder %v445_v5, 2  ;;  %v2277_v19 = vpack.c.bf16 %v153_v18, %v151_v13 }
 0x204   :  { %v788_v8 = vsel %vm780_vm10, 1, %v2512_v33  ;;  %v580_v9 = vsel %vm572_vm11, 1, %v2512_v33  ;;  %vm453_vm14 = vcmp.ne.s32.totalorder %v445_v5, 0  ;;  %v684_v25 = vsel %vm676_vm12, 1, %v2512_v33 }
 0x205   :  { %799 = vperm.xlu1 %2337, %v788_v8   ;;  %591 = vperm.xlu2 %2339, %v580_v9   ;;  %2278 = vst [vmem:[#allocation10] sm:$0xff] %v2277_v19   ;;  %v2850_v27 = vsel %vm453_vm14, 1.0, %v2514_v16  ;;  %vm425_vm11 = vcmp.gt.f32.partialorder %v2674_v26, %v407_v40  ;;  %v161_v26 = vadd.f32 %v2838_v6, %v160_v48  ;;  %v167_v9 = vpop.f32.mrf.mxu0  ;;  %v2238_v19 = vld [vmem:[%s3451_s8 + $0x20] sm:$0xff]  ;;  %v2236_v40 = vld [vmem:[%s3451_s8 + $0x10] sm:$0xff]  ;;  %v2235_v48 = vld [vmem:[%s3451_s8 + $0x8] sm:$0xff] }
 0x206   :  { %vm836_vm3 = vcmp.gt.f32.partialorder %v2850_v27, 0.0  ;;  %v166_v5 = vadd.f32 %v2838_v6, %v165_v62  ;;  %v168_v13 = vadd.f32 %v2838_v6, %v167_v9  ;;  %v2258_v62 = vld [vmem:[%s3453_s10 + $0x80] sm:$0xff] }
 0x207   :  { %v844_v32 = vsel %vm836_vm3, 1, %v2512_v33  ;;  %v2287_v56 = vpack.c.bf16 %v163_v54, %v161_v26  ;;  %v553_v26 = vpop.f32.mrf.mxu3  ;;  %v503_v54 = vpop.f32.mrf.mxu1  ;;  %v3031_v9 = vld [vmem:[%s3450_s7 + $0x2] ss:$0 sm:$0xff] }
 0x208   :  { %v403_v14 = vpop.permute.xlu0 %402  ;;  %v2292_v11 = vpack.c.bf16 %v168_v13, %v166_v5  ;;  %v3021_v5 = vld [vmem:[%s3450_s7] ss:$0 sm:$0xff] }
 0x209   :  { %v433_v12 = vpop.permute.xlu1 %432  ;;  %vm423_vm13 = vcmp.gt.f32.partialorder %v2666_v22, %v403_v14  ;;  %2315 = vst [vmem:[#allocation10 + $0x10] sm:$0xff] %v2287_v56   ;;  %v2249_v14 = vld [vmem:[%s3453_s10 + $0x38] sm:$0xff]  ;;  %v2251_v56 = vld [vmem:[%s3453_s10 + $0x48] sm:$0xff] }
 0x20a   :  { %v446_v17 = vsel %vm422_vm0, 3, %v433_v12  ;;  %v447_v21 = vsel %vm423_vm13, 3, %v435_v15  ;;  %2316 = vst [vmem:[#allocation10 + $0x18] sm:$0xff] %v2292_v11   ;;  %v2257_v15 = vld [vmem:[%s3453_s10 + $0x78] sm:$0xff]  ;;  %1290 = vmatpush.bf16.msra.mxu3 %v2249_v14 }
 0x20b   :  { %vm573_vm15 = vcmp.eq.s32.totalorder %v446_v17, 1  ;;  %vm574_vm1 = vcmp.eq.s32.totalorder %v447_v21, 1  ;;  %vm677_vm2 = vcmp.eq.s32.totalorder %v446_v17, 2  ;;  %vm678_vm4 = vcmp.eq.s32.totalorder %v447_v21, 2  ;;  %1386 = vmatpush.bf16.msra.mxu0 %v2257_v15  ;;  %1900 = dma.vmem_to_hbm [thread:$0]  %s1893_s3, 512, %s1895_s0, [#allocation4], %s2506_s21, %s2506_s21, %s2507_s22  }
 0x20c   :  { %v581_v23 = vsel %vm573_vm15, 1, %v2512_v33  ;;  %v582_v20 = vsel %vm574_vm1, 1, %v2512_v33  ;;  %vm454_vm5 = vcmp.ne.s32.totalorder %v446_v17, 0  ;;  %v685_v31 = vsel %vm677_vm2, 1, %v2512_v33 }
 0x20d   :  { %594 = vperm.xlu0 %2338, %v581_v23   ;;  %695 = vperm.xlu2 %2339, %v684_v25   ;;  %v686_v34 = vsel %vm678_vm4, 1, %v2512_v33  ;;  %v2858_v36 = vsel %vm454_vm5, 1.0, %v2514_v16  ;;  %vm782_vm6 = vcmp.eq.s32.totalorder %v447_v21, 3  ;;  %vm781_vm7 = vcmp.eq.s32.totalorder %v446_v17, 3  ;;  %v2265_v17 = vld [vmem:[%s3453_s10 + $0xb8] sm:$0xff]  ;;  %v2256_v23 = vld [vmem:[%s3453_s10 + $0x70] sm:$0xff] }
 0x20e   :  { %597 = vperm.xlu1 %2337, %v582_v20   ;;  %vm837_vm8 = vcmp.gt.f32.partialorder %v2858_v36, 0.0  ;;  %vm455_vm10 = vcmp.ne.s32.totalorder %v447_v21, 0  ;;  %v790_v43 = vsel %vm782_vm6, 1, %v2512_v33  ;;  %v789_v44 = vsel %vm781_vm7, 1, %v2512_v33  ;;  %v2248_v21 = vld [vmem:[%s3453_s10 + $0x30] sm:$0xff]  ;;  %1538 = vmatpush.bf16.msrb.mxu1 %v2265_v17 }
 0x20f   :  { %v845_v45 = vsel %vm837_vm8, 1, %v2512_v33  ;;  %v2868_v47 = vsel %vm455_vm10, 1.0, %v2514_v16  ;;  %v441_v60 = vpop.permute.xlu2 %440  ;;  %1291 = vmatpush.bf16.msra.mxu3 %v2248_v21  ;;  %1387 = vmatpush.bf16.msra.mxu0 %v2256_v23 }
 0x210   :  { %v437_v41 = vpop.permute.xlu0 %436  ;;  %vm838_vm12 = vcmp.gt.f32.partialorder %v2868_v47, 0.0 }
 0x211   :  { %v405_v22 = vpop.permute.xlu1 %404  ;;  %v846_v50 = vsel %vm838_vm12, 1, %v2512_v33 }
 0x212   :  { %vm424_vm9 = vcmp.gt.f32.partialorder %v2670_v24, %v405_v22  ;;  %v2237_v22 = vld [vmem:[%s3451_s8 + $0x18] sm:$0xff]  ;;  %1539 = vmatpush.bf16.msrb.mxu1 %v2264_v29 }
 0x213   :  { %v448_v46 = vsel %vm424_vm9, 3, %v437_v41 }
 0x214   :  { %vm783_vm0 = vcmp.eq.s32.totalorder %v448_v46, 3  ;;  %vm456_vm14 = vcmp.ne.s32.totalorder %v448_v46, 0  ;;  %vm575_vm1 = vcmp.eq.s32.totalorder %v448_v46, 1  ;;  %vm679_vm5 = vcmp.eq.s32.totalorder %v448_v46, 2  ;;  %v2253_v46 = vld [vmem:[%s3453_s10 + $0x58] sm:$0xff] }
 0x215   :  { %698 = vperm.xlu0 %2338, %v685_v31   ;;  %855 = vperm.xlu2 %2339, %v844_v32   ;;  %v791_v49 = vsel %vm783_vm0, 1, %v2512_v33  ;;  %v2876_v52 = vsel %vm456_vm14, 1.0, %v2514_v16  ;;  %v583_v58 = vsel %vm575_vm1, 1, %v2512_v33  ;;  %v687_v1 = vsel %vm679_vm5, 1, %v2512_v33  ;;  %v2247_v32 = vld [vmem:[%s3453_s10 + $0x28] sm:$0xff] }
 0x216   :  { %701 = vperm.xlu1 %2337, %v686_v34   ;;  %vm839_vm2 = vcmp.gt.f32.partialorder %v2876_v52, 0.0  ;;  %v2255_v34 = vld [vmem:[%s3453_s10 + $0x68] sm:$0xff]  ;;  %1292 = vmatpush.bf16.msra.mxu3 %v2247_v32 }
 0x217   :  { %v847_v4 = vsel %vm839_vm2, 1, %v2512_v33  ;;  %1388 = vmatpush.bf16.msra.mxu0 %v2255_v34  ;;  %1540 = vmatpush.bf16.msrb.mxu1 %v2263_v35 }
 0x218   :  { %v409_v55 = vpop.permute.xlu0 %408 }
 0x219   :  { %v439_v42 = vpop.permute.xlu1 %438  ;;  %vm426_vm3 = vcmp.gt.f32.partialorder %v2678_v28, %v409_v55  ;;  %v2240_v28 = vld [vmem:[%s3451_s8 + $0x30] sm:$0xff]  ;;  %v2243_v55 = vld [vmem:[%s3453_s10 + $0x8] sm:$0xff] }
 0x21a   :  { %v449_v24 = vsel %vm425_vm11, 3, %v439_v42  ;;  %v2887_v61 = vsel %vm426_vm3, 3, %v441_v60  ;;  %972 = vmatpush.bf16.msrb.mxu2 %v2240_v28  ;;  %1293 = vmatpush.bf16.msra.mxu3 %v2246_v38  ;;  %v2250_v60 = vld [vmem:[%s3453_s10 + $0x40] sm:$0xff] }
 0x21b   :  { %vm576_vm13 = vcmp.eq.s32.totalorder %v449_v24, 1  ;;  %vm680_vm15 = vcmp.eq.s32.totalorder %v449_v24, 2  ;;  %vm784_vm4 = vcmp.eq.s32.totalorder %v449_v24, 3  ;;  %vm681_vm6 = vcmp.eq.s32.totalorder %v2887_v61, 2  ;;  %1389 = vmatpush.bf16.msra.mxu0 %v2254_v39 }
 0x21c   :  { %v584_v51 = vsel %vm576_vm13, 1, %v2512_v33  ;;  %v688_v57 = vsel %vm680_vm15, 1, %v2512_v33  ;;  %vm457_vm7 = vcmp.ne.s32.totalorder %v449_v24, 0  ;;  %v792_v10 = vsel %vm784_vm4, 1, %v2512_v33  ;;  %v2261_v24 = vld [vmem:[%s3453_s10 + $0x98] sm:$0xff] }
 0x21d   :  { %805 = vperm.xlu0 %2338, %v790_v43   ;;  %802 = vperm.xlu2 %2339, %v789_v44   ;;  %v689_v2 = vsel %vm681_vm6, 1, %v2512_v33  ;;  %v2898_v3 = vsel %vm457_vm7, 1.0, %v2514_v16  ;;  %vm785_vm9 = vcmp.eq.s32.totalorder %v2887_v61, 3  ;;  %vm577_vm12 = vcmp.eq.s32.totalorder %v2887_v61, 1  ;;  %v2262_v43 = vld [vmem:[%s3453_s10 + $0xa0] sm:$0xff] }
 0x21e   :  { %858 = vperm.xlu1 %2337, %v845_v45   ;;  %vm840_vm10 = vcmp.gt.f32.partialorder %v2898_v3, 0.0  ;;  %v793_v18 = vsel %vm785_vm9, 1, %v2512_v33  ;;  %v585_v20 = vsel %vm577_vm12, 1, %v2512_v33  ;;  %vm458_vm1 = vcmp.ne.s32.totalorder %v2887_v61, 0  ;;  %1541 = vmatpush.bf16.msrb.mxu1 %v2262_v43  ;;  %v2245_v45 = vld [vmem:[%s3453_s10 + $0x18] sm:$0xff]  ;;  %v3011_v61 = vpop.f32.mrf.mxu3 }
 0x21f   :  { %v848_v12 = vsel %vm840_vm10, 1, %v2512_v33  ;;  %v2968_v44 = vsel %vm458_vm1, 1.0, %v2514_v16  ;;  %1294 = vmatpush.bf16.msra.mxu3 %v2245_v45  ;;  %1390 = vmatpush.bf16.msra.mxu0 %v2253_v46 }
 0x220   :  { %vm841_vm2 = vcmp.gt.f32.partialorder %v2968_v44, 0.0 }
 0x222   :  { %1542 = vmatpush.bf16.msrb.mxu1 %v2261_v24 }
 0x225   :  { %808 = vperm.xlu0 %2338, %v791_v49   ;;  %861 = vperm.xlu2 %2339, %v846_v50   ;;  %v2244_v49 = vld [vmem:[%s3453_s10 + $0x10] sm:$0xff] }
 0x226   :  { %603 = vperm.xlu1 %2337, %v584_v51   ;;  %v2252_v50 = vld [vmem:[%s3453_s10 + $0x50] sm:$0xff]  ;;  %v849_v51 = vsel %vm841_vm2, 1, %v2512_v33  ;;  %1295 = vmatpush.bf16.msra.mxu3 %v2244_v49  ;;  %v508_v49 = vpop.f32.mrf.mxu2 }
 0x227   :  { %1391 = vmatpush.bf16.msra.mxu0 %v2252_v50  ;;  %1543 = vmatpush.bf16.msrb.mxu1 %v2260_v53 }
 0x22a   :  { %1296 = vmatpush.bf16.msra.mxu3 %v2243_v55 }
 0x22b   :  { %1392 = vmatpush.bf16.msra.mxu0 %v2251_v56 }
 0x22d   :  { %707 = vperm.xlu0 %2338, %v688_v57   ;;  %600 = vperm.xlu2 %2339, %v583_v58   ;;  %v2259_v57 = vld [vmem:[%s3453_s10 + $0x88] sm:$0xff] }
 0x22e   :  { %864 = vperm.xlu1 %2337, %v847_v4   ;;  %1544 = vmatpush.bf16.msrb.mxu1 %v2259_v57  ;;  %v2234_v4 = vld [vmem:[%s3451_s8] sm:$0xff] }
 0x22f   :  { %1297 = vmatpush.bf16.msra.mxu3 %v2242_v59  ;;  %1393 = vmatpush.bf16.msra.mxu0 %v2250_v60  ;;  %v509_v59 = vadd.f32 %v3021_v5, %v508_v49 }
 0x230   :  { %v411_v7 = vpop.permute.xlu1 %410  ;;  %v443_v0 = vpop.permute.xlu0 %442 }
 0x231   :  { %vm427_vm8 = vcmp.gt.f32.partialorder %v2682_v30, %v411_v7  ;;  %v2239_v30 = vld [vmem:[%s3451_s8 + $0x28] sm:$0xff]  ;;  %v505_v7 = vpop.f32.mrf.mxu1 }
 0x232   :  { %v451_v8 = vsel %vm427_vm8, 3, %v443_v0  ;;  %973 = vmatpush.bf16.msrb.mxu2 %v2239_v30  ;;  %1545 = vmatpush.bf16.msrb.mxu1 %v2258_v62  ;;  %v504_v30 = vadd.f32 %v3021_v5, %v503_v54 }
 0x233   :  { %vm786_vm11 = vcmp.eq.s32.totalorder %v451_v8, 3  ;;  %vm578_vm0 = vcmp.eq.s32.totalorder %v451_v8, 1  ;;  %vm459_vm13 = vcmp.ne.s32.totalorder %v451_v8, 0  ;;  %vm682_vm15 = vcmp.eq.s32.totalorder %v451_v8, 2  ;;  %v3026_v8 = vld [vmem:[%s3450_s7 + $0x1] ss:$0 sm:$0xff] }
 0x234   :  { %v794_v6 = vsel %vm786_vm11, 1, %v2512_v33  ;;  %v586_v25 = vsel %vm578_vm0, 1, %v2512_v33  ;;  %v2938_v31 = vsel %vm459_vm13, 1.0, %v2514_v16  ;;  %v690_v42 = vsel %vm682_vm15, 1, %v2512_v33 }
 0x235   :  { %811 = vperm.xlu0 %2338, %v792_v10   ;;  %704 = vperm.xlu2 %2339, %v687_v1   ;;  %vm842_vm14 = vcmp.gt.f32.partialorder %v2938_v31, 0.0  ;;  %v655_v10 = vpop.f32.mrf.mxu0  ;;  %v552_v11 = vadd.f32 %v3026_v8, %v2950_v37 }
 0x236   :  { %710 = vperm.xlu1 %2337, %v689_v2   ;;  %974 = vmatpush.bf16.msrb.mxu2 %v2238_v19  ;;  %v850_v41 = vsel %vm842_vm14, 1, %v2512_v33  ;;  %v3016_v2 = vpop.f32.mrf.mxu3  ;;  %v656_v14 = vadd.f32 %v3031_v9, %v655_v10  ;;  %v506_v19 = vadd.f32 %v3021_v5, %v505_v7  ;;  %v557_v7 = vadd.f32 %v3026_v8, %v3011_v61 }
 0x237   :  { %v559_v10 = vadd.f32 %v3026_v8, %v3016_v2 }
 0x239   :  { %v759_v13 = vpop.f32.mrf.mxu1 }
 0x23a   :  { %975 = vmatpush.bf16.msrb.mxu2 %v2237_v22 }
 0x23d   :  { %814 = vperm.xlu0 %2338, %v793_v18   ;;  %867 = vperm.xlu2 %2339, %v848_v12   ;;  %v3039_v18 = vld [vmem:[%s3450_s7 + $0x3] ss:$0 sm:$0xff]  ;;  %v657_v15 = vpop.f32.mrf.mxu0 }
 0x23e   :  { %817 = vperm.xlu1 %2337, %v794_v6   ;;  %976 = vmatpush.bf16.msrb.mxu2 %v2236_v40  ;;  %v3042_v17 = vpop.f32.mrf.mxu3  ;;  %v658_v22 = vadd.f32 %v3031_v9, %v657_v15 }
 0x241   :  { %v761_v32 = vpop.f32.mrf.mxu1 }
 0x242   :  { %977 = vmatpush.bf16.msrb.mxu2 %v2235_v48  ;;  %v762_v37 = vadd.f32 %v3039_v18, %v761_v32  ;;  %v2273_v32 = vld [vmem:[%s3453_s10 + $0xf8] sm:$0xff] }
 0x245   :  { %609 = vperm.xlu0 %2338, %v586_v25   ;;  %606 = vperm.xlu2 %2339, %v585_v20   ;;  %v554_v25 = vadd.f32 %v3026_v8, %v553_v26  ;;  %v760_v20 = vadd.f32 %v3039_v18, %v759_v13  ;;  %v660_v50 = vpop.f32.mrf.mxu0 }
 0x246   :  { %978 = vmatpush.bf16.msrb.mxu2 %v2234_v4  ;;  %v3055_v24 = vpop.f32.mrf.mxu3  ;;  %v661_v62 = vadd.f32 %v3031_v9, %v660_v50  ;;  %v2271_v50 = vld [vmem:[%s3453_s10 + $0xe8] sm:$0xff] }
 0x249   :  { %v764_v54 = vpop.f32.mrf.mxu1 }
 0x24a   :  { %1690 = vmatpush.bf16.msra.mxu2 %v2273_v32 }
 0x24d   :  { %873 = vperm.xlu0 %2338, %v850_v41   ;;  %713 = vperm.xlu2 %2339, %v690_v42   ;;  %v662_v60 = vpop.f32.mrf.mxu0 }
 0x24e   :  { %v3067_v55 = vpop.f32.mrf.mxu3 }
 0x255   :  { %870 = vperm.xlu2 %2339, %v849_v51  }
 0x256   :  { %v3081_v15 = vpop.f32.mrf.mxu3 }
 0x257   :  { %v589_v58 = vpop.permute.xlu1 %588  ;;  %v797_v23 = vpop.permute.xlu0 %796 }
 0x258   :  { %vm611_vm3 = vcmp.eq.s32.totalorder %v589_v58, 1  ;;  %vm819_vm8 = vcmp.eq.s32.totalorder %v797_v23, 1  ;;  %v510_v58 = vpop.f32.mrf.mxu2 }
 0x259   :  { %v619_v21 = vsel %vm611_vm3, %v552_v11, %v504_v30  ;;  %v765_v30 = vadd.f32 %v3039_v18, %v764_v54 }
 0x25f   :  { %v592_v28 = vpop.permute.xlu2 %591  ;;  %v693_v0 = vpop.permute.xlu1 %692 }
 0x260   :  { %vm715_vm4 = vcmp.eq.s32.totalorder %v693_v0, 1  ;;  %vm612_vm5 = vcmp.eq.s32.totalorder %v592_v28, 1  ;;  %v766_v28 = vpop.f32.mrf.mxu1  ;;  %v511_v0 = vadd.f32 %v3021_v5, %v510_v58 }
 0x261   :  { %v723_v29 = vsel %vm715_vm4, %v656_v14, %v619_v21  ;;  %v620_v34 = vsel %vm612_vm5, %v554_v25, %v506_v19  ;;  %v767_v11 = vadd.f32 %v3039_v18, %v766_v28  ;;  %v2270_v28 = vld [vmem:[%s3453_s10 + $0xe0] sm:$0xff] }
 0x262   :  { %v827_v35 = vsel %vm819_vm8, %v760_v20, %v723_v29 }
 0x267   :  { %v696_v1 = vpop.permute.xlu2 %695  ;;  %v853_v12 = vpop.permute.xlu1 %852 }
 0x268   :  { %vm875_vm6 = vcmp.eq.s32.totalorder %v853_v12, 1  ;;  %vm716_vm7 = vcmp.eq.s32.totalorder %v696_v1, 1  ;;  %v663_v1 = vadd.f32 %v3031_v9, %v662_v60 }
 0x269   :  { %v3049_v40 = vsel %vm875_vm6, %v827_v35, 0.0  ;;  %v724_v41 = vsel %vm716_vm7, %v658_v22, %v620_v34 }
 0x26a   :  { %v891_v45 = vmax.f32 %v3049_v40, 0.0 }
 0x26f   :  { %v856_v6 = vpop.permute.xlu2 %855 }
 0x270   :  { %vm876_vm10 = vcmp.eq.s32.totalorder %v856_v6, 1 }
 0x277   :  { %v800_v38 = vpop.permute.xlu1 %799  ;;  %v803_v39 = vpop.permute.xlu2 %802 }
 0x278   :  { %vm820_vm9 = vcmp.eq.s32.totalorder %v800_v38, 1  ;;  %vm821_vm14 = vcmp.eq.s32.totalorder %v803_v39, 1  ;;  %v665_v39 = vpop.f32.mrf.mxu0 }
 0x279   :  { %v828_v42 = vsel %vm820_vm9, %v762_v37, %v724_v41  ;;  %v513_v37 = vpop.f32.mrf.mxu2  ;;  %v2272_v41 = vld [vmem:[%s3453_s10 + $0xf0] sm:$0xff]  ;;  %v666_v58 = vadd.f32 %v3031_v9, %v665_v39 }
 0x27a   :  { %v3051_v43 = vsel %vm876_vm10, %v828_v42, 0.0  ;;  %v769_v42 = vpop.f32.mrf.mxu3  ;;  %1691 = vmatpush.bf16.msra.mxu2 %v2272_v41  ;;  %v514_v54 = vadd.f32 %v3021_v5, %v513_v37 }
 0x27b   :  { %v892_v46 = vmax.f32 %v3051_v43, 0.0  ;;  %v770_v60 = vadd.f32 %v3039_v18, %v769_v42  ;;  %v2266_v42 = vld [vmem:[%s3453_s10 + $0xc0] sm:$0xff] }
 0x27d   :  { %v3061_v48 = vpack.c.bf16 %v892_v46, %v891_v45 }
 0x27e   :  { %1692 = vmatpush.bf16.msra.mxu2 %v2271_v50 }
 0x27f   :  { %v595_v51 = vpop.permute.xlu0 %594  ;;  %v862_v26 = vpop.permute.xlu2 %861  ;;  %979 = vmatmul.bf16.vlgmr.msrb.gmra.mxu2 %v3061_v48  ;;  %1298 = vmatmul.bf16.vlgmr.msra.gmra.mxu3 %v3061_v48 }
 0x280   :  { %v598_v53 = vpop.permute.xlu1 %597  ;;  %1394 = vmatmul.bf16.vlgmr.msra.gmra.mxu0 %v3061_v48  ;;  %1546 = vmatmul.bf16.vlgmr.msrb.gmra.mxu1 %v3061_v48  ;;  %vm613_vm11 = vcmp.eq.s32.totalorder %v595_v51, 1  ;;  %vm878_vm1 = vcmp.eq.s32.totalorder %v862_v26, 1 }
 0x281   :  { %vm614_vm12 = vcmp.eq.s32.totalorder %v598_v53, 1  ;;  %v621_v13 = vsel %vm613_vm11, %v557_v7, %v509_v59  ;;  %v515_v26 = vpop.f32.mrf.mxu2  ;;  %v562_v53 = vadd.f32 %v3026_v8, %v3042_v17  ;;  %v564_v17 = vadd.f32 %v3026_v8, %v3055_v24 }
 0x282   :  { %v622_v6 = vsel %vm614_vm12, %v559_v10, %v511_v0  ;;  %v771_v59 = vpop.f32.mrf.mxu3  ;;  %1693 = vmatpush.bf16.msra.mxu2 %v2270_v28 }
 0x283   :  { %v772_v10 = vadd.f32 %v3039_v18, %v771_v59 }
 0x287   :  { %v699_v56 = vpop.permute.xlu0 %698  ;;  %v3069_v57 = vpop.permute.xlu2 %600 }
 0x288   :  { %v702_v4 = vpop.permute.xlu1 %701  ;;  %vm717_vm0 = vcmp.eq.s32.totalorder %v699_v56, 1  ;;  %v667_v56 = vpop.f32.mrf.mxu0  ;;  %vm615_vm3 = vcmp.eq.s32.totalorder %v3069_v57, 1 }
 0x289   :  { %vm718_vm13 = vcmp.eq.s32.totalorder %v702_v4, 1  ;;  %v725_v12 = vsel %vm717_vm0, %v661_v62, %v621_v13  ;;  %v516_v62 = vadd.f32 %v3021_v5, %v515_v26  ;;  %v668_v57 = vadd.f32 %v3031_v9, %v667_v56 }
 0x28a   :  { %v726_v61 = vsel %vm718_vm13, %v663_v1, %v622_v6  ;;  %v829_v21 = vsel %vm821_vm14, %v765_v30, %v725_v12  ;;  %v623_v7 = vsel %vm615_vm3, %v562_v53, %v514_v54  ;;  %v2269_v12 = vld [vmem:[%s3453_s10 + $0xd8] sm:$0xff]  ;;  %v567_v54 = vadd.f32 %v3026_v8, %v3067_v55 }
 0x28b   :  { %1694 = vmatpush.bf16.msra.mxu2 %v2269_v12 }
 0x28f   :  { %v806_v14 = vpop.permute.xlu0 %805  ;;  %v705_v23 = vpop.permute.xlu2 %704 }
 0x290   :  { %vm822_vm15 = vcmp.eq.s32.totalorder %v806_v14, 1  ;;  %v859_v19 = vpop.permute.xlu1 %858  ;;  %vm719_vm4 = vcmp.eq.s32.totalorder %v705_v23, 1  ;;  %v670_v37 = vpop.f32.mrf.mxu0 }
 0x291   :  { %v830_v2 = vsel %vm822_vm15, %v767_v11, %v726_v61  ;;  %vm877_vm2 = vcmp.eq.s32.totalorder %v859_v19, 1  ;;  %v727_v1 = vsel %vm719_vm4, %v666_v58, %v623_v7  ;;  %v2268_v61 = vld [vmem:[%s3453_s10 + $0xd0] sm:$0xff]  ;;  %v671_v56 = vadd.f32 %v3031_v9, %v670_v37 }
 0x292   :  { %v3083_v25 = vsel %vm878_vm1, %v830_v2, 0.0  ;;  %v3085_v20 = vsel %vm877_vm2, %v829_v21, 0.0  ;;  %v518_v2 = vpop.f32.mrf.mxu2  ;;  %1695 = vmatpush.bf16.msra.mxu2 %v2268_v61 }
 0x293   :  { %v894_v29 = vmax.f32 %v3083_v25, 0.0  ;;  %v893_v22 = vmax.f32 %v3085_v20, 0.0 }
 0x295   :  { %v3096_v34 = vpack.c.bf16 %v894_v29, %v893_v22 }
 0x297   :  { %v809_v35 = vpop.permute.xlu0 %808  ;;  %984 = vmatmul.bf16.gmra.mxu2 %v3096_v34  ;;  %1303 = vmatmul.bf16.gmra.mxu3 %v3096_v34  ;;  %v868_v49 = vpop.permute.xlu2 %867 }
 0x298   :  { %1399 = vmatmul.bf16.gmra.mxu0 %v3096_v34  ;;  %1551 = vmatmul.bf16.gmra.mxu1 %v3096_v34  ;;  %v604_v38 = vpop.permute.xlu1 %603  ;;  %vm823_vm5 = vcmp.eq.s32.totalorder %v809_v35, 1  ;;  %vm880_vm10 = vcmp.eq.s32.totalorder %v868_v49, 1  ;;  %v2267_v35 = vld [vmem:[%s3453_s10 + $0xc8] sm:$0xff]  ;;  %v672_v53 = vpop.f32.mrf.mxu0  ;;  %s2515_s10 = smov 125  }
 0x299   :  { %vm616_vm6 = vcmp.eq.s32.totalorder %v604_v38, 1  ;;  %v831_v30 = vsel %vm823_vm5, %v770_v60, %v727_v1  ;;  %v774_v38 = vpop.f32.mrf.mxu3  ;;  %1696 = vmatpush.bf16.msra.mxu2 %v2267_v35 }
 0x29a   :  { %v624_v13 = vsel %vm616_vm6, %v564_v17, %v516_v62  ;;  %v520_v50 = vpop.f32.mrf.mxu2  ;;  %v775_v59 = vadd.f32 %v3039_v18, %v774_v38  ;;  %v673_v62 = vadd.f32 %v3031_v9, %v672_v53 }
 0x29b   :  { %v521_v26 = vadd.f32 %v3021_v5, %v520_v50 }
 0x29d   :  { %1697 = vmatpush.bf16.msra.mxu2 %v2266_v42 }
 0x29f   :  { %v708_v51 = vpop.permute.xlu0 %707  ;;  %v607_v0 = vpop.permute.xlu2 %606 }
 0x2a0   :  { %v865_v4 = vpop.permute.xlu1 %864  ;;  %vm720_vm7 = vcmp.eq.s32.totalorder %v708_v51, 1  ;;  %v519_v51 = vadd.f32 %v3021_v5, %v518_v2  ;;  %vm617_vm11 = vcmp.eq.s32.totalorder %v607_v0, 1 }
 0x2a1   :  { %vm879_vm8 = vcmp.eq.s32.totalorder %v865_v4, 1  ;;  %v728_v24 = vsel %vm720_vm7, %v668_v57, %v624_v13  ;;  %v569_v4 = vadd.f32 %v3026_v8, %v3081_v15  ;;  %v776_v5 = vpop.f32.mrf.mxu3 }
 0x2a2   :  { %v3125_v6 = vsel %vm879_vm8, %v831_v30, 0.0  ;;  %v625_v28 = vsel %vm617_vm11, %v567_v54, %v519_v51  ;;  %v777_v0 = vadd.f32 %v3039_v18, %v776_v5  ;;  %v2348_v18 = vld [vmem:[#allocation7] ss:$0 sm:$0xff] }
 0x2a3   :  { %v895_v21 = vmax.f32 %v3125_v6, 0.0 }
 0x2a7   :  { %v812_v11 = vpop.permute.xlu0 %811  ;;  %v714_v39 = vpop.permute.xlu2 %713 }
 0x2a8   :  { %vm824_vm9 = vcmp.eq.s32.totalorder %v812_v11, 1  ;;  %v711_v49 = vpop.permute.xlu1 %710  ;;  %vm722_vm14 = vcmp.eq.s32.totalorder %v714_v39, 1 }
 0x2a9   :  { %v832_v14 = vsel %vm824_vm9, %v772_v10, %v728_v24  ;;  %vm721_vm0 = vcmp.eq.s32.totalorder %v711_v49, 1 }
 0x2aa   :  { %v3130_v19 = vsel %vm880_vm10, %v832_v14, 0.0  ;;  %v729_v57 = vsel %vm721_vm0, %v671_v56, %v625_v28 }
 0x2ab   :  { %v896_v23 = vmax.f32 %v3130_v19, 0.0 }
 0x2ad   :  { %v901_v32 = vpack.c.bf16 %v896_v23, %v895_v21 }
 0x2af   :  { %v815_v41 = vpop.permute.xlu0 %814  ;;  %989 = vmatmul.bf16.gmra.mxu2 %v901_v32  ;;  %1308 = vmatmul.bf16.gmra.mxu3 %v901_v32  ;;  %v871_v60 = vpop.permute.xlu2 %870 }
 0x2b0   :  { %1404 = vmatmul.bf16.gmra.mxu0 %v901_v32  ;;  %1556 = vmatmul.bf16.gmra.mxu1 %v901_v32  ;;  %vm825_vm13 = vcmp.eq.s32.totalorder %v815_v41, 1  ;;  %v818_v55 = vpop.permute.xlu1 %817  ;;  %vm881_vm15 = vcmp.eq.s32.totalorder %v871_v60, 1 }
 0x2b1   :  { %v833_v7 = vsel %vm825_vm13, %v775_v59, %v729_v57  ;;  %vm826_vm1 = vcmp.eq.s32.totalorder %v818_v55, 1 }
 0x2b2   :  { %v3154_v8 = vsel %vm881_vm15, %v833_v7, 0.0 }
 0x2b3   :  { %v897_v9 = vmax.f32 %v3154_v8, 0.0 }
 0x2b7   :  { %v610_v58 = vpop.permute.xlu0 %609 }
 0x2b8   :  { %vm618_vm12 = vcmp.eq.s32.totalorder %v610_v58, 1 }
 0x2b9   :  { %v626_v17 = vsel %vm618_vm12, %v569_v4, %v521_v26 }
 0x2ba   :  { %v730_v10 = vsel %vm722_vm14, %v673_v62, %v626_v17 }
 0x2bb   :  { %v834_v1 = vsel %vm826_vm1, %v777_v0, %v730_v10 }
 0x2bf   :  { %v874_v15 = vpop.permute.xlu0 %873 }
 0x2c0   :  { %vm882_vm2 = vcmp.eq.s32.totalorder %v874_v15, 1 }
 0x2c1   :  { %v3156_v13 = vsel %vm882_vm2, %v834_v1, 0.0 }
 0x2c2   :  { %v898_v30 = vmax.f32 %v3156_v13, 0.0 }
 0x2c4   :  { %v902_v11 = vpack.c.bf16 %v898_v30, %v897_v9 }
 0x2c6   :  { %994 = vmatmul.bf16.gmra.mxu2 %v902_v11  ;;  %1313 = vmatmul.bf16.gmra.mxu3 %v902_v11 }
 0x2c7   :  { %1409 = vmatmul.bf16.gmra.mxu0 %v902_v11  ;;  %1561 = vmatmul.bf16.gmra.mxu1 %v902_v11 }
 0x2d6   :  { %1698 = vmatmul.bf16.vlgmr.msra.gmra.mxu2 %v3061_v48 }
 0x2e6   :  { %1703 = vmatmul.bf16.gmra.mxu2 %v3096_v34 }
 0x2f6   :  { %1708 = vmatmul.bf16.gmra.mxu2 %v901_v32 }
 0x302   :  { %v980_v12 = vpop.f32.mrf.mxu2 }
 0x303   :  { %v3166_v24 = vadd.f32 %v2348_v18, %v980_v12 }
 0x305   :  { %1008 = vrot.lane.b32.xlu1 %v3166_v24, %s2511_s17 }
 0x306   :  { %1713 = vmatmul.bf16.gmra.mxu2 %v902_v11 }
 0x30a   :  { %v982_v14 = vpop.f32.mrf.mxu2 }
 0x30b   :  { %v3170_v61 = vadd.f32 %v2348_v18, %v982_v14 }
 0x30d   :  { %1010 = vrot.lane.b32.xlu2 %v3170_v61, %s2511_s17 }
 0x31a   :  { %v985_v2 = vpop.f32.mrf.mxu2 }
 0x31b   :  { %v3174_v35 = vadd.f32 %v2348_v18, %v985_v2 }
 0x31d   :  { %1012 = vrot.lane.b32.xlu0 %v3174_v35, %s2511_s17 }
 0x322   :  { %v987_v48 = vpop.f32.mrf.mxu2 }
 0x323   :  { %v3178_v34 = vadd.f32 %v2348_v18, %v987_v48 }
 0x325   :  { %1014 = vrot.lane.b32.xlu1 %v3178_v34, %s2511_s17 }
 0x332   :  { %v990_v32 = vpop.f32.mrf.mxu2 }
 0x333   :  { %v3182_v37 = vadd.f32 %v2348_v18, %v990_v32 }
 0x335   :  { %1016 = vrot.lane.b32.xlu2 %v3182_v37, %s2511_s17 }
 0x33a   :  { %v992_v38 = vpop.f32.mrf.mxu2 }
 0x33b   :  { %v3186_v39 = vadd.f32 %v2348_v18, %v992_v38 }
 0x33d   :  { %1018 = vrot.lane.b32.xlu0 %v3186_v39, %s2511_s17 }
 0x349   :  { %v995_v41 = vpop.f32.mrf.mxu2 }
 0x34a   :  { %v3190_v42 = vadd.f32 %v2348_v18, %v995_v41 }
 0x34c   :  { %1020 = vrot.lane.b32.xlu1 %v3190_v42, %s2511_s17 }
 0x351   :  { %v997_v49 = vpop.f32.mrf.mxu2 }
 0x352   :  { %v3194_v50 = vadd.f32 %v2348_v18, %v997_v49 }
 0x354   :  { %1022 = vrot.lane.b32.xlu2 %v3194_v50, %s2511_s17 }
 0x367   :  { %v1011_v51 = vpop.permute.xlu2 %1010 }
 0x368   :  { %vm1033_vm3 = vcmp.gt.f32.partialorder %v3170_v61, %v1011_v51 }
 0x369   :  { %v1049_v26 = vsel %vm1033_vm3, %v3170_v61, %v1011_v51  ;;  %v1041_v58 = vsel %vm1033_vm3, 1, %v2512_v33 }
 0x36a   :  { %1066 = vrot.lane.b32.xlu1 %v1049_v26, %s2511_s17 }
 0x377   :  { %v1009_v53 = vpop.permute.xlu1 %1008 }
 0x378   :  { %vm1032_vm4 = vcmp.gt.f32.partialorder %v3166_v24, %v1009_v53 }
 0x379   :  { %v1048_v54 = vsel %vm1032_vm4, %v3166_v24, %v1009_v53  ;;  %v1040_v56 = vsel %vm1032_vm4, 1, %v2512_v33 }
 0x37a   :  { %1064 = vrot.lane.b32.xlu0 %v1048_v54, %s2511_s17  ;;  %1096 = vrot.lane.b32.xlu2 %v1040_v56, %s2511_s17 }
 0x382   :  { %1098 = vrot.lane.b32.xlu0 %v1041_v58, %s2511_s17 }
 0x38f   :  { %v1013_v4 = vpop.permute.xlu0 %1012  ;;  %v1017_v62 = vpop.permute.xlu2 %1016 }
 0x390   :  { %vm1034_vm5 = vcmp.gt.f32.partialorder %v3174_v35, %v1013_v4  ;;  %vm1036_vm6 = vcmp.gt.f32.partialorder %v3182_v37, %v1017_v62 }
 0x391   :  { %v1042_v59 = vsel %vm1034_vm5, 1, %v2512_v33  ;;  %v1050_v60 = vsel %vm1034_vm5, %v3174_v35, %v1013_v4  ;;  %v1052_v28 = vsel %vm1036_vm6, %v3182_v37, %v1017_v62  ;;  %v1044_v55 = vsel %vm1036_vm6, 1, %v2512_v33 }
 0x392   :  { %1100 = vrot.lane.b32.xlu1 %v1042_v59, %s2511_s17  ;;  %1068 = vrot.lane.b32.xlu2 %v1050_v60, %s2511_s17 }
 0x397   :  { %v1015_v5 = vpop.permute.xlu1 %1014 }
 0x398   :  { %vm1035_vm7 = vcmp.gt.f32.partialorder %v3178_v34, %v1015_v5 }
 0x399   :  { %v1051_v17 = vsel %vm1035_vm7, %v3178_v34, %v1015_v5  ;;  %v1043_v57 = vsel %vm1035_vm7, 1, %v2512_v33 }
 0x39a   :  { %1072 = vrot.lane.b32.xlu1 %v1052_v28, %s2511_s17  ;;  %1070 = vrot.lane.b32.xlu0 %v1051_v17, %s2511_s17 }
 0x39b   :  { %1102 = vrot.lane.b32.xlu2 %v1043_v57, %s2511_s17 }
 0x3a2   :  { %1104 = vrot.lane.b32.xlu0 %v1044_v55, %s2511_s17 }
 0x3ae   :  { %v1023_v15 = vpop.permute.xlu2 %1022 }
 0x3af   :  { %v1019_v7 = vpop.permute.xlu0 %1018  ;;  %vm1039_vm9 = vcmp.gt.f32.partialorder %v3194_v50, %v1023_v15 }
 0x3b0   :  { %vm1037_vm8 = vcmp.gt.f32.partialorder %v3186_v39, %v1019_v7  ;;  %v1055_v1 = vsel %vm1039_vm9, %v3194_v50, %v1023_v15  ;;  %v1047_v14 = vsel %vm1039_vm9, 1, %v2512_v33 }
 0x3b1   :  { %v1045_v0 = vsel %vm1037_vm8, 1, %v2512_v33  ;;  %v1053_v10 = vsel %vm1037_vm8, %v3186_v39, %v1019_v7 }
 0x3b2   :  { %1106 = vrot.lane.b32.xlu1 %v1045_v0, %s2511_s17  ;;  %1074 = vrot.lane.b32.xlu2 %v1053_v10, %s2511_s17 }
 0x3ba   :  { %1078 = vrot.lane.b32.xlu1 %v1055_v1, %s2511_s17 }
 0x3be   :  { %v1021_v11 = vpop.permute.xlu1 %1020 }
 0x3bf   :  { %vm1038_vm10 = vcmp.gt.f32.partialorder %v3190_v42, %v1021_v11 }
 0x3c0   :  { %v1054_v18 = vsel %vm1038_vm10, %v3190_v42, %v1021_v11  ;;  %v1046_v12 = vsel %vm1038_vm10, 1, %v2512_v33 }
 0x3c1   :  { %1076 = vrot.lane.b32.xlu0 %v1054_v18, %s2511_s17  ;;  %1108 = vrot.lane.b32.xlu2 %v1046_v12, %s2511_s17 }
 0x3c9   :  { %1110 = vrot.lane.b32.xlu0 %v1047_v14, %s2511_s17 }
 0x3d4   :  { %v1097_v32 = vpop.permute.xlu2 %1096 }
 0x3dc   :  { %v1067_v2 = vpop.permute.xlu1 %1066 }
 0x3dd   :  { %vm1089_vm11 = vcmp.gt.f32.partialorder %v3170_v61, %v1067_v2 }
 0x3de   :  { %v1121_v48 = vsel %vm1089_vm11, %v3170_v61, %v1067_v2 }
 0x3df   :  { %1138 = vrot.lane.b32.xlu2 %v1121_v48, %s2511_s17 }
 0x3ec   :  { %v1065_v38 = vpop.permute.xlu0 %1064  ;;  %v1069_v51 = vpop.permute.xlu2 %1068 }
 0x3ed   :  { %vm1088_vm0 = vcmp.gt.f32.partialorder %v3166_v24, %v1065_v38  ;;  %vm1090_vm12 = vcmp.gt.f32.partialorder %v3174_v35, %v1069_v51 }
 0x3ee   :  { %v1120_v41 = vsel %vm1088_vm0, %v3166_v24, %v1065_v38  ;;  %v1112_v49 = vsel %vm1088_vm0, 2, %v1097_v32  ;;  %v1122_v54 = vsel %vm1090_vm12, %v3174_v35, %v1069_v51 }
 0x3ef   :  { %1136 = vrot.lane.b32.xlu1 %v1120_v41, %s2511_s17  ;;  %1168 = vrot.lane.b32.xlu0 %v1112_v49, %s2511_s17 }
 0x3f4   :  { %v1099_v26 = vpop.permute.xlu0 %1098 }
 0x3f5   :  { %v1113_v53 = vsel %vm1089_vm11, 2, %v1099_v26  ;;  %v1103_v4 = vpop.permute.xlu2 %1102 }
 0x3f7   :  { %1140 = vrot.lane.b32.xlu0 %v1122_v54, %s2511_s17  ;;  %1170 = vrot.lane.b32.xlu1 %v1113_v53, %s2511_s17 }
 0x404   :  { %v1101_v56 = vpop.permute.xlu1 %1100 }
 0x405   :  { %v1114_v58 = vsel %vm1090_vm12, 2, %v1101_v56 }
 0x406   :  { %1172 = vrot.lane.b32.xlu2 %v1114_v58, %s2511_s17 }
 0x40c   :  { %v1071_v59 = vpop.permute.xlu0 %1070  ;;  %v1073_v60 = vpop.permute.xlu1 %1072 }
 0x40d   :  { %vm1091_vm13 = vcmp.gt.f32.partialorder %v3178_v34, %v1071_v59  ;;  %vm1092_vm14 = vcmp.gt.f32.partialorder %v3182_v37, %v1073_v60  ;;  %v1075_v17 = vpop.permute.xlu2 %1074 }
 0x40e   :  { %v1115_v62 = vsel %vm1091_vm13, 2, %v1103_v4  ;;  %v1123_v5 = vsel %vm1091_vm13, %v3178_v34, %v1071_v59  ;;  %v1124_v28 = vsel %vm1092_vm14, %v3182_v37, %v1073_v60  ;;  %vm1093_vm15 = vcmp.gt.f32.partialorder %v3186_v39, %v1075_v17 }
 0x40f   :  { %1174 = vrot.lane.b32.xlu0 %v1115_v62, %s2511_s17  ;;  %1142 = vrot.lane.b32.xlu1 %v1123_v5, %s2511_s17  ;;  %v1125_v7 = vsel %vm1093_vm15, %v3186_v39, %v1075_v17 }
 0x410   :  { %1144 = vrot.lane.b32.xlu2 %v1124_v28, %s2511_s17 }
 0x414   :  { %v1105_v57 = vpop.permute.xlu0 %1104 }
 0x415   :  { %v1116_v55 = vsel %vm1092_vm14, 2, %v1105_v57 }
 0x417   :  { %1146 = vrot.lane.b32.xlu0 %v1125_v7, %s2511_s17  ;;  %1176 = vrot.lane.b32.xlu1 %v1116_v55, %s2511_s17 }
 0x41b   :  { %v1109_v18 = vpop.permute.xlu2 %1108 }
 0x424   :  { %v1107_v0 = vpop.permute.xlu1 %1106 }
 0x425   :  { %v1117_v10 = vsel %vm1093_vm15, 2, %v1107_v0 }
 0x426   :  { %1178 = vrot.lane.b32.xlu2 %v1117_v10, %s2511_s17 }
 0x42c   :  { %v1079_v15 = vpop.permute.xlu1 %1078 }
 0x42d   :  { %vm1095_vm1 = vcmp.gt.f32.partialorder %v3194_v50, %v1079_v15 }
 0x42e   :  { %v1127_v1 = vsel %vm1095_vm1, %v3194_v50, %v1079_v15 }
 0x42f   :  { %1150 = vrot.lane.b32.xlu2 %v1127_v1, %s2511_s17 }
 0x433   :  { %v1077_v11 = vpop.permute.xlu0 %1076 }
 0x434   :  { %vm1094_vm2 = vcmp.gt.f32.partialorder %v3190_v42, %v1077_v11 }
 0x435   :  { %v1118_v12 = vsel %vm1094_vm2, 2, %v1109_v18  ;;  %v1126_v14 = vsel %vm1094_vm2, %v3190_v42, %v1077_v11 }
 0x436   :  { %1180 = vrot.lane.b32.xlu0 %v1118_v12, %s2511_s17  ;;  %1148 = vrot.lane.b32.xlu1 %v1126_v14, %s2511_s17 }
 0x439   :  { %v1139_v54 = vpop.permute.xlu2 %1138 }
 0x43a   :  { %vm1161_vm8 = vcmp.gt.f32.partialorder %v3170_v61, %v1139_v54 }
 0x43b   :  { %v1111_v2 = vpop.permute.xlu0 %1110 }
 0x43c   :  { %v1119_v48 = vsel %vm1095_vm1, 2, %v1111_v2 }
 0x43e   :  { %1182 = vrot.lane.b32.xlu1 %v1119_v48, %s2511_s17 }
 0x460   :  { %v1173_v61 = vpop.permute.xlu2 %1172 }
 0x461   :  { %v1169_v32 = vpop.permute.xlu0 %1168  ;;  %v1137_v38 = vpop.permute.xlu1 %1136 }
 0x462   :  { %vm1160_vm3 = vcmp.gt.f32.partialorder %v3166_v24, %v1137_v38 }
 0x463   :  { %v1184_v41 = vsel %vm1160_vm3, 3, %v1169_v32 }
 0x464   :  { %vm1192_vm4 = vcmp.ne.s32.totalorder %v1184_v41, 0  ;;  %vm1719_vm5 = vcmp.eq.s32.totalorder %v1184_v41, 3  ;;  %vm1567_vm6 = vcmp.eq.s32.totalorder %v1184_v41, 2  ;;  %vm1415_vm7 = vcmp.eq.s32.totalorder %v1184_v41, 1 }
 0x465   :  { %v1727_v49 = vsel %vm1719_vm5, 1, %v2512_v33  ;;  %v1575_v51 = vsel %vm1567_vm6, 1, %v2512_v33  ;;  %v1423_v26 = vsel %vm1415_vm7, 1, %v2512_v33  ;;  %v2039_v53 = vsel %vm1192_vm4, 1.0, %v2514_v16 }
 0x466   :  { %1736 = vperm.xlu0 %2338, %v1727_v49   ;;  %1584 = vperm.xlu1 %2337, %v1575_v51   ;;  %v1216_v56 = vmul.f32 %v2039_v53, %v2826_v63 }
 0x467   :  { %1432 = vperm.xlu2 %2339, %v1423_v26  }
 0x468   :  { %vm1775_vm10 = vcmp.gt.f32.partialorder %v1216_v56, 0.0 }
 0x469   :  { %v1171_v24 = vpop.permute.xlu1 %1170  ;;  %v1783_v60 = vsel %vm1775_vm10, 1, %v2512_v33  ;;  %v1141_v63 = vpop.permute.xlu0 %1140 }
 0x46a   :  { %v1185_v58 = vsel %vm1161_vm8, 3, %v1171_v24  ;;  %vm1162_vm0 = vcmp.gt.f32.partialorder %v3174_v35, %v1141_v63  ;;  %v1145_v18 = vpop.permute.xlu2 %1144 }
 0x46b   :  { %vm1193_vm9 = vcmp.ne.s32.totalorder %v1185_v58, 0  ;;  %vm1416_vm11 = vcmp.eq.s32.totalorder %v1185_v58, 1  ;;  %vm1720_vm12 = vcmp.eq.s32.totalorder %v1185_v58, 3  ;;  %vm1568_vm14 = vcmp.eq.s32.totalorder %v1185_v58, 2 }
 0x46c   :  { %v2040_v4 = vsel %vm1193_vm9, 1.0, %v2514_v16  ;;  %v1424_v59 = vsel %vm1416_vm11, 1, %v2512_v33  ;;  %v1186_v5 = vsel %vm1162_vm0, 3, %v1173_v61  ;;  %v1728_v28 = vsel %vm1720_vm12, 1, %v2512_v33 }
 0x46d   :  { %v1217_v62 = vmul.f32 %v2040_v4, %v2850_v27  ;;  %v1576_v57 = vsel %vm1568_vm14, 1, %v2512_v33  ;;  %vm1194_vm15 = vcmp.ne.s32.totalorder %v1186_v5, 0  ;;  %vm1417_vm1 = vcmp.eq.s32.totalorder %v1186_v5, 1 }
 0x46e   :  { %1855 = vrot.lane.b32.xlu1 %v1216_v56, %s2515_s10  ;;  %1435 = vperm.xlu0 %2338, %v1424_v59   ;;  %vm1569_vm2 = vcmp.eq.s32.totalorder %v1186_v5, 2  ;;  %v2041_v27 = vsel %vm1194_vm15, 1.0, %v2514_v16  ;;  %v1425_v35 = vsel %vm1417_vm1, 1, %v2512_v33  ;;  %vm1721_vm5 = vcmp.eq.s32.totalorder %v1186_v5, 3 }
 0x46f   :  { %1792 = vperm.xlu2 %2339, %v1783_v60   ;;  %vm1776_vm13 = vcmp.gt.f32.partialorder %v1217_v62, 0.0  ;;  %v1577_v55 = vsel %vm1569_vm2, 1, %v2512_v33  ;;  %v1218_v7 = vmul.f32 %v2041_v27, %v2858_v36  ;;  %v1729_v11 = vsel %vm1721_vm5, 1, %v2512_v33 }
 0x470   :  { %v1784_v17 = vsel %vm1776_vm13, 1, %v2512_v33  ;;  %vm1164_vm10 = vcmp.gt.f32.partialorder %v3182_v37, %v1145_v18 }
 0x471   :  { %vm1777_vm3 = vcmp.gt.f32.partialorder %v1218_v7, 0.0 }
 0x472   :  { %v1785_v15 = vsel %vm1777_vm3, 1, %v2512_v33 }
 0x476   :  { %1739 = vperm.xlu1 %2337, %v1728_v28   ;;  %1795 = vperm.xlu0 %2338, %v1784_v17  }
 0x477   :  { %1587 = vperm.xlu2 %2339, %v1576_v57  }
 0x47e   :  { %1438 = vperm.xlu1 %2337, %v1425_v35   ;;  %1590 = vperm.xlu0 %2338, %v1577_v55  }
 0x47f   :  { %1857 = vrot.lane.b32.xlu2 %v1217_v62, %s2515_s10 }
 0x481   :  { %v1143_v0 = vpop.permute.xlu1 %1142  ;;  %v1175_v10 = vpop.permute.xlu0 %1174 }
 0x482   :  { %vm1163_vm4 = vcmp.gt.f32.partialorder %v3178_v34, %v1143_v0 }
 0x483   :  { %v1187_v1 = vsel %vm1163_vm4, 3, %v1175_v10 }
 0x484   :  { %vm1195_vm6 = vcmp.ne.s32.totalorder %v1187_v1, 0  ;;  %vm1722_vm7 = vcmp.eq.s32.totalorder %v1187_v1, 3  ;;  %vm1570_vm8 = vcmp.eq.s32.totalorder %v1187_v1, 2  ;;  %vm1418_vm9 = vcmp.eq.s32.totalorder %v1187_v1, 1  ;;  %v1395_v1 = vpop.f32.mrf.mxu0 }
 0x485   :  { %v2042_v34 = vsel %vm1195_vm6, 1.0, %v2514_v16  ;;  %v1730_v14 = vsel %vm1722_vm7, 1, %v2512_v33  ;;  %v1578_v2 = vsel %vm1570_vm8, 1, %v2512_v33  ;;  %v1426_v48 = vsel %vm1418_vm9, 1, %v2512_v33 }
 0x486   :  { %1798 = vperm.xlu1 %2337, %v1785_v15   ;;  %1859 = vrot.lane.b32.xlu0 %v1218_v7, %s2515_s10  ;;  %v1219_v32 = vmul.f32 %v2042_v34, %v2868_v47  ;;  %v1179_v47 = vpop.permute.xlu2 %1178 }
 0x487   :  { %1742 = vperm.xlu2 %2339, %v1729_v11   ;;  %v1299_v11 = vpop.f32.mrf.mxu3 }
 0x488   :  { %vm1778_vm12 = vcmp.gt.f32.partialorder %v1219_v32, 0.0 }
 0x489   :  { %v1177_v36 = vpop.permute.xlu1 %1176  ;;  %v1786_v41 = vsel %vm1778_vm12, 1, %v2512_v33  ;;  %v1147_v51 = vpop.permute.xlu0 %1146 }
 0x48a   :  { %v1188_v12 = vsel %vm1164_vm10, 3, %v1177_v36  ;;  %vm1165_vm13 = vcmp.gt.f32.partialorder %v3186_v39, %v1147_v51 }
 0x48b   :  { %vm1196_vm11 = vcmp.ne.s32.totalorder %v1188_v12, 0  ;;  %vm1419_vm0 = vcmp.eq.s32.totalorder %v1188_v12, 1  ;;  %vm1723_vm14 = vcmp.eq.s32.totalorder %v1188_v12, 3  ;;  %vm1571_vm1 = vcmp.eq.s32.totalorder %v1188_v12, 2  ;;  %v1547_v12 = vpop.f32.mrf.mxu1 }
 0x48c   :  { %v2043_v38 = vsel %vm1196_vm11, 1.0, %v2514_v16  ;;  %v1427_v37 = vsel %vm1419_vm0, 1, %v2512_v33  ;;  %v1189_v26 = vsel %vm1165_vm13, 3, %v1179_v47  ;;  %v1731_v53 = vsel %vm1723_vm14, 1, %v2512_v33 }
 0x48d   :  { %v1220_v49 = vmul.f32 %v2043_v38, %v2876_v52  ;;  %v1579_v56 = vsel %vm1571_vm1, 1, %v2512_v33  ;;  %vm1197_vm2 = vcmp.ne.s32.totalorder %v1189_v26, 0  ;;  %vm1420_vm3 = vcmp.eq.s32.totalorder %v1189_v26, 1 }
 0x48e   :  { %1745 = vperm.xlu0 %2338, %v1730_v14   ;;  %1593 = vperm.xlu1 %2337, %v1578_v2   ;;  %vm1572_vm4 = vcmp.eq.s32.totalorder %v1189_v26, 2  ;;  %v2044_v52 = vsel %vm1197_vm2, 1.0, %v2514_v16  ;;  %v1428_v39 = vsel %vm1420_vm3, 1, %v2512_v33  ;;  %vm1724_vm7 = vcmp.eq.s32.totalorder %v1189_v26, 3  ;;  %v1151_v62 = vpop.permute.xlu2 %1150  ;;  %v3344_v14 = vld [vmem:[#allocation8 + $0x1] ss:$0 sm:$0xff] }
 0x48f   :  { %1441 = vperm.xlu2 %2339, %v1426_v48   ;;  %vm1779_vm15 = vcmp.gt.f32.partialorder %v1220_v49, 0.0  ;;  %v1580_v24 = vsel %vm1572_vm4, 1, %v2512_v33  ;;  %v1221_v58 = vmul.f32 %v2044_v52, %v2898_v3  ;;  %v1732_v5 = vsel %vm1724_vm7, 1, %v2512_v33  ;;  %v3346_v2 = vld [vmem:[#allocation8] ss:$0 sm:$0xff] }
 0x490   :  { %v1787_v54 = vsel %vm1779_vm15, 1, %v2512_v33  ;;  %vm1167_vm9 = vcmp.gt.f32.partialorder %v3194_v50, %v1151_v62  ;;  %vm1879_vm3 = vcmask 7168   ;;  %v3348_v48 = vld [vmem:[#allocation8 + $0x2] ss:$0 sm:$0xff]  ;;  %v1396_v51 = vadd.f32 %v3344_v14, %v1395_v1  ;;  %v3358_v26 = vld [vmem:[#allocation8 + $0x3] ss:$0 sm:$0xff] }
 0x491   :  { %vm1780_vm6 = vcmp.gt.f32.partialorder %v1221_v58, 0.0  ;;  %v1300_v47 = vadd.f32 %v3346_v2, %v1299_v11 }
 0x492   :  { %v1788_v63 = vsel %vm1780_vm6, 1, %v2512_v33 }
 0x496   :  { %1861 = vrot.lane.b32.xlu1 %v1219_v32, %s2515_s10  ;;  %1444 = vperm.xlu0 %2338, %v1427_v37   ;;  %v1397_v32 = vpop.f32.mrf.mxu0 }
 0x497   :  { %1801 = vperm.xlu2 %2339, %v1786_v41   ;;  %v1301_v41 = vpop.f32.mrf.mxu3 }
 0x498   :  { %v1302_v52 = vadd.f32 %v3346_v2, %v1301_v41 }
 0x49e   :  { %1748 = vperm.xlu1 %2337, %v1731_v53   ;;  %1804 = vperm.xlu0 %2338, %v1787_v54   ;;  %v1548_v53 = vadd.f32 %v3348_v48, %v1547_v12  ;;  %v1398_v54 = vadd.f32 %v3344_v14, %v1397_v32 }
 0x49f   :  { %1596 = vperm.xlu2 %2339, %v1579_v56   ;;  %v1549_v56 = vpop.f32.mrf.mxu1 }
 0x4a6   :  { %1447 = vperm.xlu1 %2337, %v1428_v39   ;;  %1599 = vperm.xlu0 %2338, %v1580_v24  }
 0x4a7   :  { %1863 = vrot.lane.b32.xlu2 %v1220_v49, %s2515_s10 }
 0x4a8   :  { %v1181_v4 = vpop.permute.xlu0 %1180  ;;  %v1149_v59 = vpop.permute.xlu1 %1148 }
 0x4a9   :  { %vm1166_vm5 = vcmp.gt.f32.partialorder %v3190_v42, %v1149_v59 }
 0x4aa   :  { %v1190_v60 = vsel %vm1166_vm5, 3, %v1181_v4 }
 0x4ab   :  { %vm1725_vm8 = vcmp.eq.s32.totalorder %v1190_v60, 3  ;;  %vm1198_vm10 = vcmp.ne.s32.totalorder %v1190_v60, 0  ;;  %vm1573_vm0 = vcmp.eq.s32.totalorder %v1190_v60, 2  ;;  %vm1421_vm13 = vcmp.eq.s32.totalorder %v1190_v60, 1 }
 0x4ac   :  { %v1733_v61 = vsel %vm1725_vm8, 1, %v2512_v33  ;;  %v2045_v17 = vsel %vm1198_vm10, 1.0, %v2514_v16  ;;  %v1581_v57 = vsel %vm1573_vm0, 1, %v2512_v33  ;;  %v1429_v35 = vsel %vm1421_vm13, 1, %v2512_v33 }
 0x4ad   :  { %v1222_v55 = vmul.f32 %v2045_v17, %v2968_v44  ;;  %v1550_v60 = vadd.f32 %v3348_v48, %v1549_v56 }
 0x4ae   :  { %1807 = vperm.xlu1 %2337, %v1788_v63   ;;  %1754 = vperm.xlu0 %2338, %v1733_v61  }
 0x4af   :  { %1751 = vperm.xlu2 %2339, %v1732_v5   ;;  %vm1781_vm1 = vcmp.gt.f32.partialorder %v1222_v55, 0.0 }
 0x4b0   :  { %v1183_v3 = vpop.permute.xlu1 %1182 }
 0x4b1   :  { %v1191_v28 = vsel %vm1167_vm9, 3, %v1183_v3 }
 0x4b2   :  { %vm1199_vm11 = vcmp.ne.s32.totalorder %v1191_v28, 0  ;;  %vm1422_vm12 = vcmp.eq.s32.totalorder %v1191_v28, 1  ;;  %vm1726_vm14 = vcmp.eq.s32.totalorder %v1191_v28, 3  ;;  %vm1574_vm2 = vcmp.eq.s32.totalorder %v1191_v28, 2 }
 0x4b3   :  { %v2046_v42 = vsel %vm1199_vm11, 1.0, %v2514_v16  ;;  %v1430_v27 = vsel %vm1422_vm12, 1, %v2512_v33  ;;  %v1734_v16 = vsel %vm1726_vm14, 1, %v2512_v33  ;;  %v1582_v0 = vsel %vm1574_vm2, 1, %v2512_v33 }
 0x4b4   :  { %v1223_v50 = vmul.f32 %v2046_v42, %v2938_v31  ;;  %v1789_v31 = vsel %vm1781_vm1, 1, %v2512_v33 }
 0x4b6   :  { %1602 = vperm.xlu1 %2337, %v1581_v57   ;;  %1453 = vperm.xlu0 %2338, %v1430_v27   ;;  %vm1782_vm15 = vcmp.gt.f32.partialorder %v1223_v50, 0.0 }
 0x4b7   :  { %1450 = vperm.xlu2 %2339, %v1429_v35   ;;  %v1790_v7 = vsel %vm1782_vm15, 1, %v2512_v33  ;;  %v1699_v33 = vpop.f32.mrf.mxu2 }
 0x4b8   :  { %v1700_v4 = vadd.f32 %v3358_v26, %v1699_v33 }
 0x4be   :  { %1757 = vperm.xlu1 %2337, %v1734_v16   ;;  %1813 = vperm.xlu0 %2338, %v1790_v7   ;;  %v1400_v16 = vpop.f32.mrf.mxu0  ;;  %v1304_v7 = vpop.f32.mrf.mxu3 }
 0x4bf   :  { %1810 = vperm.xlu2 %2339, %v1789_v31   ;;  %v1701_v24 = vpop.f32.mrf.mxu2  ;;  %v1552_v31 = vpop.f32.mrf.mxu1  ;;  %v1401_v43 = vadd.f32 %v3344_v14, %v1400_v16 }
 0x4c0   :  { %v1702_v62 = vadd.f32 %v3358_v26, %v1701_v24 }
 0x4c1   :  { %v1433_v44 = vpop.permute.xlu2 %1432 }
 0x4c2   :  { %vm1455_vm4 = vcmp.eq.s32.totalorder %v1433_v44, 1 }
 0x4c3   :  { %v1463_v39 = vsel %vm1455_vm4, %v1396_v51, %v1300_v47 }
 0x4c6   :  { %1867 = vrot.lane.b32.xlu1 %v1222_v55, %s2515_s10  ;;  %1865 = vrot.lane.b32.xlu0 %v1221_v58, %s2515_s10 }
 0x4c7   :  { %1605 = vperm.xlu2 %2339, %v1582_v0   ;;  %v1704_v44 = vpop.f32.mrf.mxu2  ;;  %v1554_v1 = vpop.f32.mrf.mxu1 }
 0x4c8   :  { %v1555_v33 = vadd.f32 %v3348_v48, %v1554_v1  ;;  %v1705_v32 = vadd.f32 %v3358_v26, %v1704_v44 }
 0x4c9   :  { %v1793_v10 = vpop.permute.xlu2 %1792 }
 0x4ca   :  { %vm1815_vm11 = vcmp.eq.s32.totalorder %v1793_v10, 1  ;;  %v1306_v10 = vpop.f32.mrf.mxu3 }
 0x4cb   :  { %v1307_v12 = vadd.f32 %v3346_v2, %v1306_v10 }
 0x4cf   :  { %1869 = vrot.lane.b32.xlu2 %v1223_v50, %s2515_s10  ;;  %v1706_v11 = vpop.f32.mrf.mxu2 }
 0x4d1   :  { %v1588_v15 = vpop.permute.xlu2 %1587 }
 0x4d2   :  { %vm1608_vm8 = vcmp.eq.s32.totalorder %v1588_v15, 1 }
 0x4d8   :  { %v1737_v18 = vpop.permute.xlu0 %1736  ;;  %v1585_v36 = vpop.permute.xlu1 %1584 }
 0x4d9   :  { %v1858_v34 = vpop.permute.xlu2 %1857  ;;  %vm1607_vm5 = vcmp.eq.s32.totalorder %v1585_v36, 1  ;;  %vm1759_vm7 = vcmp.eq.s32.totalorder %v1737_v18, 1  ;;  %v1553_v36 = vadd.f32 %v3348_v48, %v1552_v31 }
 0x4da   :  { %1881 = vst.msk [vmem:[%s3457_s14 + $0x8] sm:$0xff] %vm1879_vm3, %v1858_v34  ;;  %v1615_v58 = vsel %vm1607_vm5, %v1548_v53, %v1463_v39 }
 0x4db   :  { %v1767_v63 = vsel %vm1759_vm7, %v1700_v4, %v1615_v58 }
 0x4dc   :  { %v1823_v17 = vsel %vm1815_vm11, %v1767_v63, %v891_v45  ;;  %v1305_v45 = vadd.f32 %v3346_v2, %v1304_v7  ;;  %v1557_v63 = vpop.f32.mrf.mxu1 }
 0x4dd   :  { %v1558_v31 = vadd.f32 %v3348_v48, %v1557_v63 }
 0x4e0   :  { %v1436_v38 = vpop.permute.xlu0 %1435  ;;  %v1856_v37 = vpop.permute.xlu1 %1855 }
 0x4e1   :  { %v3350_v49 = vpop.permute.xlu2 %1742  ;;  %1880 = vst.msk [vmem:[%s3457_s14] sm:$0xff] %vm1879_vm3, %v1856_v37  ;;  %vm1456_vm6 = vcmp.eq.s32.totalorder %v1436_v38, 1  ;;  %v1707_v38 = vadd.f32 %v3358_v26, %v1706_v11 }
 0x4e2   :  { %v1464_v59 = vsel %vm1456_vm6, %v1398_v54, %v1302_v52  ;;  %vm1761_vm2 = vcmp.eq.s32.totalorder %v3350_v49, 1 }
 0x4e3   :  { %v1616_v28 = vsel %vm1608_vm8, %v1550_v60, %v1464_v59 }
 0x4e8   :  { %v1796_v61 = vpop.permute.xlu0 %1795  ;;  %v1740_v5 = vpop.permute.xlu1 %1739 }
 0x4e9   :  { %vm1816_vm9 = vcmp.eq.s32.totalorder %v1796_v61, 1  ;;  %v1442_v3 = vpop.permute.xlu2 %1441  ;;  %vm1760_vm10 = vcmp.eq.s32.totalorder %v1740_v5, 1  ;;  %v1709_v61 = vpop.f32.mrf.mxu2 }
 0x4ea   :  { %v1768_v42 = vsel %vm1760_vm10, %v1702_v62, %v1616_v28  ;;  %vm1458_vm13 = vcmp.eq.s32.totalorder %v1442_v3, 1  ;;  %v1309_v62 = vpop.f32.mrf.mxu3 }
 0x4eb   :  { %v1824_v57 = vsel %vm1816_vm9, %v1768_v42, %v892_v46  ;;  %v1402_v46 = vpop.f32.mrf.mxu0 }
 0x4ec   :  { %v2297_v27 = vpack.c.bf16 %v1824_v57, %v1823_v17  ;;  %v1403_v34 = vadd.f32 %v3344_v14, %v1402_v46  ;;  %v1310_v57 = vadd.f32 %v3346_v2, %v1309_v62 }
 0x4ee   :  { %2298 = vst [vmem:[#allocation11] sm:$0xff] %v2297_v27   ;;  %v1466_v47 = vsel %vm1458_vm13, %v1403_v34, %v1307_v12 }
 0x4f0   :  { %v1591_v35 = vpop.permute.xlu0 %1590  ;;  %v1439_v50 = vpop.permute.xlu1 %1438 }
 0x4f1   :  { %v1802_v55 = vpop.permute.xlu2 %1801  ;;  %vm1457_vm0 = vcmp.eq.s32.totalorder %v1439_v50, 1  ;;  %vm1609_vm12 = vcmp.eq.s32.totalorder %v1591_v35, 1  ;;  %v1711_v50 = vpop.f32.mrf.mxu2 }
 0x4f2   :  { %v1465_v18 = vsel %vm1457_vm0, %v1401_v43, %v1305_v45  ;;  %vm1818_vm4 = vcmp.eq.s32.totalorder %v1802_v55, 1  ;;  %v1311_v25 = vpop.f32.mrf.mxu3  ;;  %v1712_v10 = vadd.f32 %v3358_v26, %v1711_v50 }
 0x4f3   :  { %v1617_v37 = vsel %vm1609_vm12, %v1553_v36, %v1465_v18  ;;  %v1405_v60 = vpop.f32.mrf.mxu0  ;;  %v1312_v35 = vadd.f32 %v3346_v2, %v1311_v25 }
 0x4f4   :  { %v1769_v56 = vsel %vm1761_vm2, %v1705_v32, %v1617_v37  ;;  %v1406_v28 = vadd.f32 %v3344_v14, %v1405_v60 }
 0x4f8   :  { %v1860_v0 = vpop.permute.xlu0 %1859  ;;  %v1799_v15 = vpop.permute.xlu1 %1798 }
 0x4f9   :  { %1882 = vst.msk [vmem:[%s3457_s14 + $0x10] sm:$0xff] %vm1879_vm3, %v1860_v0  ;;  %v3374_v40 = vpop.permute.xlu2 %1596  ;;  %vm1817_vm14 = vcmp.eq.s32.totalorder %v1799_v15, 1  ;;  %v1710_v15 = vadd.f32 %v3358_v26, %v1709_v61  ;;  %v1714_v32 = vpop.f32.mrf.mxu2 }
 0x4fa   :  { %v1825_v39 = vsel %vm1817_vm14, %v1769_v56, %v893_v22  ;;  %vm1611_vm9 = vcmp.eq.s32.totalorder %v3374_v40, 1  ;;  %v1314_v46 = vpop.f32.mrf.mxu3 }
 0x4fb   :  { %v1407_v3 = vpop.f32.mrf.mxu0  ;;  %v1315_v56 = vadd.f32 %v3346_v2, %v1314_v46 }
 0x4fc   :  { %v1408_v27 = vadd.f32 %v3344_v14, %v1407_v3 }
 0x500   :  { %v1746_v41 = vpop.permute.xlu0 %1745  ;;  %v1594_v51 = vpop.permute.xlu1 %1593 }
 0x501   :  { %vm1762_vm15 = vcmp.eq.s32.totalorder %v1746_v41, 1  ;;  %v1864_v53 = vpop.permute.xlu2 %1863  ;;  %vm1610_vm1 = vcmp.eq.s32.totalorder %v1594_v51, 1 }
 0x502   :  { %1884 = vst.msk [vmem:[%s3457_s14 + $0x20] sm:$0xff] %vm1879_vm3, %v1864_v53  ;;  %v1618_v54 = vsel %vm1610_vm1, %v1555_v33, %v1466_v47  ;;  %v1316_v47 = vpop.f32.mrf.mxu3 }
 0x503   :  { %v1770_v52 = vsel %vm1762_vm15, %v1707_v38, %v1618_v54  ;;  %v1410_v0 = vpop.f32.mrf.mxu0 }
 0x504   :  { %v1826_v24 = vsel %vm1818_vm4, %v1770_v52, %v894_v29  ;;  %v1559_v29 = vpop.f32.mrf.mxu1  ;;  %v1411_v54 = vadd.f32 %v3344_v14, %v1410_v0 }
 0x505   :  { %v2302_v58 = vpack.c.bf16 %v1826_v24, %v1825_v39  ;;  %v1560_v44 = vadd.f32 %v3348_v48, %v1559_v29  ;;  %v1716_v39 = vpop.f32.mrf.mxu2 }
 0x507   :  { %2317 = vst [vmem:[#allocation11 + $0x8] sm:$0xff] %v2302_v58   ;;  %v1715_v58 = vadd.f32 %v3358_v26, %v1714_v32 }
 0x508   :  { %v1445_v4 = vpop.permute.xlu0 %1444  ;;  %v1862_v59 = vpop.permute.xlu1 %1861 }
 0x509   :  { %v1752_v49 = vpop.permute.xlu2 %1751  ;;  %1883 = vst.msk [vmem:[%s3457_s14 + $0x18] sm:$0xff] %vm1879_vm3, %v1862_v59  ;;  %vm1459_vm5 = vcmp.eq.s32.totalorder %v1445_v4, 1 }
 0x50a   :  { %v1467_v16 = vsel %vm1459_vm5, %v1406_v28, %v1310_v57  ;;  %vm1764_vm11 = vcmp.eq.s32.totalorder %v1752_v49, 1  ;;  %v1717_v49 = vadd.f32 %v3358_v26, %v1716_v39 }
 0x50b   :  { %v1619_v43 = vsel %vm1611_vm9, %v1558_v31, %v1467_v16  ;;  %v1412_v37 = vpop.f32.mrf.mxu0 }
 0x50c   :  { %v1562_v12 = vpop.f32.mrf.mxu1  ;;  %v1413_v19 = vadd.f32 %v3344_v14, %v1412_v37 }
 0x50d   :  { %v1563_v6 = vadd.f32 %v3348_v48, %v1562_v12 }
 0x510   :  { %v1805_v5 = vpop.permute.xlu0 %1804  ;;  %v1749_v20 = vpop.permute.xlu1 %1748 }
 0x511   :  { %v1451_v22 = vpop.permute.xlu2 %1450  ;;  %vm1763_vm8 = vcmp.eq.s32.totalorder %v1749_v20, 1  ;;  %vm1819_vm10 = vcmp.eq.s32.totalorder %v1805_v5, 1 }
 0x512   :  { %v1771_v1 = vsel %vm1763_vm8, %v1710_v15, %v1619_v43  ;;  %vm1461_vm12 = vcmp.eq.s32.totalorder %v1451_v22, 1 }
 0x513   :  { %v1827_v33 = vsel %vm1819_vm10, %v1771_v1, %v895_v21  ;;  %v1469_v52 = vsel %vm1461_vm12, %v1411_v54, %v1315_v56 }
 0x514   :  { %v1564_v21 = vpop.f32.mrf.mxu1 }
 0x515   :  { %v1565_v59 = vadd.f32 %v3348_v48, %v1564_v21 }
 0x518   :  { %v1600_v42 = vpop.permute.xlu0 %1599  ;;  %v1448_v17 = vpop.permute.xlu1 %1447 }
 0x519   :  { %v3401_v55 = vpop.permute.xlu2 %1810  ;;  %vm1460_vm6 = vcmp.eq.s32.totalorder %v1448_v17, 1  ;;  %vm1612_vm7 = vcmp.eq.s32.totalorder %v1600_v42, 1 }
 0x51a   :  { %v1468_v7 = vsel %vm1460_vm6, %v1408_v27, %v1312_v35  ;;  %vm1821_vm5 = vcmp.eq.s32.totalorder %v3401_v55, 1 }
 0x51b   :  { %v1620_v45 = vsel %vm1612_vm7, %v1560_v44, %v1468_v7 }
 0x51c   :  { %v1772_v34 = vsel %vm1764_vm11, %v1712_v10, %v1620_v45 }
 0x520   :  { %v1755_v11 = vpop.permute.xlu0 %1754  ;;  %v1808_v18 = vpop.permute.xlu1 %1807 }
 0x521   :  { %v1606_v36 = vpop.permute.xlu2 %1605  ;;  %vm1820_vm0 = vcmp.eq.s32.totalorder %v1808_v18, 1  ;;  %vm1765_vm15 = vcmp.eq.s32.totalorder %v1755_v11, 1 }
 0x522   :  { %v1828_v40 = vsel %vm1820_vm0, %v1772_v34, %v896_v23  ;;  %v1317_v23 = vadd.f32 %v3346_v2, %v1316_v47  ;;  %vm1614_vm1 = vcmp.eq.s32.totalorder %v1606_v36, 1 }
 0x523   :  { %v2307_v38 = vpack.c.bf16 %v1828_v40, %v1827_v33 }
 0x525   :  { %2318 = vst [vmem:[#allocation11 + $0x10] sm:$0xff] %v2307_v38  }
 0x528   :  { %v1454_v41 = vpop.permute.xlu0 %1453  ;;  %v1603_v51 = vpop.permute.xlu1 %1602 }
 0x529   :  { %v1870_v53 = vpop.permute.xlu2 %1869  ;;  %vm1613_vm13 = vcmp.eq.s32.totalorder %v1603_v51, 1  ;;  %vm1462_vm14 = vcmp.eq.s32.totalorder %v1454_v41, 1 }
 0x52a   :  { %1887 = vst.msk [vmem:[%s3457_s14 + $0x38] sm:$0xff] %vm1879_vm3, %v1870_v53  ;;  %v1621_v24 = vsel %vm1613_vm13, %v1563_v6, %v1469_v52  ;;  %v1470_v4 = vsel %vm1462_vm14, %v1413_v19, %v1317_v23 }
 0x52b   :  { %v1773_v60 = vsel %vm1765_vm15, %v1715_v58, %v1621_v24  ;;  %v1622_v14 = vsel %vm1614_vm1, %v1565_v59, %v1470_v4 }
 0x52c   :  { %v1829_v48 = vsel %vm1821_vm5, %v1773_v60, %v897_v9 }
 0x530   :  { %v1814_v62 = vpop.permute.xlu0 %1813  ;;  %v1758_v63 = vpop.permute.xlu1 %1757 }
 0x531   :  { %vm1822_vm2 = vcmp.eq.s32.totalorder %v1814_v62, 1  ;;  %vm1766_vm4 = vcmp.eq.s32.totalorder %v1758_v63, 1 }
 0x532   :  { %v1774_v2 = vsel %vm1766_vm4, %v1717_v49, %v1622_v14 }
 0x533   :  { %v1830_v26 = vsel %vm1822_vm2, %v1774_v2, %v898_v30 }
 0x534   :  { %v2312_v61 = vpack.c.bf16 %v1830_v26, %v1829_v48 }
 0x536   :  { %2319 = vst [vmem:[#allocation11 + $0x18] sm:$0xff] %v2312_v61  }
 0x537   :  { %1913 = dma.vmem_to_hbm [thread:$0]  %s1906_s4, 512, %s1908_s28, [#allocation12], %s2506_s21, %s2506_s21, %s2507_s22  }
 0x538   :  { %v1866_v5 = vpop.permute.xlu0 %1865  ;;  %v1868_v20 = vpop.permute.xlu1 %1867 }
 0x539   :  { %1885 = vst.msk [vmem:[%s3457_s14 + $0x28] sm:$0xff] %vm1879_vm3, %v1866_v5 }
 0x53a   :  { %1886 = vst.msk [vmem:[%s3457_s14 + $0x30] sm:$0xff] %vm1879_vm3, %v1868_v20 }
 0x53b   :  { %2501 = dma.done.wait [#allocation4], 512  }
 0x53c   :  { %2502 = vsyncadd [#allocation4], 4294966784 }
 0x53d   :  { %2503 = dma.done.wait [#allocation12], 512  }
 0x53e   :  { %2504 = vsyncadd [#allocation12], 4294966784 }
 0x53f   :  { %1926 = vsyncpa [#allocation3], 1 }
 0x540   :  { %1927 = vsyncpa [#allocation6], 1 }
 0x541   :  { %1928 = vsyncpa [#allocation9], 1 }
 0x542   :  { %1929 = vsyncpa [#allocation4], 1 }
 0x543   :  { %1930 = vsyncpa [#allocation12], 1 }

</bundles_post_ra>
